<compile_context>
chip_gen: v6e
topology: v6e:2x2x1
jax: 0.10.0
libtpu: 0.0.40
codegen_flags: <defaults>
</compile_context>

<pallas_src>
import functools

import jax
import jax.numpy as jnp
from jax.experimental import pallas as pl
from jax.experimental.pallas import tpu as pltpu

EPS = 1e-5
NEG_SLOPE = 0.2


def _leaky_relu(x):
    return jnp.where(x >= 0, x, NEG_SLOPE * x)


def _vmem_budget():
    """(scoped vmem limit to request, per-step working-set budget) in bytes."""
    try:
        cap = int(pltpu.get_tpu_info().vmem_capacity_bytes)
    except Exception:
        cap = 64 << 20                      # conservative (v7x per-TC VMEM)
    limit = min((cap * 3) // 4, 100 << 20)  # 48 MiB on v7x, ~96 MiB on v5e/v6e
    tile_budget = min(int(limit * 0.55), 36 << 20)
    return limit, tile_budget


def _choose_tile_s(S, c_in, c_out, tile_budget, max_lanes):
    """Pick (tS, n_tiles, S_pad) for the tiled path.

    tS is a multiple of 128 sized from the VMEM budget (x triple-buffered,
    intermediates, double-buffered output).  Prefers exact divisors of S
    (no padding / no output copy); otherwise pads and corrects analytically.
    """
    bytes_per_lane = 4 * (3 * c_in + 8 * c_out)
    cap = (tile_budget // bytes_per_lane) // 128 * 128
    cap = int(max(128, min(max_lanes, cap)))
    if S % 128 == 0:
        if S <= cap:
            return S, 1, S
        for ts in range(cap, 127, -128):
            if S % ts == 0:
                return ts, S // ts, S
        return 128, S // 128, S
    # Non-128-divisible spatial extent: pad to n_tiles * tS (even tile count for
    # the megacore split), stats are corrected analytically, output is sliced.
    ts = min(cap, ((S + 127) // 128) * 128)
    n_tiles = -(-S // ts)
    if n_tiles > 1 and n_tiles % 2 == 1:
        n_tiles += 1
    return ts, n_tiles, ts * n_tiles


# --------------------------- kernel bodies ----------------------------------


def _fused_kernel(x_ref, w1_ref, w2_ref, p_ref, gb_ref, m_ref, o_ref, *, count):
    """Whole DoubleConvK1 for one sample, fully VMEM-resident.

    x_ref: (C_in, S); w1: (C_out, C_in); w2: (C_out, C_out)
    p_ref: (C_out, 2) = [b1 | b2]; gb_ref: (C_out, 4) = [g1 | be1 | g2 | be2]
    m_ref: (C_out, G) group-membership mask (0/1).
    """
    mask = m_ref[...]
    inv_count = 1.0 / count

    def gn_lrelu(h, gamma, beta):
        sum_c = jnp.sum(h, axis=1, keepdims=True)                            # (C,1)
        mean_g = jnp.sum(sum_c * mask, axis=0, keepdims=True) * inv_count    # (1,G)
        mean_c = jnp.sum(mask * mean_g, axis=1, keepdims=True)               # (C,1)
        cen = h - mean_c
        ss_c = jnp.sum(cen * cen, axis=1, keepdims=True)                     # (C,1)
        var_g = jnp.sum(ss_c * mask, axis=0, keepdims=True) * inv_count      # (1,G)
        inv_g = jax.lax.rsqrt(var_g + EPS)
        inv_c = jnp.sum(mask * inv_g, axis=1, keepdims=True)                 # (C,1)
        return _leaky_relu(cen * (gamma * inv_c) + beta)

    h1 = jnp.dot(w1_ref[...], x_ref[...],
                 preferred_element_type=jnp.float32) + p_ref[:, 0:1]
    y1 = gn_lrelu(h1, gb_ref[:, 0:1], gb_ref[:, 1:2])
    h2 = jnp.dot(w2_ref[...], y1,
                 preferred_element_type=jnp.float32) + p_ref[:, 1:2]
    o_ref[...] = gn_lrelu(h2, gb_ref[:, 2:3], gb_ref[:, 3:4]).astype(o_ref.dtype)


def _stats1_kernel(x_ref, w1_ref, s_ref):
    # Accumulate per-channel [sum, sumsq] of z1 = W1 x (bias-free -> well
    # conditioned; zero-padded columns contribute exactly nothing).
    @pl.when(pl.program_id(2) == 0)
    def _():
        s_ref[...] = jnp.zeros_like(s_ref)

    z = jnp.dot(w1_ref[...], x_ref[...], preferred_element_type=jnp.float32)
    s_ref[...] += jnp.concatenate(
        [jnp.sum(z, axis=1, keepdims=True),
         jnp.sum(z * z, axis=1, keepdims=True)], axis=1)


def _stats2_kernel(x_ref, w1_ref, w2_ref, p_ref, af1_ref, s_ref):
    # Recompute h1, apply GN1+LReLU via the folded (scale, shift), accumulate
    # per-channel [sum, sumsq] of z2 = W2 y1 (bias-free).
    @pl.when(pl.program_id(2) == 0)
    def _():
        s_ref[...] = jnp.zeros_like(s_ref)

    h1 = jnp.dot(w1_ref[...], x_ref[...],
                 preferred_element_type=jnp.float32) + p_ref[:, 0:1]
    y1 = _leaky_relu(h1 * af1_ref[:, 0:1] + af1_ref[:, 1:2])
    z2 = jnp.dot(w2_ref[...], y1, preferred_element_type=jnp.float32)
    s_ref[...] += jnp.concatenate(
        [jnp.sum(z2, axis=1, keepdims=True),
         jnp.sum(z2 * z2, axis=1, keepdims=True)], axis=1)


def _apply_kernel(x_ref, w1_ref, w2_ref, p_ref, af_ref, o_ref):
    # af_ref: (C_out, 4) = [scale1 | shift1 | scale2 | shift2] (per sample)
    h1 = jnp.dot(w1_ref[...], x_ref[...],
                 preferred_element_type=jnp.float32) + p_ref[:, 0:1]
    y1 = _leaky_relu(h1 * af_ref[:, 0:1] + af_ref[:, 1:2])
    h2 = jnp.dot(w2_ref[...], y1,
                 preferred_element_type=jnp.float32) + p_ref[:, 1:2]
    o_ref[...] = _leaky_relu(h2 * af_ref[:, 2:3] + af_ref[:, 3:4]).astype(o_ref.dtype)


# --------------------------- JAX glue (tiled path) ---------------------------


def _gn_fold(stats, bias, gamma, beta, num_groups, S_real, pad_cnt=0, z_pad=None):
    """Fold per-channel [sum(z), sum(z^2)] of z = h - bias into per-channel
    GroupNorm (scale, shift), using shifted sums (exact, well conditioned)."""
    s = stats.sum(axis=1)                                        # (N, C, 2)
    if pad_cnt and z_pad is not None:
        s = s - float(pad_cnt) * jnp.stack([z_pad, z_pad * z_pad], axis=-1)
    n, C, _ = s.shape
    cpg = C // num_groups
    cnt = float(cpg * S_real)
    sz = s[..., 0].reshape(n, num_groups, cpg)
    szz = s[..., 1].reshape(n, num_groups, cpg)
    bg = bias.reshape(1, num_groups, cpg)
    mean = (sz.sum(-1) + float(S_real) * bg.sum(-1)) / cnt       # (N, G)
    d = bg - mean[:, :, None]                                    # (N, G, cpg)
    var = (szz + 2.0 * d * sz + float(S_real) * d * d).sum(-1) / cnt
    var = jnp.maximum(var, 0.0)
    inv = jax.lax.rsqrt(var + EPS)
    mean_c = jnp.repeat(mean, cpg, axis=1)                       # (N, C)
    inv_c = jnp.repeat(inv, cpg, axis=1)
    scale = gamma[None, :] * inv_c
    shift = beta[None, :] - mean_c * scale
    return scale, shift


# --------------------------- wrapper paths ------------------------------------


def _fast_path(x_ncs, w1, b1, g1, be1, w2, b2, g2, be2, num_groups, vmem_limit):
    N, C_in, S = x_ncs.shape
    C_out = w1.shape[0]
    cpg = C_out // num_groups
    count = float(cpg * S)

    params = jnp.stack([b1, b2], axis=-1)                        # (C_out, 2)
    gb = jnp.stack([g1, be1, g2, be2], axis=-1)                  # (C_out, 4)
    ch = jnp.arange(C_out)[:, None]
    gr = jnp.arange(num_groups)[None, :]
    mask = ((ch // cpg) == gr).astype(jnp.float32)               # (C_out, G)

    kernel = functools.partial(_fused_kernel, count=count)
    return pl.pallas_call(
        kernel,
        out_shape=jax.ShapeDtypeStruct((N, C_out, S), jnp.float32),
        grid_spec=pltpu.PrefetchScalarGridSpec(
            num_scalar_prefetch=0, grid=(N,),
            in_specs=[
                pl.BlockSpec((pl.Squeezed(), C_in, S), lambda n: (n, 0, 0)),
                pl.BlockSpec((C_out, C_in), lambda n: (0, 0)),
                pl.BlockSpec((C_out, C_out), lambda n: (0, 0)),
                pl.BlockSpec((C_out, 2), lambda n: (0, 0)),
                pl.BlockSpec((C_out, 4), lambda n: (0, 0)),
                pl.BlockSpec((C_out, num_groups), lambda n: (0, 0)),
            ],
            out_specs=pl.BlockSpec((pl.Squeezed(), C_out, S), lambda n: (n, 0, 0))),
        compiler_params=pltpu.CompilerParams(
            dimension_semantics=("parallel",),
            vmem_limit_bytes=vmem_limit),
    )(x_ncs, w1, w2, params, gb, mask)


def _tiled_path(x_ncs, w1, b1, g1, be1, w2, b2, g2, be2,
                num_groups, vmem_limit, tile_budget, max_tile_s):
    N, C_in, S = x_ncs.shape
    C_out = w1.shape[0]
    tS, n_tiles, S_pad = _choose_tile_s(S, C_in, C_out, tile_budget, max_tile_s)
    pad = S_pad - S
    if pad:
        x_ncs = jnp.pad(x_ncs, ((0, 0), (0, 0), (0, pad)))

    n_super = 2 if (n_tiles >= 2 and n_tiles % 2 == 0) else 1
    tiles_per_super = n_tiles // n_super
    params = jnp.stack([b1, b2], axis=-1)                        # (C_out, 2)

    # ---- specs shared by the two stats passes (grid: N x super x tile) -------
    grid3 = (N, n_super, tiles_per_super)
    x_spec3 = pl.BlockSpec(
        (pl.Squeezed(), C_in, tS),
        lambda n, p, t: (n, 0, p * tiles_per_super + t),
        pipeline_mode=pl.Buffered(3))
    w1_spec3 = pl.BlockSpec((C_out, C_in), lambda n, p, t: (0, 0))
    w2_spec3 = pl.BlockSpec((C_out, C_out), lambda n, p, t: (0, 0))
    prm_spec3 = pl.BlockSpec((C_out, 2), lambda n, p, t: (0, 0))
    af1_spec3 = pl.BlockSpec((pl.Squeezed(), C_out, 2), lambda n, p, t: (n, 0, 0))
    stat_out_spec = pl.BlockSpec(
        (pl.Squeezed(), pl.Squeezed(), C_out, 2), lambda n, p, t: (n, p, 0, 0))
    stats_shape = jax.ShapeDtypeStruct((N, n_super, C_out, 2), jnp.float32)
    cparams_red = pltpu.CompilerParams(
        dimension_semantics=("parallel", "parallel", "arbitrary"),
        vmem_limit_bytes=vmem_limit)

    # ---- pass A: per-channel sum / sumsq of z1 = W1 x -------------------------
    stats1 = pl.pallas_call(
        _stats1_kernel,
        out_shape=stats_shape,
        grid_spec=pltpu.PrefetchScalarGridSpec(
            num_scalar_prefetch=0, grid=grid3,
            in_specs=[x_spec3, w1_spec3],
            out_specs=stat_out_spec),
        compiler_params=cparams_red,
    )(x_ncs, w1)

    # Padded columns of z1 are exactly zero, so no correction is needed here.
    scale1, shift1 = _gn_fold(stats1, b1, g1, be1, num_groups, S)
    af1 = jnp.stack([scale1, shift1], axis=-1)                   # (N, C_out, 2)

    # ---- pass B: per-channel sum / sumsq of z2 = W2 y1 ------------------------
    stats2 = pl.pallas_call(
        _stats2_kernel,
        out_shape=stats_shape,
        grid_spec=pltpu.PrefetchScalarGridSpec(
            num_scalar_prefetch=0, grid=grid3,
            in_specs=[x_spec3, w1_spec3, w2_spec3, prm_spec3, af1_spec3],
            out_specs=stat_out_spec),
        compiler_params=cparams_red,
    )(x_ncs, w1, w2, params, af1)

    if pad:
        # At padded columns: x = 0 -> h1 = b1 -> y1 = lrelu(b1*scale1+shift1),
        # z2 = W2 y1 (per sample).  Subtract their exact contribution.
        y1_pad = _leaky_relu(b1[None, :] * scale1 + shift1)      # (N, C_out)
        z2_pad = jnp.einsum('ok,nk->no', w2, y1_pad)             # (N, C_out)
    else:
        z2_pad = None
    scale2, shift2 = _gn_fold(stats2, b2, g2, be2, num_groups, S,
                              pad_cnt=pad, z_pad=z2_pad)
    af_all = jnp.stack([scale1, shift1, scale2, shift2], axis=-1)  # (N, C_out, 4)

    # ---- pass C: full chain, final write (fully parallel) ---------------------
    grid2 = (N, n_tiles)
    x_spec2 = pl.BlockSpec((pl.Squeezed(), C_in, tS), lambda n, t: (n, 0, t),
                           pipeline_mode=pl.Buffered(3))
    w1_spec2 = pl.BlockSpec((C_out, C_in), lambda n, t: (0, 0))
    w2_spec2 = pl.BlockSpec((C_out, C_out), lambda n, t: (0, 0))
    prm_spec2 = pl.BlockSpec((C_out, 2), lambda n, t: (0, 0))
    af_spec2 = pl.BlockSpec((pl.Squeezed(), C_out, 4), lambda n, t: (n, 0, 0))
    out_spec = pl.BlockSpec((pl.Squeezed(), C_out, tS), lambda n, t: (n, 0, t))

    out = pl.pallas_call(
        _apply_kernel,
        out_shape=jax.ShapeDtypeStruct((N, C_out, S_pad), jnp.float32),
        grid_spec=pltpu.PrefetchScalarGridSpec(
            num_scalar_prefetch=0, grid=grid2,
            in_specs=[x_spec2, w1_spec2, w2_spec2, prm_spec2, af_spec2],
            out_specs=out_spec),
        compiler_params=pltpu.CompilerParams(
            dimension_semantics=("parallel", "parallel"),
            vmem_limit_bytes=vmem_limit),
    )(x_ncs, w1, w2, params, af_all)

    if pad:
        out = out[:, :, :S]
    return out


def double_conv_k1(x, w1, b1, g1, be1, w2, b2, g2, be2, *,
                   num_groups=None, force_tiled=False, max_tile_s=32768):
    """x: (N, C_in, D, H, W) float32 (NCDHW).  Returns (N, C_out, D, H, W)."""
    N, C_in = x.shape[0], x.shape[1]
    spatial = tuple(int(d) for d in x.shape[2:])
    S = 1
    for d in spatial:
        S *= d

    w1 = jnp.reshape(w1, (w1.shape[0], -1))            # (C_out, C_in), k=1 squeezed
    C_out = w1.shape[0]
    w2 = jnp.reshape(w2, (C_out, -1))                  # (C_out, C_out)
    if num_groups is None:
        num_groups = max(C_out // 8, 1)                # nn.GroupNorm(out_ch // 8, out_ch)

    x_ncs = x.reshape(N, C_in, S)
    vmem_limit, tile_budget = _vmem_budget()

    fast_bytes = 4 * S * (2 * C_in + 8 * C_out)        # x dbl-buffered + intermediates + out
    if (not force_tiled) and fast_bytes <= tile_budget:
        out = _fast_path(x_ncs, w1, b1, g1, be1, w2, b2, g2, be2,
                         num_groups, vmem_limit)
    else:
        out = _tiled_path(x_ncs, w1, b1, g1, be1, w2, b2, g2, be2,
                          num_groups, vmem_limit, tile_budget, max_tile_s)
    return out.reshape((N, C_out) + spatial)


# --------------------------- reference & test ---------------------------------


def _reference(x_ncs, w1, b1, g1, be1, w2, b2, g2, be2, num_groups):
    def gn(h, gamma, beta):
        N, C, S = h.shape
        hg = h.reshape(N, num_groups, (C // num_groups) * S)
        mean = hg.mean(axis=-1, keepdims=True)
        var = ((hg - mean) ** 2).mean(axis=-1, keepdims=True)
        hn = ((hg - mean) / jnp.sqrt(var + EPS)).reshape(N, C, S)
        return hn * gamma[None, :, None] + beta[None, :, None]

    lrelu = lambda v: jnp.where(v >= 0, v, NEG_SLOPE * v)
    h = jnp.einsum('oc,ncs->nos', w1, x_ncs) + b1[None, :, None]
    h = lrelu(gn(h, g1, be1))
    h = jnp.einsum('oc,ncs->nos', w2, h) + b2[None, :, None]
    h = lrelu(gn(h, g2, be2))
    return h


if __name__ == "__main__":
    N, C_in, C_out = 2, 4, 16
    D = H = W = 16
    S = D * H * W

    key = jax.random.PRNGKey(0)
    kx, kw1, kb1, kw2, kb2, kg1, kbe1, kg2, kbe2 = jax.random.split(key, 9)

    x = jax.random.normal(kx, (N, C_in, D, H, W), dtype=jnp.float32)
    w1 = jax.random.normal(kw1, (C_out, C_in), dtype=jnp.float32) * 0.2
    b1 = jax.random.normal(kb1, (C_out,), dtype=jnp.float32) * 0.1
    w2 = jax.random.normal(kw2, (C_out, C_out), dtype=jnp.float32) * 0.2
    b2 = jax.random.normal(kb2, (C_out,), dtype=jnp.float32) * 0.1
    g1 = 1.0 + 0.1 * jax.random.normal(kg1, (C_out,), dtype=jnp.float32)
    be1 = 0.1 * jax.random.normal(kbe1, (C_out,), dtype=jnp.float32)
    g2 = 1.0 + 0.1 * jax.random.normal(kg2, (C_out,), dtype=jnp.float32)
    be2 = 0.1 * jax.random.normal(kbe2, (C_out,), dtype=jnp.float32)
    args = (w1, b1, g1, be1, w2, b2, g2, be2)

    ref = _reference(x.reshape(N, C_in, S), *args, C_out // 8).reshape(
        N, C_out, D, H, W)

    # 1) default path (VMEM-resident fused single-call kernel)
    out = jax.block_until_ready(jax.jit(double_conv_k1)(x, *args))
    assert out.shape == (N, C_out, D, H, W)
    assert jnp.allclose(out, ref, atol=1e-3, rtol=1e-3), "fast path mismatch"

    # 2) tiled three-pass path (forced small tiles to exercise multi-tile grid
    #    + megacore super-tile split)
    tiled_fn = jax.jit(functools.partial(double_conv_k1, force_tiled=True,
                                         max_tile_s=512))
    out_t = jax.block_until_ready(tiled_fn(x, *args))
    assert jnp.allclose(out_t, ref, atol=1e-3, rtol=1e-3), "tiled path mismatch"

    # 3) tiled path with a spatial extent not divisible by 128 (pad + exact
    #    analytic statistics correction)
    x_odd = x[:, :, :7, :6, :5]                        # S = 210
    ref_odd = _reference(x_odd.reshape(N, C_in, 7 * 6 * 5), *args,
                         C_out // 8).reshape(N, C_out, 7, 6, 5)
    odd_fn = jax.jit(functools.partial(double_conv_k1, force_tiled=True,
                                       max_tile_s=128))
    out_odd = jax.block_until_ready(odd_fn(x_odd, *args))
    assert jnp.allclose(out_odd, ref_odd, atol=1e-3, rtol=1e-3), "padded path mismatch"

    print("KERNEL_OK")
</pallas_src>

<mosaic_0001>
module attributes {stable_mosaic.version = 11 : i64} {
  func.func @_fused_kernel(%arg0: i32, %arg1: memref<1x4x4096xf32, #tpu.memory_space<vmem>>, %arg2: memref<16x4xf32, #tpu.memory_space<vmem>>, %arg3: memref<16x16xf32, #tpu.memory_space<vmem>>, %arg4: memref<16x2xf32, #tpu.memory_space<vmem>>, %arg5: memref<16x4xf32, #tpu.memory_space<vmem>>, %arg6: memref<16x2xf32, #tpu.memory_space<vmem>>, %arg7: memref<1x16x4096xf32, #tpu.memory_space<vmem>>) attributes {dimension_semantics = [#tpu.dimension_semantics<parallel>], iteration_bounds = array<i64: 2>, scalar_prefetch = 0 : i64, scratch_operands = 0 : i64, tpu.core_type = #tpu.core_type<tc>, window_params = [{transform_indices = @transform_0, window_bounds = array<i64: 1, 4, 4096>}, {pipeline_mode = #tpu.pipeline_mode<synchronous>, transform_indices = @transform_1, window_bounds = array<i64: 16, 4>}, {pipeline_mode = #tpu.pipeline_mode<synchronous>, transform_indices = @transform_2, window_bounds = array<i64: 16, 16>}, {pipeline_mode = #tpu.pipeline_mode<synchronous>, transform_indices = @transform_3, window_bounds = array<i64: 16, 2>}, {pipeline_mode = #tpu.pipeline_mode<synchronous>, transform_indices = @transform_4, window_bounds = array<i64: 16, 4>}, {pipeline_mode = #tpu.pipeline_mode<synchronous>, transform_indices = @transform_5, window_bounds = array<i64: 16, 2>}, {transform_indices = @transform_6, window_bounds = array<i64: 1, 16, 4096>}]} {
    %c0 = arith.constant 0 : index
    %c0_0 = arith.constant 0 : index
    %0 = vector.load %arg6[%c0, %c0_0] : memref<16x2xf32, #tpu.memory_space<vmem>>, vector<16x2xf32>
    %c0_1 = arith.constant 0 : index
    %c0_2 = arith.constant 0 : index
    %1 = vector.load %arg2[%c0_1, %c0_2] : memref<16x4xf32, #tpu.memory_space<vmem>>, vector<16x4xf32>
    %c0_3 = arith.constant 0 : index
    %c0_4 = arith.constant 0 : index
    %c0_5 = arith.constant 0 : index
    %2 = vector.load %arg1[%c0_3, %c0_4, %c0_5] : memref<1x4x4096xf32, #tpu.memory_space<vmem>>, vector<1x4x4096xf32>
    %3 = vector.shape_cast %2 : vector<1x4x4096xf32> to vector<4x4096xf32>
    %cst = arith.constant dense<0.000000e+00> : vector<16x4096xf32>
    %4 = tpu.matmul %1, %3, %cst {dimension_numbers = #tpu.dot_dimension_numbers<[1], [0], [0], [1], [0, 0, 1, 1], [], []>} : vector<16x4xf32>, vector<4x4096xf32>, vector<16x4096xf32> -> vector<16x4096xf32>
    %c0_6 = arith.constant 0 : index
    %c0_7 = arith.constant 0 : index
    %5 = vector.load %arg4[%c0_6, %c0_7] : memref<16x2xf32, #tpu.memory_space<vmem>>, vector<16x1xf32>
    %6 = vector.broadcast %5 : vector<16x1xf32> to vector<16x4096xf32>
    %7 = arith.addf %4, %6 : vector<16x4096xf32>
    %c0_8 = arith.constant 0 : index
    %c0_9 = arith.constant 0 : index
    %8 = vector.load %arg5[%c0_8, %c0_9] : memref<16x4xf32, #tpu.memory_space<vmem>>, vector<16x1xf32>
    %c0_10 = arith.constant 0 : index
    %c1 = arith.constant 1 : index
    %9 = vector.load %arg5[%c0_10, %c1] : memref<16x4xf32, #tpu.memory_space<vmem>>, vector<16x1xf32>
    %cst_11 = arith.constant dense<0.000000e+00> : vector<16xf32>
    %10 = vector.multi_reduction <add>, %7, %cst_11 [1] : vector<16x4096xf32> to vector<16xf32>
    %11 = vector.shape_cast %10 : vector<16xf32> to vector<16x1xf32>
    %12 = vector.broadcast %11 : vector<16x1xf32> to vector<16x2xf32>
    %13 = arith.mulf %12, %0 : vector<16x2xf32>
    %cst_12 = arith.constant dense<0.000000e+00> : vector<2xf32>
    %14 = vector.multi_reduction <add>, %13, %cst_12 [0] : vector<16x2xf32> to vector<2xf32>
    %15 = vector.shape_cast %14 : vector<2xf32> to vector<1x2xf32>
    %cst_13 = arith.constant 3.05175781E-5 : f32
    %16 = vector.broadcast %cst_13 : f32 to vector<1x2xf32>
    %17 = arith.mulf %15, %16 : vector<1x2xf32>
    %18 = vector.broadcast %17 : vector<1x2xf32> to vector<16x2xf32>
    %19 = arith.mulf %0, %18 : vector<16x2xf32>
    %cst_14 = arith.constant dense<0.000000e+00> : vector<16xf32>
    %20 = vector.multi_reduction <add>, %19, %cst_14 [1] : vector<16x2xf32> to vector<16xf32>
    %21 = vector.shape_cast %20 : vector<16xf32> to vector<16x1xf32>
    %22 = vector.broadcast %21 : vector<16x1xf32> to vector<16x4096xf32>
    %23 = arith.subf %7, %22 : vector<16x4096xf32>
    %24 = arith.mulf %23, %23 : vector<16x4096xf32>
    %cst_15 = arith.constant dense<0.000000e+00> : vector<16xf32>
    %25 = vector.multi_reduction <add>, %24, %cst_15 [1] : vector<16x4096xf32> to vector<16xf32>
    %26 = vector.shape_cast %25 : vector<16xf32> to vector<16x1xf32>
    %27 = vector.broadcast %26 : vector<16x1xf32> to vector<16x2xf32>
    %28 = arith.mulf %27, %0 : vector<16x2xf32>
    %cst_16 = arith.constant dense<0.000000e+00> : vector<2xf32>
    %29 = vector.multi_reduction <add>, %28, %cst_16 [0] : vector<16x2xf32> to vector<2xf32>
    %30 = vector.shape_cast %29 : vector<2xf32> to vector<1x2xf32>
    %cst_17 = arith.constant 3.05175781E-5 : f32
    %31 = vector.broadcast %cst_17 : f32 to vector<1x2xf32>
    %32 = arith.mulf %30, %31 : vector<1x2xf32>
    %cst_18 = arith.constant 9.99999974E-6 : f32
    %33 = vector.broadcast %cst_18 : f32 to vector<1x2xf32>
    %34 = arith.addf %32, %33 : vector<1x2xf32>
    %35 = math.rsqrt %34 : vector<1x2xf32>
    %36 = vector.broadcast %35 : vector<1x2xf32> to vector<16x2xf32>
    %37 = arith.mulf %0, %36 : vector<16x2xf32>
    %cst_19 = arith.constant dense<0.000000e+00> : vector<16xf32>
    %38 = vector.multi_reduction <add>, %37, %cst_19 [1] : vector<16x2xf32> to vector<16xf32>
    %39 = vector.shape_cast %38 : vector<16xf32> to vector<16x1xf32>
    %40 = arith.mulf %8, %39 : vector<16x1xf32>
    %41 = vector.broadcast %40 : vector<16x1xf32> to vector<16x4096xf32>
    %42 = arith.mulf %23, %41 : vector<16x4096xf32>
    %43 = vector.broadcast %9 : vector<16x1xf32> to vector<16x4096xf32>
    %44 = arith.addf %42, %43 : vector<16x4096xf32>
    %cst_20 = arith.constant 0.000000e+00 : f32
    %45 = vector.broadcast %cst_20 : f32 to vector<16x4096xf32>
    %46 = arith.cmpf oge, %44, %45 : vector<16x4096xf32>
    %cst_21 = arith.constant 2.000000e-01 : f32
    %47 = vector.broadcast %cst_21 : f32 to vector<16x4096xf32>
    %48 = arith.mulf %47, %44 : vector<16x4096xf32>
    %49 = arith.select %46, %44, %48 : vector<16x4096xi1>, vector<16x4096xf32>
    %c0_22 = arith.constant 0 : index
    %c0_23 = arith.constant 0 : index
    %50 = vector.load %arg3[%c0_22, %c0_23] : memref<16x16xf32, #tpu.memory_space<vmem>>, vector<16x16xf32>
    %cst_24 = arith.constant dense<0.000000e+00> : vector<16x4096xf32>
    %51 = tpu.matmul %50, %49, %cst_24 {dimension_numbers = #tpu.dot_dimension_numbers<[1], [0], [0], [1], [0, 0, 1, 1], [], []>} : vector<16x16xf32>, vector<16x4096xf32>, vector<16x4096xf32> -> vector<16x4096xf32>
    %c0_25 = arith.constant 0 : index
    %c1_26 = arith.constant 1 : index
    %52 = vector.load %arg4[%c0_25, %c1_26] : memref<16x2xf32, #tpu.memory_space<vmem>>, vector<16x1xf32>
    %53 = vector.broadcast %52 : vector<16x1xf32> to vector<16x4096xf32>
    %54 = arith.addf %51, %53 : vector<16x4096xf32>
    %c0_27 = arith.constant 0 : index
    %c2 = arith.constant 2 : index
    %55 = vector.load %arg5[%c0_27, %c2] : memref<16x4xf32, #tpu.memory_space<vmem>>, vector<16x1xf32>
    %c0_28 = arith.constant 0 : index
    %c3 = arith.constant 3 : index
    %56 = vector.load %arg5[%c0_28, %c3] : memref<16x4xf32, #tpu.memory_space<vmem>>, vector<16x1xf32>
    %cst_29 = arith.constant dense<0.000000e+00> : vector<16xf32>
    %57 = vector.multi_reduction <add>, %54, %cst_29 [1] : vector<16x4096xf32> to vector<16xf32>
    %58 = vector.shape_cast %57 : vector<16xf32> to vector<16x1xf32>
    %59 = vector.broadcast %58 : vector<16x1xf32> to vector<16x2xf32>
    %60 = arith.mulf %59, %0 : vector<16x2xf32>
    %cst_30 = arith.constant dense<0.000000e+00> : vector<2xf32>
    %61 = vector.multi_reduction <add>, %60, %cst_30 [0] : vector<16x2xf32> to vector<2xf32>
    %62 = vector.shape_cast %61 : vector<2xf32> to vector<1x2xf32>
    %cst_31 = arith.constant 3.05175781E-5 : f32
    %63 = vector.broadcast %cst_31 : f32 to vector<1x2xf32>
    %64 = arith.mulf %62, %63 : vector<1x2xf32>
    %65 = vector.broadcast %64 : vector<1x2xf32> to vector<16x2xf32>
    %66 = arith.mulf %0, %65 : vector<16x2xf32>
    %cst_32 = arith.constant dense<0.000000e+00> : vector<16xf32>
    %67 = vector.multi_reduction <add>, %66, %cst_32 [1] : vector<16x2xf32> to vector<16xf32>
    %68 = vector.shape_cast %67 : vector<16xf32> to vector<16x1xf32>
    %69 = vector.broadcast %68 : vector<16x1xf32> to vector<16x4096xf32>
    %70 = arith.subf %54, %69 : vector<16x4096xf32>
    %71 = arith.mulf %70, %70 : vector<16x4096xf32>
    %cst_33 = arith.constant dense<0.000000e+00> : vector<16xf32>
    %72 = vector.multi_reduction <add>, %71, %cst_33 [1] : vector<16x4096xf32> to vector<16xf32>
    %73 = vector.shape_cast %72 : vector<16xf32> to vector<16x1xf32>
    %74 = vector.broadcast %73 : vector<16x1xf32> to vector<16x2xf32>
    %75 = arith.mulf %74, %0 : vector<16x2xf32>
    %cst_34 = arith.constant dense<0.000000e+00> : vector<2xf32>
    %76 = vector.multi_reduction <add>, %75, %cst_34 [0] : vector<16x2xf32> to vector<2xf32>
    %77 = vector.shape_cast %76 : vector<2xf32> to vector<1x2xf32>
    %cst_35 = arith.constant 3.05175781E-5 : f32
    %78 = vector.broadcast %cst_35 : f32 to vector<1x2xf32>
    %79 = arith.mulf %77, %78 : vector<1x2xf32>
    %cst_36 = arith.constant 9.99999974E-6 : f32
    %80 = vector.broadcast %cst_36 : f32 to vector<1x2xf32>
    %81 = arith.addf %79, %80 : vector<1x2xf32>
    %82 = math.rsqrt %81 : vector<1x2xf32>
    %83 = vector.broadcast %82 : vector<1x2xf32> to vector<16x2xf32>
    %84 = arith.mulf %0, %83 : vector<16x2xf32>
    %cst_37 = arith.constant dense<0.000000e+00> : vector<16xf32>
    %85 = vector.multi_reduction <add>, %84, %cst_37 [1] : vector<16x2xf32> to vector<16xf32>
    %86 = vector.shape_cast %85 : vector<16xf32> to vector<16x1xf32>
    %87 = arith.mulf %55, %86 : vector<16x1xf32>
    %88 = vector.broadcast %87 : vector<16x1xf32> to vector<16x4096xf32>
    %89 = arith.mulf %70, %88 : vector<16x4096xf32>
    %90 = vector.broadcast %56 : vector<16x1xf32> to vector<16x4096xf32>
    %91 = arith.addf %89, %90 : vector<16x4096xf32>
    %cst_38 = arith.constant 0.000000e+00 : f32
    %92 = vector.broadcast %cst_38 : f32 to vector<16x4096xf32>
    %93 = arith.cmpf oge, %91, %92 : vector<16x4096xf32>
    %cst_39 = arith.constant 2.000000e-01 : f32
    %94 = vector.broadcast %cst_39 : f32 to vector<16x4096xf32>
    %95 = arith.mulf %94, %91 : vector<16x4096xf32>
    %96 = arith.select %93, %91, %95 : vector<16x4096xi1>, vector<16x4096xf32>
    %c0_40 = arith.constant 0 : index
    %c0_41 = arith.constant 0 : index
    %c0_42 = arith.constant 0 : index
    %97 = vector.load %arg7[%c0_40, %c0_41, %c0_42] : memref<1x16x4096xf32, #tpu.memory_space<vmem>>, vector<1x16x4096xf32>
    %98 = vector.shape_cast %97 : vector<1x16x4096xf32> to vector<16x4096xf32>
    %99 = vector.shape_cast %96 : vector<16x4096xf32> to vector<1x16x4096xf32>
    tpu.vector_store %arg7[%c0_40, %c0_41, %c0_42], %99 {strides = array<i32>} : memref<1x16x4096xf32, #tpu.memory_space<vmem>>, vector<1x16x4096xf32>,
    return
  }
  func.func @transform_0(%arg0: i32) -> (i32, i32, i32) {
    %c0_i32 = arith.constant 0 : i32
    %c0_i32_0 = arith.constant 0 : i32
    %c0_i32_1 = arith.constant 0 : i32
    return %arg0, %c0_i32, %c0_i32_0 : i32, i32, i32
  }
  func.func @transform_1(%arg0: i32) -> (i32, i32) {
    %c0_i32 = arith.constant 0 : i32
    %c0_i32_0 = arith.constant 0 : i32
    %c0_i32_1 = arith.constant 0 : i32
    return %c0_i32, %c0_i32_0 : i32, i32
  }
  func.func @transform_2(%arg0: i32) -> (i32, i32) {
    %c0_i32 = arith.constant 0 : i32
    %c0_i32_0 = arith.constant 0 : i32
    %c0_i32_1 = arith.constant 0 : i32
    return %c0_i32, %c0_i32_0 : i32, i32
  }
  func.func @transform_3(%arg0: i32) -> (i32, i32) {
    %c0_i32 = arith.constant 0 : i32
    %c0_i32_0 = arith.constant 0 : i32
    %c0_i32_1 = arith.constant 0 : i32
    return %c0_i32, %c0_i32_0 : i32, i32
  }
  func.func @transform_4(%arg0: i32) -> (i32, i32) {
    %c0_i32 = arith.constant 0 : i32
    %c0_i32_0 = arith.constant 0 : i32
    %c0_i32_1 = arith.constant 0 : i32
    return %c0_i32, %c0_i32_0 : i32, i32
  }
  func.func @transform_5(%arg0: i32) -> (i32, i32) {
    %c0_i32 = arith.constant 0 : i32
    %c0_i32_0 = arith.constant 0 : i32
    %c0_i32_1 = arith.constant 0 : i32
    return %c0_i32, %c0_i32_0 : i32, i32
  }
  func.func @transform_6(%arg0: i32) -> (i32, i32, i32) {
    %c0_i32 = arith.constant 0 : i32
    %c0_i32_0 = arith.constant 0 : i32
    %c0_i32_1 = arith.constant 0 : i32
    return %arg0, %c0_i32, %c0_i32_0 : i32, i32, i32
  }
}

</mosaic_0001>

<bundles_post_ra>
// kernel: double_conv_k1.1
= control target key start
LH: loop header
LB: loop body
LE: loop exit
PB: predicated region body
PF: predicated region fallthrough
CT: control target
= control target key end

     0   :  { %11 = vsyncpa [#allocation3], 0  ;;  %s4559_s21 = smov 0   ;;  %s7097_s0 = inlined_call_operand.vmem [shape: f32[2,4,4096], index: 0, kind: input, shape index: {}]   ;;  %s7098_s1 = inlined_call_operand.vmem [shape: f32[16,4], index: 1, kind: input, shape index: {}]   ;;  %s7099_s2 = inlined_call_operand.hbm [shape: f32[16,16], index: 2, kind: input, shape index: {}]   ;;  %s7100_s3 = inlined_call_operand.vmem [shape: f32[16,2], index: 3, kind: input, shape index: {}]   ;;  %s7101_s4 = inlined_call_operand.vmem [shape: f32[16,4], index: 4, kind: input, shape index: {}]   ;;  %s7102_s5 = inlined_call_operand.vmem [shape: f32[16,2], index: 5, kind: input, shape index: {}]   ;;  %s7103_s6 = inlined_call_operand.vmem [shape: f32[2,16,4096], index: 6, kind: output, shape index: {}]  }
   0x1 LB: > { %s4565_s22 = sadd.s32 4294967295, %s4514_s21   ;;  %p4310_p0 = scmp.ge.s32.totalorder %s4514_s21, 1  ;;  %s4514_s21 = sphi %s4559_s21, %s17_s21  }
   0x2   : > { %p179_p1 = scmp.lt.s32.totalorder %s4514_s21, 3  ;;  %s4516_s23 = smov [#allocation2]  }
   0x3   : > { %s194_s24 = sshll.u32 %s4516_s23, 4  ;;  %p4427_p3 = scmp.eq.s32.totalorder %s4565_s22, 0  ;;  %s195_s24 = int_to_ptr.vmem [resolvable:$true] %s194_s24 }
   0x4   : > { %p4569_p2 = pnand %p4310_p0, %p179_p1  ;;  %s4489_s26 = scalar_lea.vmem %s195_s24, 256 }
   0x5   : > { %p4490_p7 = scmp.ne.s32.totalorder %s195_s24, %s4489_s26  ;;  %p4497_p10 = scmp.lt.s32.totalorder %s195_s24, %s195_s24 }
   0x6   : > { %p4423_p4 = pneg %p4569_p2  ;;  %p4498_p11 = scmp.lt.s32.totalorder %s4489_s26, %s4489_s26 }
   0x8   : > { %p4424_p5 = pnand %p4427_p3, %p4423_p4  ;;  %p4499_p12 = por %p4498_p11, %p4497_p10 }
   0xa   : > { %p4480_p6 = pneg %p4424_p5 }
   0xc   : > { %p4492_p8 = pnand %p4490_p7, %p4480_p6 }
   0xe   : > { %p4493_p9 = pneg %p4492_p8 }
  0x10   : > { %p4500_p13 = pnand %p4499_p12, %p4493_p9 }
  0x12   : > { %4503 = shalt.err (!%p4500_p13)
}
  0x13   : > { %s4517_s27 = smov 128   ;;  %s4518_s28 = smov 8  }
  0x14   : > { %4426 = dma.hbm_to_vmem [thread:$0]  (!%p4424_p5), %s7099_s2, 256, %s195_s24, [#allocation3], %s4517_s27, %s4517_s27, %s4518_s28  }
  0x15   : > { %227 = sbr.rel (%p4569_p2) target bundleno = 2321 (0x911), region = 44 }
  0x1a   : > { %4509 = dma.done.wait (%p4427_p3), [#allocation3], 256  }
  0x1b   : > { %4511 = vsyncadd (%p4427_p3), [#allocation3], 4294967040  ;;  %p257_p0 = scmp.lt.s32.totalorder %s4565_s22, 1  ;;  %v7104_v0 = vmov 0.0   ;;  %v4520_v1 = vmov 0   ;;  %vm338_vm0 = vcmask 1043456  }
  0x1c   : > { %467 = vmatprep.mubr.f32.mxu0 %v7104_v0  ;;  %544 = vmatprep.mubr.f32.mxu1 %v7104_v0  ;;  %v4606_v8 = vld [vmem:[%s7098_s1] sm:$0xff]  ;;  %vm331_vm1 = vcmask 31744   ;;  %v4623_v14 = vld [vmem:[%s7098_s1 + $0x8] sm:$0xff]  ;;  %vm1705_vm2 = vcmask 15360   ;;  %vm2296_vm3 = vcmask 130048  }
  0x1d   : > { %s7371_s22 = smov (!%p257_p0, %s4565_s22), 1  ;;  %4445 = vset.pattern.permute.xlu0 %v4520_v1  ;;  %4446 = vset.pattern.permute.xlu1 %v4520_v1  ;;  %v287_v18 = vld [vmem:[%s7100_s3] sm:$0xff]  ;;  %v288_v21 = vld [vmem:[%s7100_s3 + $0x8] sm:$0xff] }
  0x1e   : > { %s4417_s7 = sshll.u32 %s7371_s22, 7  ;;  %291 = vperm.xlu0 %4445, %v287_v18   ;;  %s4418_s17 = sshll.u32 %s7371_s22, 9 }
  0x1f   : > { %s4597_s10 = scalar_lea.vmem %s7097_s0, %s4417_s7  ;;  %s6596_s19 = scalar_lea.vmem %s7103_s6, %s4418_s17 }
  0x20   : > { %v271_v2 = vld [vmem:[%s4597_s10] sm:$0xff]  ;;  %v272_v3 = vld [vmem:[%s4597_s10 + $0x8] sm:$0xff]  ;;  %v273_v6 = vld [vmem:[%s4597_s10 + $0x10] sm:$0xff] }
  0x21   : > { %v315_v4 = vcombine.high %v271_v2, %v271_v2  ;;  %v316_v5 = vcombine.high %v272_v3, %v272_v3  ;;  %v274_v7 = vld [vmem:[%s4597_s10 + $0x18] sm:$0xff]  ;;  %v317_v9 = vcombine.high %v273_v6, %v273_v6  ;;  %v275_v10 = vld [vmem:[%s4597_s10 + $0x20] sm:$0xff]  ;;  %v276_v13 = vld [vmem:[%s4597_s10 + $0x28] sm:$0xff] }
  0x22   : > { %v318_v11 = vcombine.high %v274_v7, %v274_v7  ;;  %v319_v12 = vcombine.high %v275_v10, %v275_v10  ;;  %v320_v15 = vcombine.high %v276_v13, %v276_v13  ;;  %v277_v16 = vld [vmem:[%s4597_s10 + $0x30] sm:$0xff]  ;;  %v278_v17 = vld [vmem:[%s4597_s10 + $0x38] sm:$0xff]  ;;  %v279_v22 = vld [vmem:[%s4597_s10 + $0x40] sm:$0xff]  ;;  %296 = vperm.xlu0 %4445, %v288_v21  }
  0x23   : > { %4319 = vmatprep.subr.msk.mxu0 %vm338_vm0, %v315_v4  ;;  %4323 = vmatprep.subr.msk.mxu1 %vm338_vm0, %v316_v5  ;;  %v321_v19 = vcombine.high %v277_v16, %v277_v16  ;;  %v322_v20 = vcombine.high %v278_v17, %v278_v17  ;;  %v280_v23 = vld [vmem:[%s4597_s10 + $0x48] sm:$0xff]  ;;  %v323_v24 = vcombine.high %v279_v22, %v279_v22  ;;  %v281_v26 = vld [vmem:[%s4597_s10 + $0x50] sm:$0xff]  ;;  %v282_v27 = vld [vmem:[%s4597_s10 + $0x58] sm:$0xff] }
  0x24   : > { %4320 = vmatpush1.msk.msra.mxu0 %vm338_vm0, %v271_v2  ;;  %4324 = vmatpush1.msk.msra.mxu1 %vm338_vm0, %v272_v3  ;;  %v324_v25 = vcombine.high %v280_v23, %v280_v23  ;;  %v325_v28 = vcombine.high %v281_v26, %v281_v26  ;;  %v326_v29 = vcombine.high %v282_v27, %v282_v27  ;;  %v283_v30 = vld [vmem:[%s4597_s10 + $0x60] sm:$0xff]  ;;  %v284_v31 = vld [vmem:[%s4597_s10 + $0x68] sm:$0xff]  ;;  %v285_v34 = vld [vmem:[%s4597_s10 + $0x70] sm:$0xff] }
  0x25   : > { %4321 = vmatmul.mubr.msk.f32.vlgmr.msra.gmra.mxu0 %vm331_vm1, %v4606_v8  ;;  %4325 = vmatmul.mubr.msk.f32.vlgmr.msra.gmra.mxu1 %vm331_vm1, %v4606_v8  ;;  %v327_v32 = vcombine.high %v283_v30, %v283_v30  ;;  %v328_v33 = vcombine.high %v284_v31, %v284_v31  ;;  %v286_v35 = vld [vmem:[%s4597_s10 + $0x78] sm:$0xff]  ;;  %v329_v36 = vcombine.high %v285_v34, %v285_v34 }
  0x26   : > { %4327 = vmatprep.subr.msk.mxu0 %vm338_vm0, %v317_v9  ;;  %473 = vmatprep.mubr.f32.mxu0 %v7104_v0  ;;  %v330_v37 = vcombine.high %v286_v35, %v286_v35 }
  0x27   : > { %550 = vmatprep.mubr.f32.mxu1 %v7104_v0  ;;  %4328 = vmatpush1.msk.msra.mxu0 %vm338_vm0, %v273_v6 }
  0x28   : > { %4331 = vmatprep.subr.msk.mxu1 %vm338_vm0, %v318_v11  ;;  %4335 = vmatprep.subr.msk.mxu0 %vm338_vm0, %v319_v12 }
  0x29   : > { %4322 = vmatmul.mubr.msk.f32.gmra.mxu0 %vm331_vm1, %v4623_v14  ;;  %4326 = vmatmul.mubr.msk.f32.gmra.mxu1 %vm331_vm1, %v4623_v14 }
  0x2a   : > { %621 = vmatprep.mubr.f32.mxu0 %v7104_v0  ;;  %4332 = vmatpush1.msk.msra.mxu1 %vm338_vm0, %v274_v7 }
  0x2b   : > { %698 = vmatprep.mubr.f32.mxu1 %v7104_v0  ;;  %4339 = vmatprep.subr.msk.mxu1 %vm338_vm0, %v320_v15 }
  0x2d   : > { %4329 = vmatmul.mubr.msk.f32.vlgmr.msra.gmra.mxu0 %vm331_vm1, %v4606_v8  ;;  %4333 = vmatmul.mubr.msk.f32.vlgmr.msra.gmra.mxu1 %vm331_vm1, %v4606_v8 }
  0x2e   : > { %627 = vmatprep.mubr.f32.mxu0 %v7104_v0  ;;  %704 = vmatprep.mubr.f32.mxu1 %v7104_v0 }
  0x2f   : > { %4336 = vmatpush1.msk.msra.mxu0 %vm338_vm0, %v275_v10  ;;  %4340 = vmatpush1.msk.msra.mxu1 %vm338_vm0, %v276_v13 }
  0x30   : > { %4343 = vmatprep.subr.msk.mxu0 %vm338_vm0, %v321_v19  ;;  %4347 = vmatprep.subr.msk.mxu1 %vm338_vm0, %v322_v20 }
  0x31   : > { %4330 = vmatmul.mubr.msk.f32.gmra.mxu0 %vm331_vm1, %v4623_v14  ;;  %4334 = vmatmul.mubr.msk.f32.gmra.mxu1 %vm331_vm1, %v4623_v14 }
  0x32   : > { %775 = vmatprep.mubr.f32.mxu0 %v7104_v0  ;;  %852 = vmatprep.mubr.f32.mxu1 %v7104_v0 }
  0x35   : > { %4337 = vmatmul.mubr.msk.f32.vlgmr.msra.gmra.mxu0 %vm331_vm1, %v4606_v8  ;;  %4341 = vmatmul.mubr.msk.f32.vlgmr.msra.gmra.mxu1 %vm331_vm1, %v4606_v8 }
  0x36   : > { %781 = vmatprep.mubr.f32.mxu0 %v7104_v0  ;;  %858 = vmatprep.mubr.f32.mxu1 %v7104_v0 }
  0x37   : > { %4344 = vmatpush1.msk.msra.mxu0 %vm338_vm0, %v277_v16  ;;  %4348 = vmatpush1.msk.msra.mxu1 %vm338_vm0, %v278_v17 }
  0x38   : > { %4351 = vmatprep.subr.msk.mxu0 %vm338_vm0, %v323_v24  ;;  %4355 = vmatprep.subr.msk.mxu1 %vm338_vm0, %v324_v25 }
  0x39   : > { %4338 = vmatmul.mubr.msk.f32.gmra.mxu0 %vm331_vm1, %v4623_v14  ;;  %4342 = vmatmul.mubr.msk.f32.gmra.mxu1 %vm331_vm1, %v4623_v14 }
  0x3a   : > { %929 = vmatprep.mubr.f32.mxu0 %v7104_v0  ;;  %1006 = vmatprep.mubr.f32.mxu1 %v7104_v0 }
  0x3d   : > { %4345 = vmatmul.mubr.msk.f32.vlgmr.msra.gmra.mxu0 %vm331_vm1, %v4606_v8  ;;  %4349 = vmatmul.mubr.msk.f32.vlgmr.msra.gmra.mxu1 %vm331_vm1, %v4606_v8 }
  0x3e   : > { %935 = vmatprep.mubr.f32.mxu0 %v7104_v0  ;;  %1012 = vmatprep.mubr.f32.mxu1 %v7104_v0 }
  0x3f   : > { %4352 = vmatpush1.msk.msra.mxu0 %vm338_vm0, %v279_v22  ;;  %4356 = vmatpush1.msk.msra.mxu1 %vm338_vm0, %v280_v23 }
  0x40   : > { %4359 = vmatprep.subr.msk.mxu0 %vm338_vm0, %v325_v28  ;;  %4363 = vmatprep.subr.msk.mxu1 %vm338_vm0, %v326_v29 }
  0x41   : > { %4346 = vmatmul.mubr.msk.f32.gmra.mxu0 %vm331_vm1, %v4623_v14  ;;  %4350 = vmatmul.mubr.msk.f32.gmra.mxu1 %vm331_vm1, %v4623_v14 }
  0x42   : > { %1083 = vmatprep.mubr.f32.mxu0 %v7104_v0  ;;  %1160 = vmatprep.mubr.f32.mxu1 %v7104_v0 }
  0x45   : > { %4353 = vmatmul.mubr.msk.f32.vlgmr.msra.gmra.mxu0 %vm331_vm1, %v4606_v8  ;;  %4357 = vmatmul.mubr.msk.f32.vlgmr.msra.gmra.mxu1 %vm331_vm1, %v4606_v8 }
  0x46   : > { %1089 = vmatprep.mubr.f32.mxu0 %v7104_v0  ;;  %1166 = vmatprep.mubr.f32.mxu1 %v7104_v0 }
  0x47   : > { %4360 = vmatpush1.msk.msra.mxu0 %vm338_vm0, %v281_v26  ;;  %4364 = vmatpush1.msk.msra.mxu1 %vm338_vm0, %v282_v27 }
  0x48   : > { %4367 = vmatprep.subr.msk.mxu0 %vm338_vm0, %v327_v32  ;;  %4371 = vmatprep.subr.msk.mxu1 %vm338_vm0, %v328_v33 }
  0x49   : > { %4354 = vmatmul.mubr.msk.f32.gmra.mxu0 %vm331_vm1, %v4623_v14  ;;  %4358 = vmatmul.mubr.msk.f32.gmra.mxu1 %vm331_vm1, %v4623_v14 }
  0x4a   : > { %1237 = vmatprep.mubr.f32.mxu0 %v7104_v0  ;;  %1314 = vmatprep.mubr.f32.mxu1 %v7104_v0 }
  0x4d   : > { %4361 = vmatmul.mubr.msk.f32.vlgmr.msra.gmra.mxu0 %vm331_vm1, %v4606_v8  ;;  %4365 = vmatmul.mubr.msk.f32.vlgmr.msra.gmra.mxu1 %vm331_vm1, %v4606_v8 }
  0x4e   : > { %1243 = vmatprep.mubr.f32.mxu0 %v7104_v0  ;;  %1320 = vmatprep.mubr.f32.mxu1 %v7104_v0 }
  0x4f   : > { %4368 = vmatpush1.msk.msra.mxu0 %vm338_vm0, %v283_v30  ;;  %4372 = vmatpush1.msk.msra.mxu1 %vm338_vm0, %v284_v31 }
  0x50   : > { %4375 = vmatprep.subr.msk.mxu0 %vm338_vm0, %v329_v36  ;;  %4379 = vmatprep.subr.msk.mxu1 %vm338_vm0, %v330_v37 }
  0x51   : > { %4362 = vmatmul.mubr.msk.f32.gmra.mxu0 %vm331_vm1, %v4623_v14  ;;  %4366 = vmatmul.mubr.msk.f32.gmra.mxu1 %vm331_vm1, %v4623_v14 }
  0x52   : > { %1391 = vmatprep.mubr.f32.mxu0 %v7104_v0  ;;  %1468 = vmatprep.mubr.f32.mxu1 %v7104_v0 }
  0x55   : > { %4369 = vmatmul.mubr.msk.f32.vlgmr.msra.gmra.mxu0 %vm331_vm1, %v4606_v8  ;;  %4373 = vmatmul.mubr.msk.f32.vlgmr.msra.gmra.mxu1 %vm331_vm1, %v4606_v8 }
  0x56   : > { %1397 = vmatprep.mubr.f32.mxu0 %v7104_v0  ;;  %1474 = vmatprep.mubr.f32.mxu1 %v7104_v0 }
  0x57   : > { %4376 = vmatpush1.msk.msra.mxu0 %vm338_vm0, %v285_v34  ;;  %4380 = vmatpush1.msk.msra.mxu1 %vm338_vm0, %v286_v35 }
  0x59   : > { %4370 = vmatmul.mubr.msk.f32.gmra.mxu0 %vm331_vm1, %v4623_v14  ;;  %4374 = vmatmul.mubr.msk.f32.gmra.mxu1 %vm331_vm1, %v4623_v14 }
  0x5a   : > { %1545 = vmatprep.mubr.f32.mxu0 %v7104_v0  ;;  %1622 = vmatprep.mubr.f32.mxu1 %v7104_v0 }
  0x5d   : > { %4377 = vmatmul.mubr.msk.f32.vlgmr.msra.gmra.mxu0 %vm331_vm1, %v4606_v8  ;;  %4381 = vmatmul.mubr.msk.f32.vlgmr.msra.gmra.mxu1 %vm331_vm1, %v4606_v8 }
  0x5e   : > { %1551 = vmatprep.mubr.f32.mxu0 %v7104_v0  ;;  %1628 = vmatprep.mubr.f32.mxu1 %v7104_v0 }
  0x61   : > { %4378 = vmatmul.mubr.msk.f32.gmra.mxu0 %vm331_vm1, %v4623_v14  ;;  %4382 = vmatmul.mubr.msk.f32.gmra.mxu1 %vm331_vm1, %v4623_v14 }
  0x62   : > { %2367 = vmatprep.mubr.f32.mxu0 %v7104_v0  ;;  %2444 = vmatprep.mubr.f32.mxu1 %v7104_v0 }
  0x99   : > { %v4759_v38 = vpop.permute.xlu0 %291 }
  0x9d   : > { %v4770_v48 = vpop.permute.xlu0 %296 }
  0xe5   : > { %v469_v39 = vpop.f32.mrf.mxu0  ;;  %v546_v40 = vpop.f32.mrf.mxu1 }
  0xe6   : > { %v4762_v43 = vadd.f32 %v469_v39, %v4759_v38  ;;  %v4768_v47 = vadd.f32 %v546_v40, %v4759_v38 }
  0xe7   : > { %v471_v41 = vpop.f32.mrf.mxu0  ;;  %v548_v42 = vpop.f32.mrf.mxu1 }
  0xe8   : > { %v4765_v44 = vadd.f32 %v471_v41, %v4759_v38  ;;  %v4775_v52 = vadd.f32 %v548_v42, %v4759_v38 }
  0xe9   : > { %v475_v45 = vpop.f32.mrf.mxu0  ;;  %v552_v46 = vpop.f32.mrf.mxu1 }
  0xea   : > { %v1637_v49 = vadd.f32 %v4765_v44, %v4762_v43  ;;  %v4779_v54 = vadd.f32 %v475_v45, %v4770_v48  ;;  %v4786_v59 = vadd.f32 %v552_v46, %v4770_v48 }
  0xeb   : > { %v477_v50 = vpop.f32.mrf.mxu0  ;;  %v554_v51 = vpop.f32.mrf.mxu1 }
  0xec   : > { %v1638_v53 = vadd.f32 %v1637_v49, %v4768_v47  ;;  %v4782_v55 = vadd.f32 %v477_v50, %v4770_v48  ;;  %v4794_v1 = vadd.f32 %v554_v51, %v4770_v48 }
  0xed   : > { %v623_v56 = vpop.f32.mrf.mxu0  ;;  %v700_v57 = vpop.f32.mrf.mxu1 }
  0xee   : > { %v1639_v58 = vadd.f32 %v1638_v53, %v4775_v52  ;;  %v1670_v60 = vadd.f32 %v4782_v55, %v4779_v54  ;;  %v4791_v61 = vadd.f32 %v623_v56, %v4759_v38  ;;  %v4803_v8 = vadd.f32 %v700_v57, %v4759_v38 }
  0xef   : > { %v625_v62 = vpop.f32.mrf.mxu0  ;;  %v702_v63 = vpop.f32.mrf.mxu1 }
  0xf0   : > { %v1671_v2 = vadd.f32 %v1670_v60, %v4786_v59  ;;  %v1640_v3 = vadd.f32 %v1639_v58, %v4791_v61  ;;  %v4799_v4 = vadd.f32 %v625_v62, %v4759_v38  ;;  %v4810_v13 = vadd.f32 %v702_v63, %v4759_v38 }
  0xf1   : > { %v629_v5 = vpop.f32.mrf.mxu0  ;;  %v706_v6 = vpop.f32.mrf.mxu1 }
  0xf2   : > { %v1672_v7 = vadd.f32 %v1671_v2, %v4794_v1  ;;  %v1641_v9 = vadd.f32 %v1640_v3, %v4799_v4  ;;  %v4807_v10 = vadd.f32 %v629_v5, %v4770_v48  ;;  %v4819_v20 = vadd.f32 %v706_v6, %v4770_v48 }
  0xf3   : > { %v631_v11 = vpop.f32.mrf.mxu0  ;;  %v708_v12 = vpop.f32.mrf.mxu1 }
  0xf4   : > { %v1642_v14 = vadd.f32 %v1641_v9, %v4803_v8  ;;  %v1673_v15 = vadd.f32 %v1672_v7, %v4807_v10  ;;  %v4815_v16 = vadd.f32 %v631_v11, %v4770_v48  ;;  %v4826_v25 = vadd.f32 %v708_v12, %v4770_v48 }
  0xf5   : > { %v777_v17 = vpop.f32.mrf.mxu0  ;;  %v854_v18 = vpop.f32.mrf.mxu1 }
  0xf6   : > { %v1643_v19 = vadd.f32 %v1642_v14, %v4810_v13  ;;  %v1674_v21 = vadd.f32 %v1673_v15, %v4815_v16  ;;  %v4823_v22 = vadd.f32 %v777_v17, %v4759_v38  ;;  %v4835_v32 = vadd.f32 %v854_v18, %v4759_v38 }
  0xf7   : > { %v779_v23 = vpop.f32.mrf.mxu0  ;;  %v856_v24 = vpop.f32.mrf.mxu1 }
  0xf8   : > { %v1675_v26 = vadd.f32 %v1674_v21, %v4819_v20  ;;  %v1644_v27 = vadd.f32 %v1643_v19, %v4823_v22  ;;  %v4831_v28 = vadd.f32 %v779_v23, %v4759_v38  ;;  %v4842_v37 = vadd.f32 %v856_v24, %v4759_v38 }
  0xf9   : > { %v783_v29 = vpop.f32.mrf.mxu0  ;;  %v860_v30 = vpop.f32.mrf.mxu1 }
  0xfa   : > { %v1676_v31 = vadd.f32 %v1675_v26, %v4826_v25  ;;  %v1645_v33 = vadd.f32 %v1644_v27, %v4831_v28  ;;  %v4839_v34 = vadd.f32 %v783_v29, %v4770_v48  ;;  %v4851_v49 = vadd.f32 %v860_v30, %v4770_v48 }
  0xfb   : > { %v785_v35 = vpop.f32.mrf.mxu0  ;;  %v862_v36 = vpop.f32.mrf.mxu1 }
  0xfc   : > { %v1646_v39 = vadd.f32 %v1645_v33, %v4835_v32  ;;  %v1677_v40 = vadd.f32 %v1676_v31, %v4839_v34  ;;  %v4847_v41 = vadd.f32 %v785_v35, %v4770_v48  ;;  %v4858_v57 = vadd.f32 %v862_v36, %v4770_v48 }
  0xfd   : > { %v931_v42 = vpop.f32.mrf.mxu0  ;;  %v1008_v45 = vpop.f32.mrf.mxu1 }
  0xfe   : > { %v1647_v46 = vadd.f32 %v1646_v39, %v4842_v37  ;;  %v1678_v50 = vadd.f32 %v1677_v40, %v4847_v41  ;;  %v4855_v51 = vadd.f32 %v931_v42, %v4759_v38  ;;  %v4867_v5 = vadd.f32 %v1008_v45, %v4759_v38 }
  0xff   : > { %v933_v53 = vpop.f32.mrf.mxu0  ;;  %v1010_v56 = vpop.f32.mrf.mxu1 }
 0x100   : > { %v1679_v58 = vadd.f32 %v1678_v50, %v4851_v49  ;;  %v1648_v60 = vadd.f32 %v1647_v46, %v4855_v51  ;;  %v4863_v62 = vadd.f32 %v933_v53, %v4759_v38  ;;  %v4874_v12 = vadd.f32 %v1010_v56, %v4759_v38 }
 0x101   : > { %v937_v63 = vpop.f32.mrf.mxu0  ;;  %v1014_v2 = vpop.f32.mrf.mxu1 }
 0x102   : > { %v1680_v3 = vadd.f32 %v1679_v58, %v4858_v57  ;;  %v1649_v6 = vadd.f32 %v1648_v60, %v4863_v62  ;;  %v4871_v7 = vadd.f32 %v937_v63, %v4770_v48  ;;  %v4883_v23 = vadd.f32 %v1014_v2, %v4770_v48 }
 0x103   : > { %v939_v9 = vpop.f32.mrf.mxu0  ;;  %v1016_v11 = vpop.f32.mrf.mxu1 }
 0x104   : > { %v1650_v14 = vadd.f32 %v1649_v6, %v4867_v5  ;;  %v1681_v15 = vadd.f32 %v1680_v3, %v4871_v7  ;;  %v4879_v17 = vadd.f32 %v939_v9, %v4770_v48  ;;  %v4890_v30 = vadd.f32 %v1016_v11, %v4770_v48 }
 0x105   : > { %v1085_v18 = vpop.f32.mrf.mxu0  ;;  %v1162_v19 = vpop.f32.mrf.mxu1 }
 0x106   : > { %v1651_v21 = vadd.f32 %v1650_v14, %v4874_v12  ;;  %v1682_v24 = vadd.f32 %v1681_v15, %v4879_v17  ;;  %v4887_v26 = vadd.f32 %v1085_v18, %v4759_v38  ;;  %v4899_v42 = vadd.f32 %v1162_v19, %v4759_v38 }
 0x107   : > { %v1087_v27 = vpop.f32.mrf.mxu0  ;;  %v1164_v29 = vpop.f32.mrf.mxu1 }
 0x108   : > { %v1683_v31 = vadd.f32 %v1682_v24, %v4883_v23  ;;  %v1652_v33 = vadd.f32 %v1651_v21, %v4887_v26  ;;  %v4895_v35 = vadd.f32 %v1087_v27, %v4759_v38  ;;  %v4906_v56 = vadd.f32 %v1164_v29, %v4759_v38 }
 0x109   : > { %v1091_v36 = vpop.f32.mrf.mxu0  ;;  %v1168_v39 = vpop.f32.mrf.mxu1 }
 0x10a   : > { %v1684_v40 = vadd.f32 %v1683_v31, %v4890_v30  ;;  %v1653_v45 = vadd.f32 %v1652_v33, %v4895_v35  ;;  %v4903_v46 = vadd.f32 %v1091_v36, %v4770_v48  ;;  %v4915_v9 = vadd.f32 %v1168_v39, %v4770_v48 }
 0x10b   : > { %v1093_v50 = vpop.f32.mrf.mxu0  ;;  %v1170_v53 = vpop.f32.mrf.mxu1 }
 0x10c   : > { %v1654_v58 = vadd.f32 %v1653_v45, %v4899_v42  ;;  %v1685_v60 = vadd.f32 %v1684_v40, %v4903_v46  ;;  %v4911_v63 = vadd.f32 %v1093_v50, %v4770_v48  ;;  %7184 = vst [vmem:[#allocation6_spill] sm:$0xff] %v4915_v9  ;;  %v4922_v19 = vadd.f32 %v1170_v53, %v4770_v48 }
 0x10d   : > { %v1239_v2 = vpop.f32.mrf.mxu0  ;;  %v1316_v3 = vpop.f32.mrf.mxu1 }
 0x10e   : > { %7183 = vst [vmem:[#allocation5_spill] sm:$0xff] %v4911_v63  ;;  %v1655_v6 = vadd.f32 %v1654_v58, %v4906_v56  ;;  %v1686_v11 = vadd.f32 %v1685_v60, %v4911_v63  ;;  %v4919_v14 = vadd.f32 %v1239_v2, %v4759_v38  ;;  %7185 = vst [vmem:[#allocation7_spill] sm:$0xff] %v4922_v19 }
 0x10f   : > { %v1241_v15 = vpop.f32.mrf.mxu0  ;;  %v1318_v18 = vpop.f32.mrf.mxu1  ;;  %v4931_v36 = vadd.f32 %v1316_v3, %v4759_v38 }
 0x110   : > { %v1687_v21 = vadd.f32 %v1686_v11, %v4915_v9  ;;  %v1656_v24 = vadd.f32 %v1655_v6, %v4919_v14  ;;  %v4927_v27 = vadd.f32 %v1241_v15, %v4759_v38  ;;  %v4938_v53 = vadd.f32 %v1318_v18, %v4759_v38 }
 0x111   : > { %v1245_v29 = vpop.f32.mrf.mxu0  ;;  %v1322_v31 = vpop.f32.mrf.mxu1 }
 0x112   : > { %v1688_v33 = vadd.f32 %v1687_v21, %v4922_v19  ;;  %v1657_v39 = vadd.f32 %v1656_v24, %v4927_v27  ;;  %v4935_v40 = vadd.f32 %v1245_v29, %v4770_v48  ;;  %v4947_v15 = vadd.f32 %v1322_v31, %v4770_v48 }
 0x113   : > { %v1247_v45 = vpop.f32.mrf.mxu0  ;;  %v1324_v50 = vpop.f32.mrf.mxu1 }
 0x114   : > { %7186 = vst [vmem:[#allocation8_spill] sm:$0xff] %v4935_v40  ;;  %v1658_v58 = vadd.f32 %v1657_v39, %v4931_v36  ;;  %v1689_v60 = vadd.f32 %v1688_v33, %v4935_v40  ;;  %v4943_v2 = vadd.f32 %v1247_v45, %v4770_v48  ;;  %7188 = vst [vmem:[#allocation10_spill] sm:$0xff] %v4947_v15 }
 0x115   : > { %v1393_v6 = vpop.f32.mrf.mxu0  ;;  %v1470_v3 = vpop.f32.mrf.mxu1  ;;  %v4954_v39 = vadd.f32 %v1324_v50, %v4770_v48 }
 0x116   : > { %7187 = vst [vmem:[#allocation9_spill] sm:$0xff] %v4943_v2  ;;  %v1659_v11 = vadd.f32 %v1658_v58, %v4938_v53  ;;  %v1690_v21 = vadd.f32 %v1689_v60, %v4943_v2  ;;  %v4951_v24 = vadd.f32 %v1393_v6, %v4759_v38  ;;  %v4963_v60 = vadd.f32 %v1470_v3, %v4759_v38 }
 0x117   : > { %v1395_v18 = vpop.f32.mrf.mxu0  ;;  %v1472_v29 = vpop.f32.mrf.mxu1  ;;  %7189 = vst [vmem:[#allocation11_spill] sm:$0xff] %v4954_v39 }
 0x118   : > { %v1691_v33 = vadd.f32 %v1690_v21, %v4947_v15  ;;  %v1660_v45 = vadd.f32 %v1659_v11, %v4951_v24  ;;  %v4959_v0 = vadd.f32 %v1395_v18, %v4759_v38  ;;  %v4970_v21 = vadd.f32 %v1472_v29, %v4759_v38 }
 0x119   : > { %v1399_v58 = vpop.f32.mrf.mxu0  ;;  %v1476_v31 = vpop.f32.mrf.mxu1 }
 0x11a   : > { %v1692_v40 = vadd.f32 %v1691_v33, %v4954_v39  ;;  %v1661_v6 = vadd.f32 %v1660_v45, %v4959_v0  ;;  %v4967_v2 = vadd.f32 %v1399_v58, %v4770_v48  ;;  %7191 = vst [vmem:[#allocation13_spill] sm:$0xff] %v4970_v21  ;;  %v4979_v45 = vadd.f32 %v1476_v31, %v4770_v48 }
 0x11b   : > { %v1401_v50 = vpop.f32.mrf.mxu0  ;;  %v1478_v19 = vpop.f32.mrf.mxu1 }
 0x11c   : > { %7190 = vst [vmem:[#allocation12_spill] sm:$0xff] %v4967_v2  ;;  %v1662_v11 = vadd.f32 %v1661_v6, %v4963_v60  ;;  %v1693_v18 = vadd.f32 %v1692_v40, %v4967_v2  ;;  %v4975_v15 = vadd.f32 %v1401_v50, %v4770_v48  ;;  %7193 = vst [vmem:[#allocation15_spill] sm:$0xff] %v4979_v45 }
 0x11d   : > { %v1547_v33 = vpop.f32.mrf.mxu0  ;;  %v1624_v3 = vpop.f32.mrf.mxu1  ;;  %v4986_v6 = vadd.f32 %v1478_v19, %v4770_v48 }
 0x11e   : > { %7192 = vst [vmem:[#allocation14_spill] sm:$0xff] %v4975_v15  ;;  %v1663_v39 = vadd.f32 %v1662_v11, %v4970_v21  ;;  %v1694_v58 = vadd.f32 %v1693_v18, %v4975_v15  ;;  %v4983_v9 = vadd.f32 %v1547_v33, %v4759_v38  ;;  %v4995_v18 = vadd.f32 %v1624_v3, %v4759_v38 }
 0x11f   : > { %v1549_v29 = vpop.f32.mrf.mxu0  ;;  %v1626_v63 = vpop.f32.mrf.mxu1  ;;  %7194 = vst [vmem:[#allocation16_spill] sm:$0xff] %v4986_v6 }
 0x120   : > { %v1695_v40 = vadd.f32 %v1694_v58, %v4979_v45  ;;  %v1664_v50 = vadd.f32 %v1663_v39, %v4983_v9  ;;  %v4991_v2 = vadd.f32 %v1549_v29, %v4759_v38  ;;  %7195 = vst [vmem:[#allocation17_spill] sm:$0xff] %v4995_v18  ;;  %v5002_v58 = vadd.f32 %v1626_v63, %v4759_v38 }
 0x121   : > { %v1553_v11 = vpop.f32.mrf.mxu0  ;;  %v1630_v31 = vpop.f32.mrf.mxu1 }
 0x122   : > { %v1696_v21 = vadd.f32 %v1695_v40, %v4986_v6  ;;  %v1665_v33 = vadd.f32 %v1664_v50, %v4991_v2  ;;  %v4999_v15 = vadd.f32 %v1553_v11, %v4770_v48  ;;  %7197 = vst [vmem:[#allocation19_spill] sm:$0xff] %v5002_v58  ;;  %v5010_v3 = vadd.f32 %v1630_v31, %v4770_v48  ;;  %v5027_v31 = vld [vmem:[%s7102_s5 + $0x8] sm:$0xff] }
 0x123   : > { %v1555_v19 = vpop.f32.mrf.mxu0  ;;  %v1632_v40 = vpop.f32.mrf.mxu1 }
 0x124   : > { %7196 = vst [vmem:[#allocation18_spill] sm:$0xff] %v4999_v15  ;;  %v1697_v39 = vadd.f32 %v1696_v21, %v4999_v15  ;;  %v5006_v29 = vadd.f32 %v1555_v19, %v4770_v48  ;;  %v1666_v45 = vadd.f32 %v1665_v33, %v4995_v18  ;;  %7199 = vst [vmem:[#allocation21_spill] sm:$0xff] %v5010_v3  ;;  %v5022_v33 = vld [vmem:[%s7102_s5] sm:$0xff] }
 0x125   : > { %v5015_v6 = vadd.f32 %v1632_v40, %v4770_v48 }
 0x126   : > { %7198 = vst [vmem:[#allocation20_spill] sm:$0xff] %v5006_v29  ;;  %v1698_v50 = vadd.f32 %v1697_v39, %v5006_v29  ;;  %v1667_v11 = vadd.f32 %v1666_v45, %v5002_v58 }
 0x127   : > { %7200 = vst [vmem:[#allocation22_spill] sm:$0xff] %v5015_v6 }
 0x128   : > { %1668 = vadd.xlane.f32.xlu1 %v1667_v11  ;;  %v1699_v38 = vadd.f32 %v1698_v50, %v5010_v3 }
 0x12a   : > { %v1700_v63 = vadd.f32 %v1699_v38, %v5015_v6 }
 0x12c   : > { %1701 = vadd.xlane.f32.xlu1 %v1700_v63 }
 0x1b1   : > { %v1669_v21 = vpop.xlane.xlu1 %1668 }
 0x1b2   : > { %v1703_v48 = vmul.f32 %v1669_v21, %v5022_v33 }
 0x1b4   : > { %v1706_v39 = vsel %vm1705_vm2, %v1703_v48, 0.0 }
 0x1b5   : > { %v1702_v45 = vpop.xlane.xlu1 %1701 }
 0x1b6   : > { %v1704_v19 = vmul.f32 %v1702_v45, %v5027_v31 }
 0x1b8   : > { %v1707_v40 = vsel %vm1705_vm2, %v1704_v19, 0.0 }
 0x1b9   : > { %v1708_v50 = vadd.f32 %v1707_v40, %v1706_v39 }
 0x1bb   : > { %v1709_v11 = vrot.slane %v1708_v50, 4 }
 0x1bd   : > { %v1710_v38 = vadd.f32 %v1709_v11, %v1708_v50 }
 0x1bf   : > { %v1711_v63 = vrot.slane %v1710_v38, 2 }
 0x1c1   : > { %v1712_v6 = vadd.f32 %v1711_v63, %v1710_v38 }
 0x1c3   : > { %v1713_v3 = vrot.slane %v1712_v6, 1 }
 0x1c5   : > { %v1714_v29 = vadd.f32 %v1713_v3, %v1712_v6 }
 0x1c7   : > { %v1715_v15 = vmul.f32 3.0517578e-05, %v1714_v29 }
 0x1c9   : > { %v1717_v58 = vmul.f32 %v1715_v15, %v5027_v31  ;;  %v1716_v21 = vmul.f32 %v1715_v15, %v5022_v33 }
 0x1cb   : > { %v1721_v18 = vsel %vm1705_vm2, %v1717_v58, 0.0  ;;  %v1718_v45 = vsel %vm1705_vm2, %v1716_v21, 0.0 }
 0x1cc   : > { %1722 = vadd.xlane.f32.xlu1 %v1721_v18  ;;  %1719 = vadd.xlane.f32.xlu0 %v1718_v45 }
 0x255   : > { %v5037_v48 = vpop.xlane.xlu0 %1719  ;;  %v5083_v63 = vpop.xlane.xlu1 %1722 }
 0x256   : > { %v5041_v19 = vsub.f32 %v4762_v43, %v5037_v48  ;;  %v5045_v6 = vsub.f32 %v4765_v44, %v5037_v48  ;;  %v5049_v29 = vsub.f32 %v4768_v47, %v5037_v48  ;;  %v5057_v58 = vsub.f32 %v4775_v52, %v5037_v48 }
 0x257   : > { %v5061_v43 = vsub.f32 %v4791_v61, %v5037_v48  ;;  %v5067_v47 = vsub.f32 %v4799_v4, %v5037_v48  ;;  %v5073_v52 = vsub.f32 %v4803_v8, %v5037_v48  ;;  %v5079_v11 = vsub.f32 %v4810_v13, %v5037_v48 }
 0x258   : > { %v1788_v15 = vmul.f32 %v5041_v19, %v5041_v19  ;;  %v1789_v18 = vmul.f32 %v5045_v6, %v5045_v6  ;;  %v1790_v44 = vmul.f32 %v5049_v29, %v5049_v29  ;;  %v1791_v39 = vmul.f32 %v5057_v58, %v5057_v58 }
 0x259   : > { %v1792_v61 = vmul.f32 %v5061_v43, %v5061_v43  ;;  %v1793_v4 = vmul.f32 %v5067_v47, %v5067_v47  ;;  %v5087_v21 = vsub.f32 %v4823_v22, %v5037_v48  ;;  %v1794_v8 = vmul.f32 %v5073_v52, %v5073_v52 }
 0x25a   : > { %v1852_v3 = vadd.f32 %v1789_v18, %v1788_v15  ;;  %v5093_v15 = vsub.f32 %v4831_v28, %v5037_v48  ;;  %v1795_v13 = vmul.f32 %v5079_v11, %v5079_v11  ;;  %v5103_v22 = vsub.f32 %v4782_v55, %v5083_v63 }
 0x25b   : > { %v1796_v28 = vmul.f32 %v5087_v21, %v5087_v21  ;;  %v5119_v55 = vsub.f32 %v4786_v59, %v5083_v63  ;;  %v5137_v59 = vsub.f32 %v4863_v62, %v5037_v48 }
 0x25c   : > { %v1853_v40 = vadd.f32 %v1852_v3, %v1790_v44  ;;  %v5099_v44 = vsub.f32 %v4779_v54, %v5083_v63  ;;  %v5107_v3 = vsub.f32 %v4835_v32, %v5037_v48  ;;  %v1797_v54 = vmul.f32 %v5093_v15, %v5093_v15 }
 0x25e   : > { %v1854_v50 = vadd.f32 %v1853_v40, %v1791_v39  ;;  %v5113_v40 = vsub.f32 %v4842_v37, %v5037_v48  ;;  %v1820_v32 = vmul.f32 %v5099_v44, %v5099_v44  ;;  %v1798_v37 = vmul.f32 %v5107_v3, %v5107_v3 }
 0x260   : > { %v1855_v38 = vadd.f32 %v1854_v50, %v1792_v61  ;;  %v1821_v50 = vmul.f32 %v5103_v22, %v5103_v22 }
 0x262   : > { %v1856_v45 = vadd.f32 %v1855_v38, %v1793_v4  ;;  %v5127_v4 = vsub.f32 %v4855_v51, %v5037_v48  ;;  %v5143_v51 = vsub.f32 %v4807_v10, %v5083_v63 }
 0x264   : > { %v1857_v18 = vadd.f32 %v1856_v45, %v1794_v8  ;;  %v5133_v8 = vsub.f32 %v4794_v1, %v5083_v63  ;;  %v1799_v45 = vmul.f32 %v5113_v40, %v5113_v40  ;;  %v5149_v1 = vsub.f32 %v4867_v5, %v5037_v48 }
 0x265   : > { %v1800_v62 = vmul.f32 %v5127_v4, %v5127_v4  ;;  %v1801_v5 = vmul.f32 %v5137_v59, %v5137_v59 }
 0x266   : > { %v1858_v39 = vadd.f32 %v1857_v18, %v1795_v13  ;;  %v1822_v18 = vmul.f32 %v5119_v55, %v5119_v55  ;;  %v1823_v10 = vmul.f32 %v5133_v8, %v5133_v8 }
 0x268   : > { %v1859_v61 = vadd.f32 %v1858_v39, %v1796_v28  ;;  %v1885_v28 = vadd.f32 %v1821_v50, %v1820_v32  ;;  %v5167_v50 = vsub.f32 %v4819_v20, %v5083_v63 }
 0x26a   : > { %v1860_v38 = vadd.f32 %v1859_v61, %v1797_v54  ;;  %v5155_v54 = vsub.f32 %v4815_v16, %v5083_v63  ;;  %v1886_v61 = vadd.f32 %v1885_v28, %v1822_v18  ;;  %v1824_v16 = vmul.f32 %v5143_v51, %v5143_v51 }
 0x26b   : > { %v5179_v18 = vsub.f32 %v4826_v25, %v5083_v63  ;;  %v1826_v25 = vmul.f32 %v5167_v50, %v5167_v50 }
 0x26c   : > { %v1861_v13 = vadd.f32 %v1860_v38, %v1798_v37  ;;  %v5161_v37 = vsub.f32 %v4874_v12, %v5037_v48  ;;  %v1887_v38 = vadd.f32 %v1886_v61, %v1823_v10  ;;  %v1802_v12 = vmul.f32 %v5149_v1, %v5149_v1 }
 0x26d   : > { %v1825_v20 = vmul.f32 %v5155_v54, %v5155_v54  ;;  %v5191_v10 = vsub.f32 %v4839_v34, %v5083_v63  ;;  %v1827_v34 = vmul.f32 %v5179_v18, %v5179_v18 }
 0x26e   : > { %v1862_v39 = vadd.f32 %v1861_v13, %v1799_v45  ;;  %v5173_v45 = vsub.f32 %v4887_v26, %v5037_v48  ;;  %v1888_v28 = vadd.f32 %v1887_v38, %v1824_v16  ;;  %v1803_v26 = vmul.f32 %v5161_v37, %v5161_v37 }
 0x26f   : > { %v5203_v16 = vsub.f32 %v4847_v41, %v5083_v63  ;;  %v1828_v41 = vmul.f32 %v5191_v10, %v5191_v10 }
 0x270   : > { %v1863_v32 = vadd.f32 %v1862_v39, %v1800_v62  ;;  %v5185_v62 = vsub.f32 %v4895_v35, %v5037_v48  ;;  %v1889_v61 = vadd.f32 %v1888_v28, %v1825_v20  ;;  %v1804_v35 = vmul.f32 %v5173_v45, %v5173_v45 }
 0x271   : > { %v5215_v20 = vsub.f32 %v4851_v49, %v5083_v63  ;;  %v1829_v49 = vmul.f32 %v5203_v16, %v5203_v16 }
 0x272   : > { %v1864_v13 = vadd.f32 %v1863_v32, %v1801_v5  ;;  %v5197_v5 = vsub.f32 %v4899_v42, %v5037_v48  ;;  %v1890_v38 = vadd.f32 %v1889_v61, %v1826_v25  ;;  %v1805_v42 = vmul.f32 %v5185_v62, %v5185_v62 }
 0x273   : > { %v5227_v25 = vsub.f32 %v4858_v57, %v5083_v63  ;;  %v1830_v57 = vmul.f32 %v5215_v20, %v5215_v20 }
 0x274   : > { %v1865_v39 = vadd.f32 %v1864_v13, %v1802_v12  ;;  %v5209_v12 = vsub.f32 %v4906_v56, %v5037_v48  ;;  %v1891_v28 = vadd.f32 %v1890_v38, %v1827_v34  ;;  %v1806_v56 = vmul.f32 %v5197_v5, %v5197_v5 }
 0x275   : > { %v5239_v34 = vsub.f32 %v4871_v7, %v5083_v63  ;;  %v1831_v7 = vmul.f32 %v5227_v25, %v5227_v25 }
 0x276   : > { %v1866_v32 = vadd.f32 %v1865_v39, %v1803_v26  ;;  %v5221_v26 = vsub.f32 %v4919_v14, %v5037_v48  ;;  %v1892_v61 = vadd.f32 %v1891_v28, %v1828_v41  ;;  %v1807_v14 = vmul.f32 %v5209_v12, %v5209_v12 }
 0x277   : > { %v5251_v41 = vsub.f32 %v4879_v17, %v5083_v63  ;;  %v1832_v17 = vmul.f32 %v5239_v34, %v5239_v34 }
 0x278   : > { %v1867_v13 = vadd.f32 %v1866_v32, %v1804_v35  ;;  %7201 = vst [vmem:[#allocation23_spill] sm:$0xff] %v5221_v26  ;;  %v5233_v35 = vsub.f32 %v4927_v27, %v5037_v48  ;;  %v1893_v38 = vadd.f32 %v1892_v61, %v1829_v49  ;;  %v1808_v27 = vmul.f32 %v5221_v26, %v5221_v26 }
 0x279   : > { %v5263_v49 = vsub.f32 %v4883_v23, %v5083_v63  ;;  %v1833_v23 = vmul.f32 %v5251_v41, %v5251_v41 }
 0x27a   : > { %v1868_v39 = vadd.f32 %v1867_v13, %v1805_v42  ;;  %7202 = vst [vmem:[#allocation24_spill] sm:$0xff] %v5233_v35  ;;  %v5245_v42 = vsub.f32 %v4931_v36, %v5037_v48  ;;  %v1894_v28 = vadd.f32 %v1893_v38, %v1830_v57  ;;  %v1809_v36 = vmul.f32 %v5233_v35, %v5233_v35 }
 0x27b   : > { %v5275_v57 = vsub.f32 %v4890_v30, %v5083_v63  ;;  %v1834_v30 = vmul.f32 %v5263_v49, %v5263_v49 }
 0x27c   : > { %v1869_v32 = vadd.f32 %v1868_v39, %v1806_v56  ;;  %7203 = vst [vmem:[#allocation25_spill] sm:$0xff] %v5245_v42  ;;  %v5257_v56 = vsub.f32 %v4938_v53, %v5037_v48  ;;  %v1895_v61 = vadd.f32 %v1894_v28, %v1831_v7  ;;  %v1810_v53 = vmul.f32 %v5245_v42, %v5245_v42 }
 0x27d   : > { %v5287_v7 = vsub.f32 %v4903_v46, %v5083_v63  ;;  %v1835_v46 = vmul.f32 %v5275_v57, %v5275_v57 }
 0x27e   : > { %v1870_v13 = vadd.f32 %v1869_v32, %v1807_v14  ;;  %7204 = vst [vmem:[#allocation26_spill] sm:$0xff] %v5257_v56  ;;  %v5269_v14 = vsub.f32 %v4951_v24, %v5037_v48  ;;  %v1896_v38 = vadd.f32 %v1895_v61, %v1832_v17  ;;  %v1811_v24 = vmul.f32 %v5257_v56, %v5257_v56  ;;  %v7208_v17 = vld [vmem:[#allocation5_spill] sm:$0xff] }
 0x27f   : > { %v5299_v61 = vsub.f32 %v7208_v17, %v5083_v63  ;;  %v5317_v17 = vsub.f32 %v4983_v9, %v5037_v48 }
 0x280   : > { %v1871_v39 = vadd.f32 %v1870_v13, %v1808_v27  ;;  %7205 = vst [vmem:[#allocation27_spill] sm:$0xff] %v5269_v14  ;;  %v5281_v27 = vsub.f32 %v4959_v0, %v5037_v48  ;;  %v1897_v28 = vadd.f32 %v1896_v38, %v1833_v23  ;;  %v1812_v0 = vmul.f32 %v5269_v14, %v5269_v14  ;;  %v7211_v38 = vld [vmem:[#allocation6_spill] sm:$0xff] }
 0x281   : > { %v5311_v14 = vsub.f32 %v7211_v38, %v5083_v63  ;;  %v5329_v38 = vsub.f32 %v4991_v2, %v5037_v48  ;;  %v1816_v2 = vmul.f32 %v5317_v17, %v5317_v17 }
 0x282   : > { %v1872_v32 = vadd.f32 %v1871_v39, %v1809_v36  ;;  %7206 = vst [vmem:[#allocation28_spill] sm:$0xff] %v5281_v27  ;;  %v5293_v36 = vsub.f32 %v4963_v60, %v5037_v48  ;;  %v1813_v60 = vmul.f32 %v5281_v27, %v5281_v27 }
 0x283   : > { %7214 = vst [vmem:[#allocation6_spill] sm:$0xff] %v5329_v38 }
 0x284   : > { %v1873_v13 = vadd.f32 %v1872_v32, %v1810_v53  ;;  %7207 = vst [vmem:[#allocation29_spill] sm:$0xff] %v5293_v36  ;;  %v1898_v53 = vadd.f32 %v1897_v28, %v1834_v30  ;;  %v7209_v32 = vld [vmem:[#allocation13_spill] sm:$0xff]  ;;  %v1814_v30 = vmul.f32 %v5293_v36, %v5293_v36 }
 0x285   : > { %v5305_v42 = vsub.f32 %v7209_v32, %v5037_v48  ;;  %7212 = vst [vmem:[#allocation13_spill] sm:$0xff] %v5317_v17  ;;  %v7213_v32 = vld [vmem:[#allocation7_spill] sm:$0xff] }
 0x286   : > { %v1874_v39 = vadd.f32 %v1873_v13, %v1811_v24  ;;  %v1836_v24 = vmul.f32 %v5287_v7, %v5287_v7  ;;  %v1899_v13 = vadd.f32 %v1898_v53, %v1835_v46  ;;  %v5323_v27 = vsub.f32 %v7213_v32, %v5083_v63  ;;  %v7215_v53 = vld [vmem:[#allocation8_spill] sm:$0xff]  ;;  %v7216_v32 = vld [vmem:[#allocation17_spill] sm:$0xff] }
 0x287   : > { %7210 = vst [vmem:[#allocation5_spill] sm:$0xff] %v5305_v42  ;;  %v1815_v9 = vmul.f32 %v5305_v42, %v5305_v42  ;;  %v5335_v36 = vsub.f32 %v7215_v53, %v5083_v63  ;;  %v5341_v26 = vsub.f32 %v7216_v32, %v5037_v48  ;;  %v7219_v53 = vld [vmem:[#allocation19_spill] sm:$0xff]  ;;  %v7221_v32 = vld [vmem:[#allocation10_spill] sm:$0xff] }
 0x288   : > { %v1875_v23 = vadd.f32 %v1874_v39, %v1812_v0  ;;  %v1837_v0 = vmul.f32 %v5299_v61, %v5299_v61  ;;  %v1900_v39 = vadd.f32 %v1899_v13, %v1836_v24  ;;  %v7218_v13 = vld [vmem:[#allocation9_spill] sm:$0xff]  ;;  %v5353_v56 = vsub.f32 %v7219_v53, %v5037_v48 }
 0x289   : > { %7217 = vst [vmem:[#allocation7_spill] sm:$0xff] %v5341_v26  ;;  %v5347_v42 = vsub.f32 %v7218_v13, %v5083_v63  ;;  %v5359_v17 = vsub.f32 %v7221_v32, %v5083_v63  ;;  %v1818_v13 = vmul.f32 %v5341_v26, %v5341_v26 }
 0x28a   : > { %v1876_v28 = vadd.f32 %v1875_v23, %v1813_v60  ;;  %v1838_v60 = vmul.f32 %v5311_v14, %v5311_v14  ;;  %v1901_v23 = vadd.f32 %v1900_v39, %v1837_v0  ;;  %7220 = vst [vmem:[#allocation8_spill] sm:$0xff] %v5353_v56  ;;  %v1817_v0 = vmul.f32 %v5329_v38, %v5329_v38  ;;  %v7223_v38 = vld [vmem:[#allocation12_spill] sm:$0xff] }
 0x28b   : > { %v1841_v53 = vmul.f32 %v5347_v42, %v5347_v42  ;;  %v5375_v35 = vsub.f32 %v7223_v38, %v5083_v63 }
 0x28c   : > { %v1877_v46 = vadd.f32 %v1876_v28, %v1814_v30  ;;  %v1839_v30 = vmul.f32 %v5323_v27, %v5323_v27  ;;  %v1902_v28 = vadd.f32 %v1901_v23, %v1838_v60  ;;  %v7222_v23 = vld [vmem:[#allocation11_spill] sm:$0xff] }
 0x28d   : > { %v5367_v48 = vsub.f32 %v7222_v23, %v5083_v63  ;;  %7224 = vst [vmem:[#allocation17_spill] sm:$0xff] %v5375_v35  ;;  %v1844_v38 = vmul.f32 %v5375_v35, %v5375_v35 }
 0x28e   : > { %v1878_v24 = vadd.f32 %v1877_v46, %v1815_v9  ;;  %v1840_v9 = vmul.f32 %v5335_v36, %v5335_v36  ;;  %v1903_v46 = vadd.f32 %v1902_v28, %v1839_v30  ;;  %v1842_v30 = vmul.f32 %v5359_v17, %v5359_v17 }
 0x290   : > { %v1879_v39 = vadd.f32 %v1878_v24, %v1816_v2  ;;  %v1904_v2 = vadd.f32 %v1903_v46, %v1840_v9  ;;  %v1819_v24 = vmul.f32 %v5353_v56, %v5353_v56  ;;  %v1843_v9 = vmul.f32 %v5367_v48, %v5367_v48 }
 0x292   : > { %v1880_v60 = vadd.f32 %v1879_v39, %v1817_v0  ;;  %v1905_v28 = vadd.f32 %v1904_v2, %v1841_v53  ;;  %v7225_v39 = vld [vmem:[#allocation14_spill] sm:$0xff]  ;;  %v7229_v53 = vld [vmem:[#allocation16_spill] sm:$0xff] }
 0x293   : > { %v5381_v23 = vsub.f32 %v7225_v39, %v5083_v63  ;;  %v5393_v2 = vsub.f32 %v7229_v53, %v5083_v63  ;;  %v7231_v39 = vld [vmem:[#allocation18_spill] sm:$0xff]  ;;  %v7235_v53 = vld [vmem:[#allocation21_spill] sm:$0xff] }
 0x294   : > { %v1881_v32 = vadd.f32 %v1880_v60, %v1818_v13  ;;  %v1906_v46 = vadd.f32 %v1905_v28, %v1842_v30  ;;  %v7227_v13 = vld [vmem:[#allocation15_spill] sm:$0xff]  ;;  %v5399_v30 = vsub.f32 %v7231_v39, %v5083_v63  ;;  %v5411_v35 = vsub.f32 %v7235_v53, %v5083_v63  ;;  %v7237_v39 = vld [vmem:[#allocation22_spill] sm:$0xff] }
 0x295   : > { %7226 = vst [vmem:[#allocation9_spill] sm:$0xff] %v5381_v23  ;;  %v5387_v60 = vsub.f32 %v7227_v13, %v5083_v63  ;;  %7230 = vst [vmem:[#allocation10_spill] sm:$0xff] %v5393_v2  ;;  %v7233_v13 = vld [vmem:[#allocation20_spill] sm:$0xff] }
 0x296   : > { %v1882_v0 = vadd.f32 %v1881_v32, %v1819_v24  ;;  %v1907_v26 = vadd.f32 %v1906_v46, %v1843_v9  ;;  %v1845_v24 = vmul.f32 %v5381_v23, %v5381_v23  ;;  %7232 = vst [vmem:[#allocation11_spill] sm:$0xff] %v5399_v30  ;;  %v5405_v56 = vsub.f32 %v7233_v13, %v5083_v63 }
 0x297   : > { %7228 = vst [vmem:[#allocation19_spill] sm:$0xff] %v5387_v60  ;;  %v1846_v28 = vmul.f32 %v5387_v60, %v5387_v60  ;;  %v1847_v9 = vmul.f32 %v5393_v2, %v5393_v2  ;;  %7236 = vst [vmem:[#allocation14_spill] sm:$0xff] %v5411_v35  ;;  %v5417_v60 = vsub.f32 %v7237_v39, %v5083_v63 }
 0x298   : > { %1883 = vadd.xlane.f32.xlu1 %v1882_v0  ;;  %v1908_v32 = vadd.f32 %v1907_v26, %v1844_v38  ;;  %7234 = vst [vmem:[#allocation12_spill] sm:$0xff] %v5405_v56  ;;  %v1848_v26 = vmul.f32 %v5399_v30, %v5399_v30  ;;  %v1850_v13 = vmul.f32 %v5411_v35, %v5411_v35 }
 0x299   : > { %7238 = vst [vmem:[#allocation15_spill] sm:$0xff] %v5417_v60 }
 0x29a   : > { %v1909_v0 = vadd.f32 %v1908_v32, %v1845_v24  ;;  %v1849_v24 = vmul.f32 %v5405_v56, %v5405_v56 }
 0x29c   : > { %v1910_v46 = vadd.f32 %v1909_v0, %v1846_v28  ;;  %v1851_v0 = vmul.f32 %v5417_v60, %v5417_v60 }
 0x29e   : > { %v1911_v38 = vadd.f32 %v1910_v46, %v1847_v9 }
 0x2a0   : > { %v1912_v32 = vadd.f32 %v1911_v38, %v1848_v26 }
 0x2a2   : > { %v1913_v28 = vadd.f32 %v1912_v32, %v1849_v24 }
 0x2a4   : > { %v1914_v53 = vadd.f32 %v1913_v28, %v1850_v13 }
 0x2a6   : > { %v1915_v2 = vadd.f32 %v1914_v53, %v1851_v0 }
 0x2a8   : > { %1916 = vadd.xlane.f32.xlu1 %v1915_v2 }
 0x321   : > { %v1884_v30 = vpop.xlane.xlu1 %1883 }
 0x322   : > { %v1918_v9 = vmul.f32 %v1884_v30, %v5022_v33 }
 0x324   : > { %v1920_v39 = vsel %vm1705_vm2, %v1918_v9, 0.0 }
 0x331   : > { %v1917_v46 = vpop.xlane.xlu1 %1916 }
 0x332   : > { %v1919_v63 = vmul.f32 %v1917_v46, %v5027_v31 }
 0x334   : > { %v1921_v26 = vsel %vm1705_vm2, %v1919_v63, 0.0  ;;  %v4521_v63 = vmov 1  }
 0x335   : > { %v1922_v38 = vadd.f32 %v1921_v26, %v1920_v39  ;;  %v4473_v39 = vld [vmem:[%s7100_s3 + $0x8] sm:$0xff] }
 0x337   : > { %v1923_v56 = vrot.slane %v1922_v38, 4 }
 0x339   : > { %v1924_v35 = vadd.f32 %v1923_v56, %v1922_v38 }
 0x33b   : > { %v1925_v24 = vrot.slane %v1924_v35, 2 }
 0x33d   : > { %v1926_v32 = vadd.f32 %v1925_v24, %v1924_v35  ;;  %v1636_v35 = vld [vmem:[%s7101_s4 + $0x8] sm:$0xff] }
 0x33f   : > { %v1927_v23 = vrot.slane %v1926_v32, 1 }
 0x341   : > { %v1928_v60 = vadd.f32 %v1927_v23, %v1926_v32 }
 0x343   : > { %v1929_v13 = vmul.f32 3.0517578e-05, %v1928_v60  ;;  %v1635_v60 = vld [vmem:[%s7101_s4] sm:$0xff] }
 0x345   : > { %v1930_v28 = vadd.f32 1e-05, %v1929_v13 }
 0x347   : > { %4468 = vrsqrt.f32 %v1930_v28 }
 0x354   : > { %v4469_v2 = vpop.eup %4468 }
 0x355   : > { %v1933_v30 = vmul.f32 %v4469_v2, %v5027_v31  ;;  %v1932_v53 = vmul.f32 %v4469_v2, %v5022_v33  ;;  %v4472_v33 = vld [vmem:[%s7100_s3] sm:$0xff] }
 0x357   : > { %v1937_v0 = vsel %vm1705_vm2, %v1933_v30, 0.0  ;;  %v1934_v9 = vsel %vm1705_vm2, %v1932_v53, 0.0 }
 0x358   : > { %1938 = vadd.xlane.f32.xlu1 %v1937_v0 }
 0x35c   : > { %1935 = vadd.xlane.f32.xlu1 %v1934_v9 }
 0x3e1   : > { %v1939_v56 = vpop.xlane.xlu1 %1938 }
 0x3e2   : > { %v1941_v23 = vmul.f32 %v1939_v56, %v1636_v35 }
 0x3e4   : > { %1949 = vperm.xlu1 %4446, %v1941_v23  }
 0x3e5   : > { %v1936_v31 = vpop.xlane.xlu1 %1935 }
 0x3e6   : > { %v1940_v46 = vmul.f32 %v1936_v31, %v1635_v60 }
 0x3e8   : > { %4447 = vset.pattern.permute.xlu1 %v4521_v63  ;;  %1944 = vperm.xlu0 %4445, %v1940_v46  }
 0x3e9   : > { %2023 = vperm.xlu1 %4447, %v1636_v35  }
 0x3ed   : > { %2018 = vperm.xlu1 %4447, %v1635_v60  }
 0x3f1   : > { %2288 = vperm.xlu1 %4447, %v4472_v33  }
 0x3f5   : > { %2293 = vperm.xlu1 %4447, %v4473_v39  }
 0x45f   : > { %v5445_v26 = vpop.permute.xlu1 %1949 }
 0x460   : > { %v1985_v38 = vmul.f32 %v5445_v26, %v5103_v22  ;;  %v1987_v24 = vmul.f32 %v5445_v26, %v5133_v8  ;;  %v1984_v32 = vmul.f32 %v5445_v26, %v5099_v44  ;;  %v1986_v13 = vmul.f32 %v5445_v26, %v5119_v55 }
 0x461   : > { %v1989_v28 = vmul.f32 %v5445_v26, %v5155_v54  ;;  %v1991_v2 = vmul.f32 %v5445_v26, %v5179_v18  ;;  %v1988_v30 = vmul.f32 %v5445_v26, %v5143_v51  ;;  %v1990_v22 = vmul.f32 %v5445_v26, %v5167_v50 }
 0x462   : > { %v5465_v8 = vmul.f32 %v5445_v26, %v5203_v16  ;;  %v5469_v44 = vmul.f32 %v5445_v26, %v5227_v25  ;;  %v5473_v55 = vmul.f32 %v5445_v26, %v5191_v10  ;;  %v5477_v54 = vmul.f32 %v5445_v26, %v5215_v20 }
 0x463   : > { %v5479_v51 = vpop.permute.xlu0 %1944  ;;  %v5483_v50 = vmul.f32 %v5445_v26, %v5251_v41  ;;  %v5487_v18 = vmul.f32 %v5445_v26, %v5275_v57  ;;  %v5491_v16 = vmul.f32 %v5445_v26, %v5239_v34  ;;  %v5495_v10 = vmul.f32 %v5445_v26, %v5263_v49 }
 0x464   : > { %v5497_v20 = vpop.permute.xlu1 %2023  ;;  %v1953_v25 = vmul.f32 %v5479_v51, %v5045_v6  ;;  %v1955_v41 = vmul.f32 %v5479_v51, %v5057_v58  ;;  %v1952_v57 = vmul.f32 %v5479_v51, %v5041_v19  ;;  %v1954_v0 = vmul.f32 %v5479_v51, %v5049_v29 }
 0x465   : > { %v2059_v34 = vadd.f32 %v5497_v20, %v1985_v38  ;;  %v2061_v53 = vadd.f32 %v5497_v20, %v1987_v24  ;;  %v2058_v49 = vadd.f32 %v5497_v20, %v1984_v32  ;;  %v2060_v9 = vadd.f32 %v5497_v20, %v1986_v13 }
 0x466   : > { %v2063_v6 = vadd.f32 %v5497_v20, %v1989_v28  ;;  %v2065_v35 = vadd.f32 %v5497_v20, %v1991_v2  ;;  %v2062_v58 = vadd.f32 %v5497_v20, %v1988_v30  ;;  %v2064_v19 = vadd.f32 %v5497_v20, %v1990_v22 }
 0x467   : > { %vm2123_vm4 = vcmp.ge.f32.partialorder %v2059_v34, 0.0  ;;  %v2187_v56 = vmul.f32 0.2, %v2059_v34  ;;  %vm2125_vm5 = vcmp.ge.f32.partialorder %v2061_v53, 0.0  ;;  %v2189_v29 = vmul.f32 0.2, %v2061_v53 }
 0x468   : > { %v5515_v23 = vpop.permute.xlu1 %2018  ;;  %vm2122_vm6 = vcmp.ge.f32.partialorder %v2058_v49, 0.0  ;;  %v2186_v60 = vmul.f32 0.2, %v2058_v49  ;;  %vm2124_vm7 = vcmp.ge.f32.partialorder %v2060_v9, 0.0  ;;  %v2188_v31 = vmul.f32 0.2, %v2060_v9 }
 0x469   : > { %v2251_v46 = vsel %vm2123_vm4, %v2059_v34, %v2187_v56  ;;  %v2253_v63 = vsel %vm2125_vm5, %v2061_v53, %v2189_v29  ;;  %v2027_v33 = vadd.f32 %v5515_v23, %v1953_v25  ;;  %v2029_v39 = vadd.f32 %v5515_v23, %v1955_v41  ;;  %v5521_v34 = vld [vmem:[#allocation2] sm:$0xff] }
 0x46a   : > { %2331 = vmatprep.subr.mxu0 %v2251_v46  ;;  %2408 = vmatprep.subr.mxu1 %v2253_v63  ;;  %v2250_v38 = vsel %vm2122_vm6, %v2058_v49, %v2186_v60  ;;  %v2252_v24 = vsel %vm2124_vm7, %v2060_v9, %v2188_v31  ;;  %v2026_v32 = vadd.f32 %v5515_v23, %v1952_v57  ;;  %vm2127_vm8 = vcmp.ge.f32.partialorder %v2063_v6, 0.0 }
 0x46b   : > { %2332 = vmatpush1.msra.mxu0 %v2250_v38  ;;  %2409 = vmatpush1.msra.mxu1 %v2252_v24  ;;  %vm2091_vm9 = vcmp.ge.f32.partialorder %v2027_v33, 0.0  ;;  %v2155_v13 = vmul.f32 0.2, %v2027_v33  ;;  %vm2093_vm10 = vcmp.ge.f32.partialorder %v2029_v39, 0.0  ;;  %v2157_v28 = vmul.f32 0.2, %v2029_v39 }
 0x46c   : > { %vm2090_vm11 = vcmp.ge.f32.partialorder %v2026_v32, 0.0  ;;  %v2154_v2 = vmul.f32 0.2, %v2026_v32  ;;  %v2028_v30 = vadd.f32 %v5515_v23, %v1954_v0  ;;  %v2191_v22 = vmul.f32 0.2, %v2063_v6 }
 0x46d   : > { %v2219_v25 = vsel %vm2091_vm9, %v2027_v33, %v2155_v13  ;;  %v2221_v41 = vsel %vm2093_vm10, %v2029_v39, %v2157_v28  ;;  %vm2129_vm12 = vcmp.ge.f32.partialorder %v2065_v35, 0.0  ;;  %v2193_v53 = vmul.f32 0.2, %v2065_v35  ;;  %v5535_v39 = vld [vmem:[#allocation2 + $0x8] sm:$0xff] }
 0x46e   : > { %2333 = vmatprep.subr.mxu0 %v2219_v25  ;;  %2410 = vmatprep.subr.mxu1 %v2221_v41  ;;  %v2218_v57 = vsel %vm2090_vm11, %v2026_v32, %v2154_v2  ;;  %vm2092_vm13 = vcmp.ge.f32.partialorder %v2028_v30, 0.0  ;;  %v2156_v49 = vmul.f32 0.2, %v2028_v30  ;;  %v2255_v9 = vsel %vm2127_vm8, %v2063_v6, %v2191_v22 }
 0x46f   : > { %2334 = vmatpush1.msra.mxu0 %v2218_v57  ;;  %v2257_v56 = vsel %vm2129_vm12, %v2065_v35, %v2193_v53  ;;  %vm2126_vm14 = vcmp.ge.f32.partialorder %v2062_v58, 0.0  ;;  %v2190_v29 = vmul.f32 0.2, %v2062_v58  ;;  %vm2128_vm15 = vcmp.ge.f32.partialorder %v2064_v19, 0.0 }
 0x470   : > { %v2220_v0 = vsel %vm2092_vm13, %v2028_v30, %v2156_v49  ;;  %4383 = vmatmul.mubr.msk.f32.vlgmr.msra.gmra.mxu0 %vm2296_vm3, %v5521_v34  ;;  %2485 = vmatprep.subr.mxu0 %v2255_v9  ;;  %v2192_v60 = vmul.f32 0.2, %v2064_v19  ;;  %v1957_v31 = vmul.f32 %v5479_v51, %v5067_v47  ;;  %v1959_v46 = vmul.f32 %v5479_v51, %v5079_v11 }
 0x471   : > { %2411 = vmatpush1.msra.mxu1 %v2220_v0  ;;  %v2254_v63 = vsel %vm2126_vm14, %v2062_v58, %v2190_v29  ;;  %v7239_v6 = vmov 0.0   ;;  %v1956_v35 = vmul.f32 %v5479_v51, %v5061_v43  ;;  %v1958_v33 = vmul.f32 %v5479_v51, %v5073_v52 }
 0x472   : > { %2373 = vmatprep.mubr.f32.mxu0 %v7239_v6  ;;  %4385 = vmatmul.mubr.msk.f32.vlgmr.msra.gmra.mxu1 %vm2296_vm3, %v5521_v34  ;;  %v2256_v47 = vsel %vm2128_vm15, %v2064_v19, %v2192_v60  ;;  %v2031_v38 = vadd.f32 %v5515_v23, %v1957_v31  ;;  %v2033_v11 = vadd.f32 %v5515_v23, %v1959_v46 }
 0x473   : > { %2562 = vmatprep.subr.mxu1 %v2257_v56  ;;  %2486 = vmatpush1.msra.mxu0 %v2254_v63  ;;  %v2030_v58 = vadd.f32 %v5515_v23, %v1956_v35  ;;  %v2032_v43 = vadd.f32 %v5515_v23, %v1958_v33  ;;  %v2067_v52 = vadd.f32 %v5497_v20, %v5465_v8 }
 0x474   : > { %2563 = vmatpush1.msra.mxu1 %v2256_v47  ;;  %vm2095_vm0 = vcmp.ge.f32.partialorder %v2031_v38, 0.0  ;;  %v2159_v24 = vmul.f32 0.2, %v2031_v38  ;;  %vm2097_vm1 = vcmp.ge.f32.partialorder %v2033_v11, 0.0  ;;  %v2161_v32 = vmul.f32 0.2, %v2033_v11  ;;  %2450 = vmatprep.mubr.f32.mxu1 %v7239_v6 }
 0x475   : > { %4384 = vmatmul.mubr.msk.f32.gmra.mxu0 %vm2296_vm3, %v5535_v39  ;;  %vm2094_vm4 = vcmp.ge.f32.partialorder %v2030_v58, 0.0  ;;  %v2158_v19 = vmul.f32 0.2, %v2030_v58  ;;  %vm2096_vm5 = vcmp.ge.f32.partialorder %v2032_v43, 0.0  ;;  %v2160_v13 = vmul.f32 0.2, %v2032_v43 }
 0x476   : > { %2521 = vmatprep.mubr.f32.mxu0 %v7239_v6  ;;  %v2223_v28 = vsel %vm2095_vm0, %v2031_v38, %v2159_v24  ;;  %v2225_v2 = vsel %vm2097_vm1, %v2033_v11, %v2161_v32  ;;  %4386 = vmatmul.mubr.msk.f32.gmra.mxu1 %vm2296_vm3, %v5535_v39  ;;  %vm2131_vm6 = vcmp.ge.f32.partialorder %v2067_v52, 0.0  ;;  %v2195_v8 = vmul.f32 0.2, %v2067_v52 }
 0x477   : > { %2487 = vmatprep.subr.mxu0 %v2223_v28  ;;  %2564 = vmatprep.subr.mxu1 %v2225_v2  ;;  %v2222_v30 = vsel %vm2094_vm4, %v2030_v58, %v2158_v19  ;;  %v2224_v22 = vsel %vm2096_vm5, %v2032_v43, %v2160_v13  ;;  %v2069_v25 = vadd.f32 %v5497_v20, %v5469_v44 }
 0x478   : > { %2488 = vmatpush1.msra.mxu0 %v2222_v30  ;;  %2565 = vmatpush1.msra.mxu1 %v2224_v22  ;;  %v2259_v41 = vsel %vm2131_vm6, %v2067_v52, %v2195_v8  ;;  %v2066_v53 = vadd.f32 %v5497_v20, %v5473_v55  ;;  %v2068_v57 = vadd.f32 %v5497_v20, %v5477_v54 }
 0x479   : > { %2639 = vmatprep.subr.mxu0 %v2259_v41  ;;  %vm2133_vm7 = vcmp.ge.f32.partialorder %v2069_v25, 0.0  ;;  %v2197_v49 = vmul.f32 0.2, %v2069_v25  ;;  %2598 = vmatprep.mubr.f32.mxu1 %v7239_v6  ;;  %v1961_v9 = vmul.f32 %v5479_v51, %v5093_v15  ;;  %v1963_v44 = vmul.f32 %v5479_v51, %v5113_v40 }
 0x47a   : > { %4387 = vmatmul.mubr.msk.f32.vlgmr.msra.gmra.mxu0 %vm2296_vm3, %v5521_v34  ;;  %4389 = vmatmul.mubr.msk.f32.vlgmr.msra.gmra.mxu1 %vm2296_vm3, %v5521_v34  ;;  %vm2130_vm8 = vcmp.ge.f32.partialorder %v2066_v53, 0.0  ;;  %v2194_v55 = vmul.f32 0.2, %v2066_v53  ;;  %vm2132_vm9 = vcmp.ge.f32.partialorder %v2068_v57, 0.0  ;;  %v2196_v54 = vmul.f32 0.2, %v2068_v57 }
 0x47b   : > { %v2261_v56 = vsel %vm2133_vm7, %v2069_v25, %v2197_v49  ;;  %v2035_v29 = vadd.f32 %v5515_v23, %v1961_v9  ;;  %v2037_v0 = vadd.f32 %v5515_v23, %v1963_v44  ;;  %v1960_v15 = vmul.f32 %v5479_v51, %v5087_v21  ;;  %2527 = vmatprep.mubr.f32.mxu0 %v7239_v6 }
 0x47c   : > { %2716 = vmatprep.subr.mxu1 %v2261_v56  ;;  %v2258_v40 = vsel %vm2130_vm8, %v2066_v53, %v2194_v55  ;;  %v2260_v60 = vsel %vm2132_vm9, %v2068_v57, %v2196_v54  ;;  %v1962_v31 = vmul.f32 %v5479_v51, %v5107_v3  ;;  %2604 = vmatprep.mubr.f32.mxu1 %v7239_v6 }
 0x47d   : > { %2640 = vmatpush1.msra.mxu0 %v2258_v40  ;;  %2717 = vmatpush1.msra.mxu1 %v2260_v60  ;;  %vm2099_vm10 = vcmp.ge.f32.partialorder %v2035_v29, 0.0  ;;  %v2163_v46 = vmul.f32 0.2, %v2035_v29  ;;  %vm2101_vm11 = vcmp.ge.f32.partialorder %v2037_v0, 0.0  ;;  %v2165_v63 = vmul.f32 0.2, %v2037_v0 }
 0x47e   : > { %v2034_v35 = vadd.f32 %v5515_v23, %v1960_v15  ;;  %v2036_v21 = vadd.f32 %v5515_v23, %v1962_v31  ;;  %v2071_v33 = vadd.f32 %v5497_v20, %v5483_v50  ;;  %v2073_v47 = vadd.f32 %v5497_v20, %v5487_v18  ;;  %4388 = vmatmul.mubr.msk.f32.gmra.mxu0 %vm2296_vm3, %v5535_v39 }
 0x47f   : > { %v2227_v3 = vsel %vm2099_vm10, %v2035_v29, %v2163_v46  ;;  %v2229_v38 = vsel %vm2101_vm11, %v2037_v0, %v2165_v63  ;;  %4390 = vmatmul.mubr.msk.f32.gmra.mxu1 %vm2296_vm3, %v5535_v39  ;;  %2675 = vmatprep.mubr.f32.mxu0 %v7239_v6  ;;  %v2070_v11 = vadd.f32 %v5497_v20, %v5491_v16 }
 0x480   : > { %2641 = vmatprep.subr.mxu0 %v2227_v3  ;;  %2718 = vmatprep.subr.mxu1 %v2229_v38  ;;  %vm2098_vm12 = vcmp.ge.f32.partialorder %v2034_v35, 0.0  ;;  %v2162_v50 = vmul.f32 0.2, %v2034_v35  ;;  %vm2100_vm13 = vcmp.ge.f32.partialorder %v2036_v21, 0.0  ;;  %v2164_v58 = vmul.f32 0.2, %v2036_v21 }
 0x481   : > { %vm2135_vm14 = vcmp.ge.f32.partialorder %v2071_v33, 0.0  ;;  %v2199_v18 = vmul.f32 0.2, %v2071_v33  ;;  %vm2137_vm15 = vcmp.ge.f32.partialorder %v2073_v47, 0.0  ;;  %v2201_v43 = vmul.f32 0.2, %v2073_v47  ;;  %2752 = vmatprep.mubr.f32.mxu1 %v7239_v6 }
 0x482   : > { %v2226_v52 = vsel %vm2098_vm12, %v2034_v35, %v2162_v50  ;;  %v2228_v24 = vsel %vm2100_vm13, %v2036_v21, %v2164_v58  ;;  %vm2134_vm0 = vcmp.ge.f32.partialorder %v2070_v11, 0.0  ;;  %v2198_v32 = vmul.f32 0.2, %v2070_v11 }
 0x483   : > { %2642 = vmatpush1.msra.mxu0 %v2226_v52  ;;  %2719 = vmatpush1.msra.mxu1 %v2228_v24  ;;  %v2263_v19 = vsel %vm2135_vm14, %v2071_v33, %v2199_v18  ;;  %v2265_v16 = vsel %vm2137_vm15, %v2073_v47, %v2201_v43  ;;  %v2072_v13 = vadd.f32 %v5497_v20, %v5495_v10 }
 0x484   : > { %2793 = vmatprep.subr.mxu0 %v2263_v19  ;;  %2870 = vmatprep.subr.mxu1 %v2265_v16  ;;  %v2262_v28 = vsel %vm2134_vm0, %v2070_v11, %v2198_v32  ;;  %v1965_v2 = vmul.f32 %v5479_v51, %v5137_v59  ;;  %v1967_v8 = vmul.f32 %v5479_v51, %v5161_v37 }
 0x485   : > { %4391 = vmatmul.mubr.msk.f32.vlgmr.msra.gmra.mxu0 %vm2296_vm3, %v5521_v34  ;;  %4393 = vmatmul.mubr.msk.f32.vlgmr.msra.gmra.mxu1 %vm2296_vm3, %v5521_v34  ;;  %vm2136_vm1 = vcmp.ge.f32.partialorder %v2072_v13, 0.0  ;;  %v2200_v30 = vmul.f32 0.2, %v2072_v13  ;;  %v1964_v10 = vmul.f32 %v5479_v51, %v5127_v4  ;;  %v1966_v22 = vmul.f32 %v5479_v51, %v5149_v1 }
 0x486   : > { %2794 = vmatpush1.msra.mxu0 %v2262_v28  ;;  %v2039_v59 = vadd.f32 %v5515_v23, %v1965_v2  ;;  %v2041_v25 = vadd.f32 %v5515_v23, %v1967_v8  ;;  %2681 = vmatprep.mubr.f32.mxu0 %v7239_v6  ;;  %v2001_v37 = vmul.f32 %v5445_v26, %v5299_v61 }
 0x487   : > { %v2264_v41 = vsel %vm2136_vm1, %v2072_v13, %v2200_v30  ;;  %v2038_v53 = vadd.f32 %v5515_v23, %v1964_v10  ;;  %v2040_v57 = vadd.f32 %v5515_v23, %v1966_v22  ;;  %2758 = vmatprep.mubr.f32.mxu1 %v7239_v6  ;;  %v2003_v4 = vmul.f32 %v5445_v26, %v5323_v27  ;;  %v7240_v30 = vld [vmem:[#allocation24_spill] sm:$0xff]  ;;  %v7241_v22 = vld [vmem:[#allocation26_spill] sm:$0xff] }
 0x488   : > { %2871 = vmatpush1.msra.mxu1 %v2264_v41  ;;  %vm2103_vm4 = vcmp.ge.f32.partialorder %v2039_v59, 0.0  ;;  %v2167_v1 = vmul.f32 0.2, %v2039_v59  ;;  %vm2105_vm5 = vcmp.ge.f32.partialorder %v2041_v25, 0.0  ;;  %v2169_v49 = vmul.f32 0.2, %v2041_v25 }
 0x489   : > { %vm2102_vm6 = vcmp.ge.f32.partialorder %v2038_v53, 0.0  ;;  %v2166_v9 = vmul.f32 0.2, %v2038_v53  ;;  %vm2104_vm7 = vcmp.ge.f32.partialorder %v2040_v57, 0.0  ;;  %v2168_v44 = vmul.f32 0.2, %v2040_v57  ;;  %4392 = vmatmul.mubr.msk.f32.gmra.mxu0 %vm2296_vm3, %v5535_v39  ;;  %4394 = vmatmul.mubr.msk.f32.gmra.mxu1 %vm2296_vm3, %v5535_v39 }
 0x48a   : > { %v2231_v61 = vsel %vm2103_vm4, %v2039_v59, %v2167_v1  ;;  %v2233_v55 = vsel %vm2105_vm5, %v2041_v25, %v2169_v49  ;;  %v2075_v54 = vadd.f32 %v5497_v20, %v2001_v37  ;;  %v2077_v27 = vadd.f32 %v5497_v20, %v2003_v4  ;;  %2829 = vmatprep.mubr.f32.mxu0 %v7239_v6  ;;  %v7242_v49 = vld [vmem:[#allocation23_spill] sm:$0xff] }
 0x48b   : > { %2795 = vmatprep.subr.mxu0 %v2231_v61  ;;  %2872 = vmatprep.subr.mxu1 %v2233_v55  ;;  %v2230_v56 = vsel %vm2102_vm6, %v2038_v53, %v2166_v9  ;;  %v2232_v29 = vsel %vm2104_vm7, %v2040_v57, %v2168_v44  ;;  %v2000_v0 = vmul.f32 %v5445_v26, %v5287_v7  ;;  %v7243_v44 = vld [vmem:[#allocation25_spill] sm:$0xff] }
 0x48c   : > { %2796 = vmatpush1.msra.mxu0 %v2230_v56  ;;  %2873 = vmatpush1.msra.mxu1 %v2232_v29  ;;  %vm2139_vm8 = vcmp.ge.f32.partialorder %v2075_v54, 0.0  ;;  %v2203_v15 = vmul.f32 0.2, %v2075_v54  ;;  %vm2141_vm9 = vcmp.ge.f32.partialorder %v2077_v27, 0.0  ;;  %v2205_v40 = vmul.f32 0.2, %v2077_v27 }
 0x48d   : > { %2906 = vmatprep.mubr.f32.mxu1 %v7239_v6  ;;  %4395 = vmatmul.mubr.msk.f32.vlgmr.msra.gmra.mxu0 %vm2296_vm3, %v5521_v34  ;;  %v2074_v60 = vadd.f32 %v5497_v20, %v2000_v0  ;;  %v2002_v31 = vmul.f32 %v5445_v26, %v5311_v14  ;;  %v1969_v46 = vmul.f32 %v5479_v51, %v5185_v62 }
 0x48e   : > { %v2267_v7 = vsel %vm2139_vm8, %v2075_v54, %v2203_v15  ;;  %v2269_v63 = vsel %vm2141_vm9, %v2077_v27, %v2205_v40  ;;  %4397 = vmatmul.mubr.msk.f32.vlgmr.msra.gmra.mxu1 %vm2296_vm3, %v5521_v34  ;;  %v1971_v35 = vmul.f32 %v5479_v51, %v5209_v12  ;;  %v1968_v21 = vmul.f32 %v5479_v51, %v5173_v45  ;;  %v7244_v40 = vld [vmem:[#allocation9_spill] sm:$0xff] }
 0x48f   : > { %2947 = vmatprep.subr.mxu0 %v2267_v7  ;;  %3024 = vmatprep.subr.mxu1 %v2269_v63  ;;  %vm2138_vm10 = vcmp.ge.f32.partialorder %v2074_v60, 0.0  ;;  %v2202_v33 = vmul.f32 0.2, %v2074_v60  ;;  %v2076_v14 = vadd.f32 %v5497_v20, %v2002_v31  ;;  %v2043_v47 = vadd.f32 %v5515_v23, %v1969_v46  ;;  %v7245_v31 = vld [vmem:[#allocation10_spill] sm:$0xff] }
 0x490   : > { %v2045_v62 = vadd.f32 %v5515_v23, %v1971_v35  ;;  %v2042_v3 = vadd.f32 %v5515_v23, %v1968_v21  ;;  %v1970_v38 = vmul.f32 %v5479_v51, %v5197_v5  ;;  %2835 = vmatprep.mubr.f32.mxu0 %v7239_v6  ;;  %2912 = vmatprep.mubr.f32.mxu1 %v7239_v6 }
 0x491   : > { %v2266_v45 = vsel %vm2138_vm10, %v2074_v60, %v2202_v33  ;;  %vm2140_vm11 = vcmp.ge.f32.partialorder %v2076_v14, 0.0  ;;  %v2204_v12 = vmul.f32 0.2, %v2076_v14  ;;  %vm2107_vm12 = vcmp.ge.f32.partialorder %v2043_v47, 0.0  ;;  %4396 = vmatmul.mubr.msk.f32.gmra.mxu0 %vm2296_vm3, %v5535_v39 }
 0x492   : > { %2948 = vmatpush1.msra.mxu0 %v2266_v45  ;;  %v2171_v11 = vmul.f32 0.2, %v2043_v47  ;;  %vm2109_vm13 = vcmp.ge.f32.partialorder %v2045_v62, 0.0  ;;  %v2173_v50 = vmul.f32 0.2, %v2045_v62  ;;  %vm2106_vm14 = vcmp.ge.f32.partialorder %v2042_v3, 0.0  ;;  %4398 = vmatmul.mubr.msk.f32.gmra.mxu1 %vm2296_vm3, %v5535_v39 }
 0x493   : > { %v2268_v5 = vsel %vm2140_vm11, %v2076_v14, %v2204_v12  ;;  %v2170_v58 = vmul.f32 0.2, %v2042_v3  ;;  %v2044_v18 = vadd.f32 %v5515_v23, %v1970_v38  ;;  %v2005_v43 = vmul.f32 %v5445_v26, %v5347_v42  ;;  %2983 = vmatprep.mubr.f32.mxu0 %v7239_v6  ;;  %3060 = vmatprep.mubr.f32.mxu1 %v7239_v6  ;;  %v7246_v14 = vld [vmem:[#allocation17_spill] sm:$0xff]  ;;  %v7248_v45 = vld [vmem:[#allocation28_spill] sm:$0xff] }
 0x494   : > { %3025 = vmatpush1.msra.mxu1 %v2268_v5  ;;  %v2235_v52 = vsel %vm2107_vm12, %v2043_v47, %v2171_v11  ;;  %v2237_v24 = vsel %vm2109_vm13, %v2045_v62, %v2173_v50  ;;  %v2007_v32 = vmul.f32 %v5445_v26, %v5367_v48  ;;  %v2004_v19 = vmul.f32 %v5445_v26, %v5335_v36  ;;  %v7249_v11 = vld [vmem:[#allocation5_spill] sm:$0xff] }
 0x495   : > { %2949 = vmatprep.subr.mxu0 %v2235_v52  ;;  %3026 = vmatprep.subr.mxu1 %v2237_v24  ;;  %v2234_v16 = vsel %vm2106_vm14, %v2042_v3, %v2170_v58  ;;  %vm2108_vm15 = vcmp.ge.f32.partialorder %v2044_v18, 0.0  ;;  %v2172_v13 = vmul.f32 0.2, %v2044_v18  ;;  %v2079_v42 = vadd.f32 %v5497_v20, %v2005_v43  ;;  %v7247_v3 = vld [vmem:[#allocation19_spill] sm:$0xff] }
 0x496   : > { %2950 = vmatpush1.msra.mxu0 %v2234_v16  ;;  %v2081_v28 = vadd.f32 %v5497_v20, %v2007_v32  ;;  %v2078_v2 = vadd.f32 %v5497_v20, %v2004_v19  ;;  %v2006_v8 = vmul.f32 %v5445_v26, %v5359_v17  ;;  %v1973_v48 = vmul.f32 %v5479_v51, %v7240_v30  ;;  %v7250_v16 = vld [vmem:[#allocation27_spill] sm:$0xff] }
 0x497   : > { %v2236_v10 = vsel %vm2108_vm15, %v2044_v18, %v2172_v13  ;;  %vm2143_vm0 = vcmp.ge.f32.partialorder %v2079_v42, 0.0  ;;  %v2207_v36 = vmul.f32 0.2, %v2079_v42  ;;  %4399 = vmatmul.mubr.msk.f32.vlgmr.msra.gmra.mxu0 %vm2296_vm3, %v5521_v34  ;;  %v1975_v59 = vmul.f32 %v5479_v51, %v7241_v22 }
 0x498   : > { %3027 = vmatpush1.msra.mxu1 %v2236_v10  ;;  %vm2145_vm1 = vcmp.ge.f32.partialorder %v2081_v28, 0.0  ;;  %v2209_v25 = vmul.f32 0.2, %v2081_v28  ;;  %vm2142_vm4 = vcmp.ge.f32.partialorder %v2078_v2, 0.0  ;;  %v2206_v37 = vmul.f32 0.2, %v2078_v2  ;;  %2989 = vmatprep.mubr.f32.mxu0 %v7239_v6 }
 0x499   : > { %v2271_v17 = vsel %vm2143_vm0, %v2079_v42, %v2207_v36  ;;  %4401 = vmatmul.mubr.msk.f32.vlgmr.msra.gmra.mxu1 %vm2296_vm3, %v5521_v34  ;;  %v2080_v41 = vadd.f32 %v5497_v20, %v2006_v8  ;;  %v2047_v53 = vadd.f32 %v5515_v23, %v1973_v48  ;;  %v2049_v57 = vadd.f32 %v5515_v23, %v1975_v59  ;;  %v7251_v42 = vld [vmem:[#allocation29_spill] sm:$0xff] }
 0x49a   : > { %3101 = vmatprep.subr.mxu0 %v2271_v17  ;;  %v2273_v4 = vsel %vm2145_vm1, %v2081_v28, %v2209_v25  ;;  %v2270_v1 = vsel %vm2142_vm4, %v2078_v2, %v2206_v37  ;;  %v1972_v9 = vmul.f32 %v5479_v51, %v7242_v49  ;;  %v1974_v61 = vmul.f32 %v5479_v51, %v7243_v44  ;;  %v7252_v17 = vld [vmem:[#allocation12_spill] sm:$0xff] }
 0x49b   : > { %3178 = vmatprep.subr.mxu1 %v2273_v4  ;;  %3102 = vmatpush1.msra.mxu0 %v2270_v1  ;;  %vm2144_vm5 = vcmp.ge.f32.partialorder %v2080_v41, 0.0  ;;  %v2208_v55 = vmul.f32 0.2, %v2080_v41  ;;  %vm2111_vm6 = vcmp.ge.f32.partialorder %v2047_v53, 0.0  ;;  %v2175_v54 = vmul.f32 0.2, %v2047_v53 }
 0x49c   : > { %vm2113_vm7 = vcmp.ge.f32.partialorder %v2049_v57, 0.0  ;;  %v2177_v27 = vmul.f32 0.2, %v2049_v57  ;;  %v2046_v56 = vadd.f32 %v5515_v23, %v1972_v9  ;;  %v2048_v29 = vadd.f32 %v5515_v23, %v1974_v61  ;;  %3066 = vmatprep.mubr.f32.mxu1 %v7239_v6  ;;  %4400 = vmatmul.mubr.msk.f32.gmra.mxu0 %vm2296_vm3, %v5535_v39  ;;  %v7254_v61 = vld [vmem:[#allocation11_spill] sm:$0xff] }
 0x49d   : > { %v2272_v0 = vsel %vm2144_vm5, %v2080_v41, %v2208_v55  ;;  %v2239_v15 = vsel %vm2111_vm6, %v2047_v53, %v2175_v54  ;;  %v2009_v60 = vmul.f32 %v5445_v26, %v7244_v40  ;;  %v2011_v46 = vmul.f32 %v5445_v26, %v7245_v31  ;;  %4402 = vmatmul.mubr.msk.f32.gmra.mxu1 %vm2296_vm3, %v5535_v39  ;;  %v7253_v53 = vld [vmem:[#allocation15_spill] sm:$0xff] }
 0x49e   : > { %3179 = vmatpush1.msra.mxu1 %v2272_v0  ;;  %3103 = vmatprep.subr.mxu0 %v2239_v15  ;;  %v2241_v7 = vsel %vm2113_vm7, %v2049_v57, %v2177_v27  ;;  %vm2110_vm8 = vcmp.ge.f32.partialorder %v2046_v56, 0.0  ;;  %v2174_v63 = vmul.f32 0.2, %v2046_v56  ;;  %vm2112_vm9 = vcmp.ge.f32.partialorder %v2048_v29, 0.0  ;;  %v7255_v27 = vld [vmem:[#allocation14_spill] sm:$0xff] }
 0x49f   : > { %3180 = vmatprep.subr.mxu1 %v2241_v7  ;;  %v2176_v35 = vmul.f32 0.2, %v2048_v29  ;;  %v2083_v21 = vadd.f32 %v5497_v20, %v2009_v60  ;;  %v2085_v33 = vadd.f32 %v5497_v20, %v2011_v46  ;;  %3137 = vmatprep.mubr.f32.mxu0 %v7239_v6  ;;  %v2008_v47 = vmul.f32 %v5445_v26, %v7246_v14  ;;  %v7259_v14 = vld [vmem:[#allocation7_spill] sm:$0xff] }
 0x4a0   : > { %v2238_v62 = vsel %vm2110_vm8, %v2046_v56, %v2174_v63  ;;  %3214 = vmatprep.mubr.f32.mxu1 %v7239_v6  ;;  %v2010_v38 = vmul.f32 %v5445_v26, %v7247_v3  ;;  %v1977_v12 = vmul.f32 %v5479_v51, %v7248_v45  ;;  %v1979_v50 = vmul.f32 %v5479_v51, %v7249_v11  ;;  %v7257_v63 = vld [vmem:[#allocation8_spill] sm:$0xff] }
 0x4a1   : > { %3104 = vmatpush1.msra.mxu0 %v2238_v62  ;;  %v2240_v5 = vsel %vm2112_vm9, %v2048_v29, %v2176_v35  ;;  %vm2147_vm10 = vcmp.ge.f32.partialorder %v2083_v21, 0.0  ;;  %v2211_v58 = vmul.f32 0.2, %v2083_v21  ;;  %vm2149_vm11 = vcmp.ge.f32.partialorder %v2085_v33, 0.0  ;;  %v7256_v29 = vld [vmem:[#allocation6_spill] sm:$0xff] }
 0x4a2   : > { %3181 = vmatpush1.msra.mxu1 %v2240_v5  ;;  %v2213_v18 = vmul.f32 0.2, %v2085_v33  ;;  %4403 = vmatmul.mubr.msk.f32.vlgmr.msra.gmra.mxu0 %vm2296_vm3, %v5521_v34  ;;  %v2082_v43 = vadd.f32 %v5497_v20, %v2008_v47  ;;  %v2084_v52 = vadd.f32 %v5497_v20, %v2010_v38  ;;  %v2051_v24 = vadd.f32 %v5515_v23, %v1977_v12 }
 0x4a3   : > { %v2275_v32 = vsel %vm2147_vm10, %v2083_v21, %v2211_v58  ;;  %4405 = vmatmul.mubr.msk.f32.vlgmr.msra.gmra.mxu1 %vm2296_vm3, %v5521_v34  ;;  %v2053_v19 = vadd.f32 %v5515_v23, %v1979_v50  ;;  %v1976_v13 = vmul.f32 %v5479_v51, %v7250_v16  ;;  %v1978_v28 = vmul.f32 %v5479_v51, %v7251_v42  ;;  %v7258_v21 = vld [vmem:[#allocation13_spill] sm:$0xff] }
 0x4a4   : > { %3255 = vmatprep.subr.mxu0 %v2275_v32  ;;  %v2277_v2 = vsel %vm2149_vm11, %v2085_v33, %v2213_v18  ;;  %vm2146_vm12 = vcmp.ge.f32.partialorder %v2082_v43, 0.0  ;;  %v2210_v8 = vmul.f32 0.2, %v2082_v43  ;;  %vm2148_vm13 = vcmp.ge.f32.partialorder %v2084_v52, 0.0  ;;  %3143 = vmatprep.mubr.f32.mxu0 %v7239_v6  ;;  %v5768_v32 = vpop.permute.xlu1 %2288 }
 0x4a5   : > { %3332 = vmatprep.subr.mxu1 %v2277_v2  ;;  %v2212_v30 = vmul.f32 0.2, %v2084_v52  ;;  %vm2115_vm14 = vcmp.ge.f32.partialorder %v2051_v24, 0.0  ;;  %v2179_v48 = vmul.f32 0.2, %v2051_v24  ;;  %vm2117_vm15 = vcmp.ge.f32.partialorder %v2053_v19, 0.0  ;;  %3220 = vmatprep.mubr.f32.mxu1 %v7239_v6 }
 0x4a6   : > { %v2274_v10 = vsel %vm2146_vm12, %v2082_v43, %v2210_v8  ;;  %v2181_v36 = vmul.f32 0.2, %v2053_v19  ;;  %v2050_v22 = vadd.f32 %v5515_v23, %v1976_v13  ;;  %v2052_v59 = vadd.f32 %v5515_v23, %v1978_v28  ;;  %4404 = vmatmul.mubr.msk.f32.gmra.mxu0 %vm2296_vm3, %v5535_v39 }
 0x4a7   : > { %3256 = vmatpush1.msra.mxu0 %v2274_v10  ;;  %v2276_v25 = vsel %vm2148_vm13, %v2084_v52, %v2212_v30  ;;  %v2243_v37 = vsel %vm2115_vm14, %v2051_v24, %v2179_v48  ;;  %v2013_v41 = vmul.f32 %v5445_v26, %v7252_v17  ;;  %v2015_v57 = vmul.f32 %v5445_v26, %v7253_v53 }
 0x4a8   : > { %3333 = vmatpush1.msra.mxu1 %v2276_v25  ;;  %3257 = vmatprep.subr.mxu0 %v2243_v37  ;;  %v2245_v4 = vsel %vm2117_vm15, %v2053_v19, %v2181_v36  ;;  %vm2114_vm0 = vcmp.ge.f32.partialorder %v2050_v22, 0.0  ;;  %v2178_v1 = vmul.f32 0.2, %v2050_v22  ;;  %vm2116_vm1 = vcmp.ge.f32.partialorder %v2052_v59, 0.0 }
 0x4a9   : > { %3334 = vmatprep.subr.mxu1 %v2245_v4  ;;  %v2180_v49 = vmul.f32 0.2, %v2052_v59  ;;  %v2087_v9 = vadd.f32 %v5497_v20, %v2013_v41  ;;  %v2089_v44 = vadd.f32 %v5497_v20, %v2015_v57  ;;  %4406 = vmatmul.mubr.msk.f32.gmra.mxu1 %vm2296_vm3, %v5535_v39  ;;  %v2012_v55 = vmul.f32 %v5445_v26, %v7254_v61 }
 0x4aa   : > { %v2242_v54 = vsel %vm2114_vm0, %v2050_v22, %v2178_v1  ;;  %3291 = vmatprep.mubr.f32.mxu0 %v7239_v6  ;;  %3368 = vmatprep.mubr.f32.mxu1 %v7239_v6  ;;  %v2014_v56 = vmul.f32 %v5445_v26, %v7255_v27  ;;  %v1981_v0 = vmul.f32 %v5479_v51, %v7256_v29 }
 0x4ab   : > { %3258 = vmatpush1.msra.mxu0 %v2242_v54  ;;  %v2244_v15 = vsel %vm2116_vm1, %v2052_v59, %v2180_v49  ;;  %vm2151_vm4 = vcmp.ge.f32.partialorder %v2087_v9, 0.0  ;;  %v2215_v40 = vmul.f32 0.2, %v2087_v9  ;;  %vm2153_vm5 = vcmp.ge.f32.partialorder %v2089_v44, 0.0 }
 0x4ac   : > { %3335 = vmatpush1.msra.mxu1 %v2244_v15  ;;  %v2217_v60 = vmul.f32 0.2, %v2089_v44  ;;  %4407 = vmatmul.mubr.msk.f32.vlgmr.msra.gmra.mxu0 %vm2296_vm3, %v5521_v34  ;;  %v2086_v31 = vadd.f32 %v5497_v20, %v2012_v55  ;;  %v2088_v46 = vadd.f32 %v5497_v20, %v2014_v56  ;;  %v2055_v7 = vadd.f32 %v5515_v23, %v1981_v0 }
 0x4ad   : > { %v2279_v26 = vsel %vm2151_vm4, %v2087_v9, %v2215_v40  ;;  %4409 = vmatmul.mubr.msk.f32.vlgmr.msra.gmra.mxu1 %vm2296_vm3, %v5521_v34  ;;  %v1983_v35 = vmul.f32 %v5479_v51, %v7257_v63  ;;  %v1980_v33 = vmul.f32 %v5479_v51, %v7258_v21  ;;  %v1982_v47 = vmul.f32 %v5479_v51, %v7259_v14 }
 0x4ae   : > { %3409 = vmatprep.subr.mxu0 %v2279_v26  ;;  %v2281_v62 = vsel %vm2153_vm5, %v2089_v44, %v2217_v60  ;;  %vm2150_vm6 = vcmp.ge.f32.partialorder %v2086_v31, 0.0  ;;  %v2214_v3 = vmul.f32 0.2, %v2086_v31  ;;  %vm2152_vm7 = vcmp.ge.f32.partialorder %v2088_v46, 0.0  ;;  %3297 = vmatprep.mubr.f32.mxu0 %v7239_v6 }
 0x4af   : > { %3486 = vmatprep.subr.mxu1 %v2281_v62  ;;  %v2216_v20 = vmul.f32 0.2, %v2088_v46  ;;  %vm2119_vm8 = vcmp.ge.f32.partialorder %v2055_v7, 0.0  ;;  %v2183_v38 = vmul.f32 0.2, %v2055_v7  ;;  %v2057_v45 = vadd.f32 %v5515_v23, %v1983_v35  ;;  %3374 = vmatprep.mubr.f32.mxu1 %v7239_v6 }
 0x4b0   : > { %v2278_v12 = vsel %vm2150_vm6, %v2086_v31, %v2214_v3  ;;  %v2054_v11 = vadd.f32 %v5515_v23, %v1980_v33  ;;  %v2056_v51 = vadd.f32 %v5515_v23, %v1982_v47  ;;  %4408 = vmatmul.mubr.msk.f32.gmra.mxu0 %vm2296_vm3, %v5535_v39 }
 0x4b1   : > { %3410 = vmatpush1.msra.mxu0 %v2278_v12  ;;  %v2280_v50 = vsel %vm2152_vm7, %v2088_v46, %v2216_v20  ;;  %v2247_v5 = vsel %vm2119_vm8, %v2055_v7, %v2183_v38  ;;  %vm2121_vm9 = vcmp.ge.f32.partialorder %v2057_v45, 0.0  ;;  %v2185_v58 = vmul.f32 0.2, %v2057_v45  ;;  %4410 = vmatmul.mubr.msk.f32.gmra.mxu1 %vm2296_vm3, %v5535_v39 }
 0x4b2   : > { %3487 = vmatpush1.msra.mxu1 %v2280_v50  ;;  %3411 = vmatprep.subr.mxu0 %v2247_v5  ;;  %vm2118_vm10 = vcmp.ge.f32.partialorder %v2054_v11, 0.0  ;;  %v2182_v18 = vmul.f32 0.2, %v2054_v11  ;;  %vm2120_vm11 = vcmp.ge.f32.partialorder %v2056_v51, 0.0  ;;  %v2184_v43 = vmul.f32 0.2, %v2056_v51 }
 0x4b3   : > { %v2249_v52 = vsel %vm2121_vm9, %v2057_v45, %v2185_v58  ;;  %3445 = vmatprep.mubr.f32.mxu0 %v7239_v6  ;;  %3522 = vmatprep.mubr.f32.mxu1 %v7239_v6 }
 0x4b4   : > { %3488 = vmatprep.subr.mxu1 %v2249_v52  ;;  %v2246_v23 = vsel %vm2118_vm10, %v2054_v11, %v2182_v18  ;;  %v2248_v24 = vsel %vm2120_vm11, %v2056_v51, %v2184_v43 }
 0x4b5   : > { %3412 = vmatpush1.msra.mxu0 %v2246_v23  ;;  %3489 = vmatpush1.msra.mxu1 %v2248_v24 }
 0x4b6   : > { %4411 = vmatmul.mubr.msk.f32.vlgmr.msra.gmra.mxu0 %vm2296_vm3, %v5521_v34  ;;  %4413 = vmatmul.mubr.msk.f32.vlgmr.msra.gmra.mxu1 %vm2296_vm3, %v5521_v34 }
 0x4b7   : > { %3451 = vmatprep.mubr.f32.mxu0 %v7239_v6  ;;  %3528 = vmatprep.mubr.f32.mxu1 %v7239_v6  ;;  %v5776_v6 = vpop.permute.xlu1 %2293 }
 0x4ba   : > { %4412 = vmatmul.mubr.msk.f32.gmra.mxu0 %vm2296_vm3, %v5535_v39  ;;  %4414 = vmatmul.mubr.msk.f32.gmra.mxu1 %vm2296_vm3, %v5535_v39 }
 0x530   : > { %v2369_v19 = vpop.f32.mrf.mxu0 }
 0x531   : > { %v5771_v42 = vadd.f32 %v2369_v19, %v5768_v32 }
 0x532   : > { %v2446_v16 = vpop.f32.mrf.mxu1  ;;  %v2371_v13 = vpop.f32.mrf.mxu0 }
 0x533   : > { %v5774_v34 = vadd.f32 %v2371_v13, %v5768_v32  ;;  %v5779_v8 = vadd.f32 %v2446_v16, %v5768_v32 }
 0x534   : > { %v2448_v28 = vpop.f32.mrf.mxu1 }
 0x535   : > { %v2375_v2 = vpop.f32.mrf.mxu0  ;;  %v3535_v39 = vadd.f32 %v5774_v34, %v5771_v42  ;;  %v5784_v10 = vadd.f32 %v2448_v28, %v5768_v32 }
 0x536   : > { %v2452_v30 = vpop.f32.mrf.mxu1  ;;  %v5788_v22 = vadd.f32 %v2375_v2, %v5776_v6 }
 0x537   : > { %v2377_v48 = vpop.f32.mrf.mxu0  ;;  %v3536_v36 = vadd.f32 %v3535_v39, %v5779_v8  ;;  %v5795_v17 = vadd.f32 %v2452_v30, %v5776_v6 }
 0x538   : > { %v5791_v59 = vadd.f32 %v2377_v48, %v5776_v6  ;;  %v2454_v25 = vpop.f32.mrf.mxu1 }
 0x539   : > { %v3537_v37 = vadd.f32 %v3536_v36, %v5784_v10  ;;  %v5800_v4 = vadd.f32 %v2454_v25, %v5776_v6 }
 0x53a   : > { %v3568_v41 = vadd.f32 %v5791_v59, %v5788_v22  ;;  %v2523_v53 = vpop.f32.mrf.mxu0  ;;  %v2600_v57 = vpop.f32.mrf.mxu1 }
 0x53b   : > { %v5804_v49 = vadd.f32 %v2523_v53, %v5768_v32  ;;  %v5812_v56 = vadd.f32 %v2600_v57, %v5768_v32 }
 0x53c   : > { %v3569_v1 = vadd.f32 %v3568_v41, %v5795_v17  ;;  %v2525_v9 = vpop.f32.mrf.mxu0  ;;  %v2602_v44 = vpop.f32.mrf.mxu1 }
 0x53d   : > { %v3538_v55 = vadd.f32 %v3537_v37, %v5804_v49  ;;  %v5809_v54 = vadd.f32 %v2525_v9, %v5768_v32  ;;  %v5824_v26 = vadd.f32 %v2602_v44, %v5768_v32 }
 0x53e   : > { %v3570_v61 = vadd.f32 %v3569_v1, %v5800_v4  ;;  %v2529_v27 = vpop.f32.mrf.mxu0 }
 0x53f   : > { %v3539_v29 = vadd.f32 %v3538_v55, %v5809_v54  ;;  %v5816_v0 = vadd.f32 %v2529_v27, %v5776_v6  ;;  %v2606_v15 = vpop.f32.mrf.mxu1 }
 0x540   : > { %v2531_v40 = vpop.f32.mrf.mxu0  ;;  %v5827_v63 = vadd.f32 %v2606_v15, %v5776_v6 }
 0x541   : > { %v3540_v60 = vadd.f32 %v3539_v29, %v5812_v56  ;;  %v3571_v31 = vadd.f32 %v3570_v61, %v5816_v0  ;;  %v5821_v46 = vadd.f32 %v2531_v40, %v5776_v6  ;;  %v2608_v7 = vpop.f32.mrf.mxu1 }
 0x542   : > { %v5833_v62 = vadd.f32 %v2608_v7, %v5776_v6 }
 0x543   : > { %v3572_v35 = vadd.f32 %v3571_v31, %v5821_v46  ;;  %v3541_v21 = vadd.f32 %v3540_v60, %v5824_v26 }
 0x545   : > { %v3573_v33 = vadd.f32 %v3572_v35, %v5827_v63  ;;  %v2677_v14 = vpop.f32.mrf.mxu0  ;;  %v2754_v47 = vpop.f32.mrf.mxu1 }
 0x546   : > { %v5836_v3 = vadd.f32 %v2677_v14, %v5768_v32  ;;  %v5844_v5 = vadd.f32 %v2754_v47, %v5768_v32 }
 0x547   : > { %v2679_v20 = vpop.f32.mrf.mxu0  ;;  %v2756_v38 = vpop.f32.mrf.mxu1  ;;  %v3574_v45 = vadd.f32 %v3573_v33, %v5833_v62 }
 0x548   : > { %v3542_v12 = vadd.f32 %v3541_v21, %v5836_v3  ;;  %v5841_v11 = vadd.f32 %v2679_v20, %v5768_v32  ;;  %v5851_v23 = vadd.f32 %v2756_v38, %v5768_v32 }
 0x549   : > { %v2683_v51 = vpop.f32.mrf.mxu0  ;;  %v2760_v50 = vpop.f32.mrf.mxu1 }
 0x54a   : > { %v3543_v58 = vadd.f32 %v3542_v12, %v5841_v11  ;;  %v5848_v18 = vadd.f32 %v2683_v51, %v5776_v6  ;;  %v5860_v2 = vadd.f32 %v2760_v50, %v5776_v6 }
 0x54b   : > { %v2685_v43 = vpop.f32.mrf.mxu0  ;;  %v2762_v52 = vpop.f32.mrf.mxu1 }
 0x54c   : > { %v3544_v24 = vadd.f32 %v3543_v58, %v5844_v5  ;;  %v3575_v19 = vadd.f32 %v3574_v45, %v5848_v18  ;;  %v5856_v16 = vadd.f32 %v2685_v43, %v5776_v6  ;;  %v5867_v25 = vadd.f32 %v2762_v52, %v5776_v6 }
 0x54d   : > { %v2831_v13 = vpop.f32.mrf.mxu0 }
 0x54e   : > { %v3545_v28 = vadd.f32 %v3544_v24, %v5851_v23  ;;  %v3576_v39 = vadd.f32 %v3575_v19, %v5856_v16  ;;  %v5864_v30 = vadd.f32 %v2831_v13, %v5768_v32  ;;  %v2908_v48 = vpop.f32.mrf.mxu1 }
 0x54f   : > { %v2833_v36 = vpop.f32.mrf.mxu0  ;;  %v5876_v44 = vadd.f32 %v2908_v48, %v5768_v32 }
 0x550   : > { %v3577_v37 = vadd.f32 %v3576_v39, %v5860_v2  ;;  %v3546_v41 = vadd.f32 %v3545_v28, %v5864_v30  ;;  %v5872_v53 = vadd.f32 %v2833_v36, %v5768_v32  ;;  %v2910_v57 = vpop.f32.mrf.mxu1 }
 0x551   : > { %v2837_v1 = vpop.f32.mrf.mxu0  ;;  %v5883_v15 = vadd.f32 %v2910_v57, %v5768_v32 }
 0x552   : > { %v3578_v9 = vadd.f32 %v3577_v37, %v5867_v25  ;;  %v3547_v61 = vadd.f32 %v3546_v41, %v5872_v53  ;;  %v5880_v55 = vadd.f32 %v2837_v1, %v5776_v6  ;;  %v2914_v27 = vpop.f32.mrf.mxu1 }
 0x553   : > { %v2839_v29 = vpop.f32.mrf.mxu0  ;;  %v5892_v21 = vadd.f32 %v2914_v27, %v5776_v6 }
 0x554   : > { %v3548_v40 = vadd.f32 %v3547_v61, %v5876_v44  ;;  %v3579_v60 = vadd.f32 %v3578_v9, %v5880_v55  ;;  %v5888_v31 = vadd.f32 %v2839_v29, %v5776_v6  ;;  %v2916_v7 = vpop.f32.mrf.mxu1 }
 0x555   : > { %v5900_v38 = vadd.f32 %v2916_v7, %v5776_v6 }
 0x556   : > { %v3549_v35 = vadd.f32 %v3548_v40, %v5883_v15  ;;  %v3580_v33 = vadd.f32 %v3579_v60, %v5888_v31 }
 0x557   : > { %v2985_v14 = vpop.f32.mrf.mxu0 }
 0x558   : > { %v3581_v47 = vadd.f32 %v3580_v33, %v5892_v21  ;;  %v5897_v20 = vadd.f32 %v2985_v14, %v5768_v32 }
 0x559   : > { %v3062_v45 = vpop.f32.mrf.mxu1  ;;  %v2987_v12 = vpop.f32.mrf.mxu0 }
 0x55a   : > { %v3550_v51 = vadd.f32 %v3549_v35, %v5897_v20  ;;  %v5904_v50 = vadd.f32 %v2987_v12, %v5768_v32  ;;  %v3582_v58 = vadd.f32 %v3581_v47, %v5900_v38  ;;  %v5908_v52 = vadd.f32 %v3062_v45, %v5768_v32 }
 0x55b   : > { %v3064_v43 = vpop.f32.mrf.mxu1 }
 0x55c   : > { %v3551_v24 = vadd.f32 %v3550_v51, %v5904_v50  ;;  %v2991_v19 = vpop.f32.mrf.mxu0  ;;  %v5916_v36 = vadd.f32 %v3064_v43, %v5768_v32 }
 0x55d   : > { %v5912_v13 = vadd.f32 %v2991_v19, %v5776_v6  ;;  %v3068_v28 = vpop.f32.mrf.mxu1 }
 0x55e   : > { %v3552_v39 = vadd.f32 %v3551_v24, %v5908_v52  ;;  %v2993_v48 = vpop.f32.mrf.mxu0  ;;  %v5924_v9 = vadd.f32 %v3068_v28, %v5776_v6 }
 0x55f   : > { %v3583_v37 = vadd.f32 %v3582_v58, %v5912_v13  ;;  %v5920_v41 = vadd.f32 %v2993_v48, %v5776_v6  ;;  %v3070_v57 = vpop.f32.mrf.mxu1 }
 0x560   : > { %v3553_v1 = vadd.f32 %v3552_v39, %v5916_v36  ;;  %7260 = vst [vmem:[#allocation16_spill] sm:$0xff] %v5924_v9  ;;  %v5928_v29 = vadd.f32 %v3070_v57, %v5776_v6 }
 0x561   : > { %v3584_v61 = vadd.f32 %v3583_v37, %v5920_v41 }
 0x562   : > { %v3139_v27 = vpop.f32.mrf.mxu0  ;;  %7261 = vst [vmem:[#allocation18_spill] sm:$0xff] %v5928_v29 }
 0x563   : > { %v3585_v40 = vadd.f32 %v3584_v61, %v5924_v9  ;;  %v5932_v60 = vadd.f32 %v3139_v27, %v5768_v32  ;;  %v3216_v7 = vpop.f32.mrf.mxu1 }
 0x564   : > { %v3141_v35 = vpop.f32.mrf.mxu0  ;;  %v5940_v51 = vadd.f32 %v3216_v7, %v5768_v32 }
 0x565   : > { %v3586_v33 = vadd.f32 %v3585_v40, %v5928_v29  ;;  %v3554_v14 = vadd.f32 %v3553_v1, %v5932_v60  ;;  %v5937_v47 = vadd.f32 %v3141_v35, %v5768_v32  ;;  %v3218_v45 = vpop.f32.mrf.mxu1 }
 0x566   : > { %v3145_v12 = vpop.f32.mrf.mxu0  ;;  %v5947_v19 = vadd.f32 %v3218_v45, %v5768_v32 }
 0x567   : > { %v3555_v58 = vadd.f32 %v3554_v14, %v5937_v47  ;;  %v5944_v43 = vadd.f32 %v3145_v12, %v5776_v6 }
 0x568   : > { %v3147_v24 = vpop.f32.mrf.mxu0 }
 0x569   : > { %7262 = vst [vmem:[#allocation20_spill] sm:$0xff] %v5944_v43  ;;  %v3556_v28 = vadd.f32 %v3555_v58, %v5940_v51  ;;  %v3587_v39 = vadd.f32 %v3586_v33, %v5944_v43  ;;  %v3222_v48 = vpop.f32.mrf.mxu1  ;;  %v5952_v37 = vadd.f32 %v3147_v24, %v5776_v6 }
 0x56a   : > { %v5956_v1 = vadd.f32 %v3222_v48, %v5776_v6 }
 0x56b   : > { %7263 = vst [vmem:[#allocation21_spill] sm:$0xff] %v5952_v37  ;;  %v3557_v57 = vadd.f32 %v3556_v28, %v5947_v19  ;;  %v3588_v61 = vadd.f32 %v3587_v39, %v5952_v37  ;;  %v3224_v27 = vpop.f32.mrf.mxu1 }
 0x56c   : > { %7264 = vst [vmem:[#allocation22_spill] sm:$0xff] %v5956_v1  ;;  %v3293_v40 = vpop.f32.mrf.mxu0  ;;  %v5960_v7 = vadd.f32 %v3224_v27, %v5776_v6 }
 0x56d   : > { %v3589_v35 = vadd.f32 %v3588_v61, %v5956_v1  ;;  %v5964_v33 = vadd.f32 %v3293_v40, %v5768_v32  ;;  %v3370_v14 = vpop.f32.mrf.mxu1 }
 0x56e   : > { %7265 = vst [vmem:[#allocation24_spill] sm:$0xff] %v5960_v7  ;;  %v3295_v45 = vpop.f32.mrf.mxu0  ;;  %v5972_v48 = vadd.f32 %v3370_v14, %v5768_v32 }
 0x56f   : > { %v3590_v12 = vadd.f32 %v3589_v35, %v5960_v7  ;;  %v3558_v58 = vadd.f32 %v3557_v57, %v5964_v33  ;;  %v5969_v24 = vadd.f32 %v3295_v45, %v5768_v32  ;;  %v3372_v28 = vpop.f32.mrf.mxu1 }
 0x570   : > { %v3299_v39 = vpop.f32.mrf.mxu0  ;;  %v5979_v37 = vadd.f32 %v3372_v28, %v5768_v32 }
 0x571   : > { %v3559_v27 = vadd.f32 %v3558_v58, %v5969_v24  ;;  %v5976_v61 = vadd.f32 %v3299_v39, %v5776_v6  ;;  %v3376_v40 = vpop.f32.mrf.mxu1 }
 0x572   : > { %v3301_v1 = vpop.f32.mrf.mxu0  ;;  %7267 = vst [vmem:[#allocation23_spill] sm:$0xff] %v5979_v37  ;;  %v5988_v58 = vadd.f32 %v3376_v40, %v5776_v6 }
 0x573   : > { %7266 = vst [vmem:[#allocation26_spill] sm:$0xff] %v5976_v61  ;;  %v3560_v57 = vadd.f32 %v3559_v27, %v5972_v48  ;;  %v3591_v35 = vadd.f32 %v3590_v12, %v5976_v61  ;;  %v5984_v45 = vadd.f32 %v3301_v1, %v5776_v6  ;;  %v3378_v7 = vpop.f32.mrf.mxu1 }
 0x574   : > { %7269 = vst [vmem:[#allocation9_spill] sm:$0xff] %v5988_v58  ;;  %v5992_v28 = vadd.f32 %v3378_v7, %v5776_v6 }
 0x575   : > { %7268 = vst [vmem:[#allocation25_spill] sm:$0xff] %v5984_v45  ;;  %v3561_v14 = vadd.f32 %v3560_v57, %v5979_v37  ;;  %v3592_v39 = vadd.f32 %v3591_v35, %v5984_v45 }
 0x576   : > { %v3447_v43 = vpop.f32.mrf.mxu0  ;;  %v3524_v29 = vpop.f32.mrf.mxu1  ;;  %7270 = vst [vmem:[#allocation10_spill] sm:$0xff] %v5992_v28 }
 0x577   : > { %v3593_v27 = vadd.f32 %v3592_v39, %v5988_v58  ;;  %v5996_v12 = vadd.f32 %v3447_v43, %v5768_v32  ;;  %v6004_v37 = vadd.f32 %v3524_v29, %v5768_v32 }
 0x578   : > { %v3449_v1 = vpop.f32.mrf.mxu0  ;;  %v3526_v61 = vpop.f32.mrf.mxu1 }
 0x579   : > { %v3594_v9 = vadd.f32 %v3593_v27, %v5992_v28  ;;  %v3562_v57 = vadd.f32 %v3561_v14, %v5996_v12  ;;  %v6001_v40 = vadd.f32 %v3449_v1, %v5768_v32  ;;  %7272 = vst [vmem:[#allocation19_spill] sm:$0xff] %v6004_v37  ;;  %v6011_v58 = vadd.f32 %v3526_v61, %v5768_v32 }
 0x57a   : > { %v3453_v35 = vpop.f32.mrf.mxu0  ;;  %v3530_v45 = vpop.f32.mrf.mxu1 }
 0x57b   : > { %7271 = vst [vmem:[#allocation17_spill] sm:$0xff] %v6001_v40  ;;  %v3563_v7 = vadd.f32 %v3562_v57, %v6001_v40  ;;  %v6008_v39 = vadd.f32 %v3453_v35, %v5776_v6  ;;  %7274 = vst [vmem:[#allocation5_spill] sm:$0xff] %v6011_v58  ;;  %v6019_v29 = vadd.f32 %v3530_v45, %v5776_v6 }
 0x57c   : > { %v3455_v43 = vpop.f32.mrf.mxu0  ;;  %v3532_v28 = vpop.f32.mrf.mxu1 }
 0x57d   : > { %7273 = vst [vmem:[#allocation28_spill] sm:$0xff] %v6008_v39  ;;  %v3595_v27 = vadd.f32 %v3594_v9, %v6008_v39  ;;  %v6015_v14 = vadd.f32 %v3455_v43, %v5776_v6  ;;  %v3564_v1 = vadd.f32 %v3563_v7, %v6004_v37  ;;  %7276 = vst [vmem:[#allocation29_spill] sm:$0xff] %v6019_v29  ;;  %v6031_v7 = vld [vmem:[%s7102_s5] sm:$0xff] }
 0x57e   : > { %v6024_v40 = vadd.f32 %v3532_v28, %v5776_v6  ;;  %v6037_v6 = vld [vmem:[%s7102_s5 + $0x8] sm:$0xff] }
 0x57f   : > { %7275 = vst [vmem:[#allocation27_spill] sm:$0xff] %v6015_v14  ;;  %v3596_v57 = vadd.f32 %v3595_v27, %v6015_v14  ;;  %v3565_v35 = vadd.f32 %v3564_v1, %v6011_v58 }
 0x580   : > { %7277 = vst [vmem:[#allocation12_spill] sm:$0xff] %v6024_v40 }
 0x581   : > { %3566 = vadd.xlane.f32.xlu0 %v3565_v35  ;;  %v3597_v32 = vadd.f32 %v3596_v57, %v6019_v29 }
 0x583   : > { %v3598_v9 = vadd.f32 %v3597_v32, %v6024_v40 }
 0x585   : > { %3599 = vadd.xlane.f32.xlu1 %v3598_v9 }
 0x60a   : > { %v3567_v61 = vpop.xlane.xlu0 %3566 }
 0x60b   : > { %v3601_v45 = vmul.f32 %v6031_v7, %v3567_v61 }
 0x60d   : > { %v3603_v27 = vsel %vm1705_vm2, %v3601_v45, 0.0 }
 0x60e   : > { %v3600_v43 = vpop.xlane.xlu1 %3599 }
 0x60f   : > { %v3602_v28 = vmul.f32 %v6037_v6, %v3600_v43 }
 0x611   : > { %v3604_v1 = vsel %vm1705_vm2, %v3602_v28, 0.0 }
 0x612   : > { %v3605_v57 = vadd.f32 %v3604_v1, %v3603_v27 }
 0x614   : > { %v3606_v35 = vrot.slane %v3605_v57, 4 }
 0x616   : > { %v3607_v32 = vadd.f32 %v3606_v35, %v3605_v57 }
 0x618   : > { %v3608_v9 = vrot.slane %v3607_v32, 2 }
 0x61a   : > { %v3609_v40 = vadd.f32 %v3608_v9, %v3607_v32 }
 0x61c   : > { %v3610_v29 = vrot.slane %v3609_v40, 1 }
 0x61e   : > { %v3611_v14 = vadd.f32 %v3610_v29, %v3609_v40 }
 0x620   : > { %v3612_v61 = vmul.f32 3.0517578e-05, %v3611_v14 }
 0x622   : > { %v3613_v39 = vmul.f32 %v6031_v7, %v3612_v61  ;;  %v3614_v37 = vmul.f32 %v6037_v6, %v3612_v61 }
 0x624   : > { %v3615_v58 = vsel %vm1705_vm2, %v3613_v39, 0.0  ;;  %v3618_v43 = vsel %vm1705_vm2, %v3614_v37, 0.0 }
 0x625   : > { %3616 = vadd.xlane.f32.xlu0 %v3615_v58 }
 0x629   : > { %3619 = vadd.xlane.f32.xlu0 %v3618_v43 }
 0x6ae   : > { %v6046_v45 = vpop.xlane.xlu0 %3616 }
 0x6af   : > { %v6050_v28 = vsub.f32 %v5771_v42, %v6046_v45  ;;  %v6054_v40 = vsub.f32 %v5774_v34, %v6046_v45  ;;  %v6058_v14 = vsub.f32 %v5779_v8, %v6046_v45  ;;  %v6066_v39 = vsub.f32 %v5784_v10, %v6046_v45 }
 0x6b0   : > { %v6070_v42 = vsub.f32 %v5804_v49, %v6046_v45  ;;  %v6076_v8 = vsub.f32 %v5809_v54, %v6046_v45  ;;  %v6082_v10 = vsub.f32 %v5812_v56, %v6046_v45  ;;  %v6088_v35 = vsub.f32 %v5824_v26, %v6046_v45 }
 0x6b1   : > { %v3685_v58 = vmul.f32 %v6050_v28, %v6050_v28  ;;  %v3686_v37 = vmul.f32 %v6054_v40, %v6054_v40  ;;  %v3687_v34 = vmul.f32 %v6058_v14, %v6058_v14  ;;  %v3688_v27 = vmul.f32 %v6066_v39, %v6066_v39 }
 0x6b2   : > { %v3689_v49 = vmul.f32 %v6070_v42, %v6070_v42  ;;  %v3690_v54 = vmul.f32 %v6076_v8, %v6076_v8  ;;  %v6092_v9 = vpop.xlane.xlu0 %3619  ;;  %v6096_v61 = vsub.f32 %v5836_v3, %v6046_v45  ;;  %v3691_v56 = vmul.f32 %v6082_v10, %v6082_v10 }
 0x6b3   : > { %v3749_v29 = vadd.f32 %v3686_v37, %v3685_v58  ;;  %v6102_v58 = vsub.f32 %v5841_v11, %v6046_v45  ;;  %v3692_v26 = vmul.f32 %v6088_v35, %v6088_v35  ;;  %v6112_v3 = vsub.f32 %v5791_v59, %v6092_v9 }
 0x6b4   : > { %v3693_v11 = vmul.f32 %v6096_v61, %v6096_v61  ;;  %v6128_v59 = vsub.f32 %v5795_v17, %v6092_v9  ;;  %v6146_v17 = vsub.f32 %v5872_v53, %v6046_v45 }
 0x6b5   : > { %v3750_v1 = vadd.f32 %v3749_v29, %v3687_v34  ;;  %v6108_v34 = vsub.f32 %v5788_v22, %v6092_v9  ;;  %v6116_v29 = vsub.f32 %v5844_v5, %v6046_v45  ;;  %v3694_v22 = vmul.f32 %v6102_v58, %v6102_v58 }
 0x6b7   : > { %v3751_v57 = vadd.f32 %v3750_v1, %v3688_v27  ;;  %v6122_v1 = vsub.f32 %v5851_v23, %v6046_v45  ;;  %v3717_v5 = vmul.f32 %v6108_v34, %v6108_v34  ;;  %v3695_v23 = vmul.f32 %v6116_v29, %v6116_v29 }
 0x6b9   : > { %v3752_v32 = vadd.f32 %v3751_v57, %v3689_v49  ;;  %v3718_v57 = vmul.f32 %v6112_v3, %v6112_v3 }
 0x6bb   : > { %v3753_v43 = vadd.f32 %v3752_v32, %v3690_v54  ;;  %v6136_v54 = vsub.f32 %v5864_v30, %v6046_v45  ;;  %v6152_v30 = vsub.f32 %v5816_v0, %v6092_v9 }
 0x6bd   : > { %v3754_v37 = vadd.f32 %v3753_v43, %v3691_v56  ;;  %v6142_v56 = vsub.f32 %v5800_v4, %v6092_v9  ;;  %v3696_v43 = vmul.f32 %v6122_v1, %v6122_v1  ;;  %v6158_v4 = vsub.f32 %v5876_v44, %v6046_v45 }
 0x6be   : > { %v3697_v53 = vmul.f32 %v6136_v54, %v6136_v54  ;;  %v3698_v44 = vmul.f32 %v6146_v17, %v6146_v17 }
 0x6bf   : > { %v3755_v27 = vadd.f32 %v3754_v37, %v3692_v26  ;;  %v3719_v37 = vmul.f32 %v6128_v59, %v6128_v59  ;;  %v3720_v0 = vmul.f32 %v6142_v56, %v6142_v56 }
 0x6c1   : > { %v3756_v49 = vadd.f32 %v3755_v27, %v3693_v11  ;;  %v3782_v11 = vadd.f32 %v3718_v57, %v3717_v5  ;;  %v6176_v57 = vsub.f32 %v5827_v63, %v6092_v9 }
 0x6c3   : > { %v3757_v32 = vadd.f32 %v3756_v49, %v3694_v22  ;;  %v6164_v22 = vsub.f32 %v5821_v46, %v6092_v9  ;;  %v3783_v49 = vadd.f32 %v3782_v11, %v3719_v37  ;;  %v3721_v46 = vmul.f32 %v6152_v30, %v6152_v30 }
 0x6c4   : > { %v6188_v37 = vsub.f32 %v5833_v62, %v6092_v9  ;;  %v3723_v62 = vmul.f32 %v6176_v57, %v6176_v57 }
 0x6c5   : > { %v3758_v26 = vadd.f32 %v3757_v32, %v3695_v23  ;;  %v6170_v23 = vsub.f32 %v5883_v15, %v6046_v45  ;;  %v3784_v32 = vadd.f32 %v3783_v49, %v3720_v0  ;;  %v3699_v15 = vmul.f32 %v6158_v4, %v6158_v4 }
 0x6c6   : > { %v3722_v63 = vmul.f32 %v6164_v22, %v6164_v22  ;;  %v6200_v0 = vsub.f32 %v5848_v18, %v6092_v9  ;;  %v3724_v18 = vmul.f32 %v6188_v37, %v6188_v37 }
 0x6c7   : > { %v3759_v27 = vadd.f32 %v3758_v26, %v3696_v43  ;;  %v6182_v43 = vsub.f32 %v5897_v20, %v6046_v45  ;;  %v3785_v11 = vadd.f32 %v3784_v32, %v3721_v46  ;;  %v3700_v20 = vmul.f32 %v6170_v23, %v6170_v23 }
 0x6c8   : > { %v6212_v46 = vsub.f32 %v5856_v16, %v6092_v9  ;;  %v3725_v16 = vmul.f32 %v6200_v0, %v6200_v0 }
 0x6c9   : > { %v3760_v5 = vadd.f32 %v3759_v27, %v3697_v53  ;;  %v6194_v53 = vsub.f32 %v5904_v50, %v6046_v45  ;;  %v3786_v49 = vadd.f32 %v3785_v11, %v3722_v63  ;;  %v3701_v50 = vmul.f32 %v6182_v43, %v6182_v43 }
 0x6ca   : > { %v6224_v63 = vsub.f32 %v5860_v2, %v6092_v9  ;;  %v3726_v2 = vmul.f32 %v6212_v46, %v6212_v46 }
 0x6cb   : > { %v3761_v26 = vadd.f32 %v3760_v5, %v3698_v44  ;;  %v6206_v44 = vsub.f32 %v5908_v52, %v6046_v45  ;;  %v3787_v32 = vadd.f32 %v3786_v49, %v3723_v62  ;;  %v3702_v52 = vmul.f32 %v6194_v53, %v6194_v53 }
 0x6cc   : > { %v6236_v62 = vsub.f32 %v5867_v25, %v6092_v9  ;;  %v3727_v25 = vmul.f32 %v6224_v63, %v6224_v63 }
 0x6cd   : > { %v3762_v27 = vadd.f32 %v3761_v26, %v3699_v15  ;;  %v6218_v15 = vsub.f32 %v5916_v36, %v6046_v45  ;;  %v3788_v11 = vadd.f32 %v3787_v32, %v3724_v18  ;;  %v3703_v36 = vmul.f32 %v6206_v44, %v6206_v44 }
 0x6ce   : > { %7278 = vst [vmem:[#allocation15_spill] sm:$0xff] %v6236_v62  ;;  %v6248_v18 = vsub.f32 %v5880_v55, %v6092_v9  ;;  %v3728_v55 = vmul.f32 %v6236_v62, %v6236_v62 }
 0x6cf   : > { %v3763_v5 = vadd.f32 %v3762_v27, %v3700_v20  ;;  %v6230_v20 = vsub.f32 %v5932_v60, %v6046_v45  ;;  %v3789_v49 = vadd.f32 %v3788_v11, %v3725_v16  ;;  %v3704_v60 = vmul.f32 %v6218_v15, %v6218_v15 }
 0x6d0   : > { %7279 = vst [vmem:[#allocation11_spill] sm:$0xff] %v6248_v18  ;;  %v6260_v16 = vsub.f32 %v5888_v31, %v6092_v9  ;;  %v3729_v31 = vmul.f32 %v6248_v18, %v6248_v18 }
 0x6d1   : > { %v3764_v26 = vadd.f32 %v3763_v5, %v3701_v50  ;;  %v6242_v50 = vsub.f32 %v5937_v47, %v6046_v45  ;;  %v3790_v32 = vadd.f32 %v3789_v49, %v3726_v2  ;;  %v3705_v47 = vmul.f32 %v6230_v20, %v6230_v20 }
 0x6d2   : > { %7280 = vst [vmem:[#allocation14_spill] sm:$0xff] %v6260_v16  ;;  %v6272_v2 = vsub.f32 %v5892_v21, %v6092_v9  ;;  %v3730_v21 = vmul.f32 %v6260_v16, %v6260_v16 }
 0x6d3   : > { %v3765_v27 = vadd.f32 %v3764_v26, %v3702_v52  ;;  %v6254_v52 = vsub.f32 %v5940_v51, %v6046_v45  ;;  %v3791_v11 = vadd.f32 %v3790_v32, %v3727_v25  ;;  %v3706_v51 = vmul.f32 %v6242_v50, %v6242_v50 }
 0x6d4   : > { %7281 = vst [vmem:[#allocation6_spill] sm:$0xff] %v6272_v2  ;;  %v6284_v25 = vsub.f32 %v5900_v38, %v6092_v9  ;;  %v3731_v38 = vmul.f32 %v6272_v2, %v6272_v2 }
 0x6d5   : > { %v3766_v5 = vadd.f32 %v3765_v27, %v3703_v36  ;;  %v6266_v36 = vsub.f32 %v5947_v19, %v6046_v45  ;;  %v3792_v49 = vadd.f32 %v3791_v11, %v3728_v55  ;;  %v3707_v19 = vmul.f32 %v6254_v52, %v6254_v52 }
 0x6d6   : > { %7282 = vst [vmem:[#allocation8_spill] sm:$0xff] %v6284_v25  ;;  %v6296_v55 = vsub.f32 %v5912_v13, %v6092_v9  ;;  %v3732_v13 = vmul.f32 %v6284_v25, %v6284_v25 }
 0x6d7   : > { %v3767_v26 = vadd.f32 %v3766_v5, %v3704_v60  ;;  %v6278_v60 = vsub.f32 %v5964_v33, %v6046_v45  ;;  %v3793_v32 = vadd.f32 %v3792_v49, %v3729_v31  ;;  %v3708_v33 = vmul.f32 %v6266_v36, %v6266_v36 }
 0x6d8   : > { %7283 = vst [vmem:[#allocation13_spill] sm:$0xff] %v6296_v55  ;;  %v6308_v31 = vsub.f32 %v5920_v41, %v6092_v9  ;;  %v3733_v41 = vmul.f32 %v6296_v55, %v6296_v55 }
 0x6d9   : > { %v3768_v27 = vadd.f32 %v3767_v26, %v3705_v47  ;;  %v6290_v47 = vsub.f32 %v5969_v24, %v6046_v45  ;;  %v3794_v11 = vadd.f32 %v3793_v32, %v3730_v21  ;;  %v3709_v24 = vmul.f32 %v6278_v60, %v6278_v60  ;;  %v7286_v32 = vld [vmem:[#allocation16_spill] sm:$0xff] }
 0x6da   : > { %7284 = vst [vmem:[#allocation7_spill] sm:$0xff] %v6308_v31  ;;  %v6320_v2 = vsub.f32 %v7286_v32, %v6092_v9  ;;  %v7290_v32 = vld [vmem:[#allocation17_spill] sm:$0xff] }
 0x6db   : > { %v3769_v5 = vadd.f32 %v3768_v27, %v3706_v51  ;;  %v6302_v51 = vsub.f32 %v5972_v48, %v6046_v45  ;;  %v3795_v49 = vadd.f32 %v3794_v11, %v3731_v38  ;;  %v3710_v48 = vmul.f32 %v6290_v47, %v6290_v47 }
 0x6dc   : > { %v6338_v55 = vsub.f32 %v7290_v32, %v6046_v45  ;;  %v7294_v32 = vld [vmem:[#allocation21_spill] sm:$0xff] }
 0x6dd   : > { %v3770_v26 = vadd.f32 %v3769_v5, %v3707_v19  ;;  %v7285_v19 = vld [vmem:[#allocation23_spill] sm:$0xff]  ;;  %v3711_v38 = vmul.f32 %v6302_v51, %v6302_v51  ;;  %v6356_v18 = vsub.f32 %v7294_v32, %v6092_v9 }
 0x6de   : > { %v6314_v5 = vsub.f32 %v7285_v19, %v6046_v45  ;;  %7287 = vst [vmem:[#allocation23_spill] sm:$0xff] %v6320_v2  ;;  %v7288_v19 = vld [vmem:[#allocation18_spill] sm:$0xff] }
 0x6df   : > { %v3771_v27 = vadd.f32 %v3770_v26, %v3708_v33  ;;  %v3796_v33 = vadd.f32 %v3795_v49, %v3732_v13  ;;  %v6326_v26 = vsub.f32 %v5996_v12, %v6046_v45  ;;  %v6332_v25 = vsub.f32 %v7288_v19, %v6092_v9  ;;  %v7291_v49 = vld [vmem:[#allocation20_spill] sm:$0xff]  ;;  %v7293_v19 = vld [vmem:[#allocation19_spill] sm:$0xff]  ;;  %7295 = vst [vmem:[#allocation17_spill] sm:$0xff] %v6356_v18 }
 0x6e0   : > { %v3712_v12 = vmul.f32 %v6314_v5, %v6314_v5  ;;  %v6344_v16 = vsub.f32 %v7291_v49, %v6092_v9  ;;  %v7296_v49 = vld [vmem:[#allocation5_spill] sm:$0xff] }
 0x6e1   : > { %v3772_v21 = vadd.f32 %v3771_v27, %v3709_v24  ;;  %7289 = vst [vmem:[#allocation16_spill] sm:$0xff] %v6332_v25  ;;  %v3734_v24 = vmul.f32 %v6308_v31, %v6308_v31  ;;  %v3797_v27 = vadd.f32 %v3796_v33, %v3733_v41  ;;  %v6350_v31 = vsub.f32 %v7293_v19, %v6046_v45  ;;  %v7297_v19 = vld [vmem:[#allocation22_spill] sm:$0xff] }
 0x6e2   : > { %7292 = vst [vmem:[#allocation18_spill] sm:$0xff] %v6344_v16  ;;  %v3713_v41 = vmul.f32 %v6326_v26, %v6326_v26  ;;  %v6368_v62 = vsub.f32 %v7297_v19, %v6092_v9 }
 0x6e3   : > { %v3773_v11 = vadd.f32 %v3772_v21, %v3710_v48  ;;  %v3735_v48 = vmul.f32 %v6320_v2, %v6320_v2  ;;  %v3798_v21 = vadd.f32 %v3797_v27, %v3734_v24  ;;  %v6362_v2 = vsub.f32 %v7296_v49, %v6046_v45 }
 0x6e4   : > { %v3714_v24 = vmul.f32 %v6338_v55, %v6338_v55  ;;  %v3715_v32 = vmul.f32 %v6350_v31, %v6350_v31  ;;  %v3738_v49 = vmul.f32 %v6356_v18, %v6356_v18 }
 0x6e5   : > { %v3774_v13 = vadd.f32 %v3773_v11, %v3711_v38  ;;  %v3736_v38 = vmul.f32 %v6332_v25, %v6332_v25  ;;  %v3799_v11 = vadd.f32 %v3798_v21, %v3735_v48  ;;  %v7298_v21 = vld [vmem:[#allocation24_spill] sm:$0xff]  ;;  %v7300_v25 = vld [vmem:[#allocation26_spill] sm:$0xff] }
 0x6e6   : > { %v6376_v45 = vsub.f32 %v7298_v21, %v6092_v9 }
 0x6e7   : > { %v3775_v33 = vadd.f32 %v3774_v13, %v3712_v12  ;;  %v3737_v12 = vmul.f32 %v6344_v16, %v6344_v16  ;;  %v3800_v13 = vadd.f32 %v3799_v11, %v3736_v38  ;;  %v6384_v16 = vsub.f32 %v7300_v25, %v6092_v9 }
 0x6e8   : > { %7299 = vst [vmem:[#allocation20_spill] sm:$0xff] %v6376_v45  ;;  %v3739_v38 = vmul.f32 %v6368_v62, %v6368_v62 }
 0x6e9   : > { %v3776_v27 = vadd.f32 %v3775_v33, %v3713_v41  ;;  %v3801_v41 = vadd.f32 %v3800_v13, %v3737_v12  ;;  %v3716_v33 = vmul.f32 %v6362_v2, %v6362_v2  ;;  %7301 = vst [vmem:[#allocation19_spill] sm:$0xff] %v6384_v16  ;;  %v3740_v12 = vmul.f32 %v6376_v45, %v6376_v45 }
 0x6ea   : > { %v3741_v25 = vmul.f32 %v6384_v16, %v6384_v16 }
 0x6eb   : > { %v3777_v48 = vadd.f32 %v3776_v27, %v3714_v24  ;;  %v3802_v11 = vadd.f32 %v3801_v41, %v3738_v49  ;;  %v7302_v27 = vld [vmem:[#allocation25_spill] sm:$0xff]  ;;  %v7306_v49 = vld [vmem:[#allocation10_spill] sm:$0xff] }
 0x6ec   : > { %v6390_v21 = vsub.f32 %v7302_v27, %v6092_v9  ;;  %v6402_v41 = vsub.f32 %v7306_v49, %v6092_v9  ;;  %v7308_v27 = vld [vmem:[#allocation28_spill] sm:$0xff]  ;;  %v7312_v49 = vld [vmem:[#allocation29_spill] sm:$0xff] }
 0x6ed   : > { %v3778_v19 = vadd.f32 %v3777_v48, %v3715_v32  ;;  %v3803_v13 = vadd.f32 %v3802_v11, %v3739_v38  ;;  %v7304_v32 = vld [vmem:[#allocation9_spill] sm:$0xff]  ;;  %v6408_v38 = vsub.f32 %v7308_v27, %v6092_v9  ;;  %v7314_v27 = vld [vmem:[#allocation12_spill] sm:$0xff] }
 0x6ee   : > { %7303 = vst [vmem:[#allocation21_spill] sm:$0xff] %v6390_v21  ;;  %v6396_v48 = vsub.f32 %v7304_v32, %v6092_v9  ;;  %7307 = vst [vmem:[#allocation22_spill] sm:$0xff] %v6402_v41  ;;  %v7310_v32 = vld [vmem:[#allocation27_spill] sm:$0xff] }
 0x6ef   : > { %v3779_v24 = vadd.f32 %v3778_v19, %v3716_v33  ;;  %v3804_v18 = vadd.f32 %v3803_v13, %v3740_v12  ;;  %v3742_v33 = vmul.f32 %v6390_v21, %v6390_v21  ;;  %7309 = vst [vmem:[#allocation24_spill] sm:$0xff] %v6408_v38  ;;  %v6414_v16 = vsub.f32 %v7310_v32, %v6092_v9 }
 0x6f0   : > { %7305 = vst [vmem:[#allocation5_spill] sm:$0xff] %v6396_v48  ;;  %v3743_v11 = vmul.f32 %v6396_v48, %v6396_v48  ;;  %v3744_v12 = vmul.f32 %v6402_v41, %v6402_v41  ;;  %v6420_v21 = vsub.f32 %v7312_v49, %v6092_v9  ;;  %v6426_v48 = vsub.f32 %v7314_v27, %v6092_v9 }
 0x6f1   : > { %3780 = vadd.xlane.f32.xlu1 %v3779_v24  ;;  %v3805_v19 = vadd.f32 %v3804_v18, %v3741_v25  ;;  %7311 = vst [vmem:[#allocation26_spill] sm:$0xff] %v6414_v16  ;;  %v3745_v18 = vmul.f32 %v6408_v38, %v6408_v38 }
 0x6f2   : > { %7313 = vst [vmem:[#allocation25_spill] sm:$0xff] %v6420_v21  ;;  %7315 = vst [vmem:[#allocation9_spill] sm:$0xff] %v6426_v48  ;;  %v3747_v32 = vmul.f32 %v6420_v21, %v6420_v21 }
 0x6f3   : > { %v3806_v24 = vadd.f32 %v3805_v19, %v3742_v33  ;;  %v3746_v33 = vmul.f32 %v6414_v16, %v6414_v16 }
 0x6f5   : > { %v3807_v13 = vadd.f32 %v3806_v24, %v3743_v11  ;;  %v3748_v24 = vmul.f32 %v6426_v48, %v6426_v48 }
 0x6f7   : > { %v3808_v25 = vadd.f32 %v3807_v13, %v3744_v12 }
 0x6f9   : > { %v3809_v19 = vadd.f32 %v3808_v25, %v3745_v18 }
 0x6fb   : > { %v3810_v11 = vadd.f32 %v3809_v19, %v3746_v33 }
 0x6fd   : > { %v3811_v49 = vadd.f32 %v3810_v11, %v3747_v32 }
 0x6ff   : > { %v3812_v41 = vadd.f32 %v3811_v49, %v3748_v24 }
 0x701   : > { %3813 = vadd.xlane.f32.xlu0 %v3812_v41 }
 0x77a   : > { %v3781_v38 = vpop.xlane.xlu1 %3780 }
 0x77b   : > { %v3815_v12 = vmul.f32 %v6031_v7, %v3781_v38 }
 0x77d   : > { %v3817_v27 = vsel %vm1705_vm2, %v3815_v12, 0.0 }
 0x78a   : > { %v3814_v13 = vpop.xlane.xlu0 %3813 }
 0x78b   : > { %v3816_v9 = vmul.f32 %v6037_v6, %v3814_v13  ;;  %v4522_v13 = vmov 2  }
 0x78c   : > { %4448 = vset.pattern.permute.xlu1 %v4522_v13  ;;  %4449 = vset.pattern.permute.xlu0 %v4522_v13 }
 0x78d   : > { %v3818_v18 = vsel %vm1705_vm2, %v3816_v9, 0.0  ;;  %v4523_v9 = vmov 3  }
 0x78e   : > { %v3819_v25 = vadd.f32 %v3818_v18, %v3817_v27 }
 0x790   : > { %v3820_v16 = vrot.slane %v3819_v25, 4 }
 0x792   : > { %v3821_v21 = vadd.f32 %v3820_v16, %v3819_v25 }
 0x794   : > { %v3822_v33 = vrot.slane %v3821_v21, 2 }
 0x796   : > { %v3823_v19 = vadd.f32 %v3822_v33, %v3821_v21 }
 0x798   : > { %v3824_v45 = vrot.slane %v3823_v19, 1 }
 0x79a   : > { %v3825_v48 = vadd.f32 %v3824_v45, %v3823_v19  ;;  %v4476_v45 = vld [vmem:[%s7101_s4 + $0x8] sm:$0xff] }
 0x79c   : > { %v3826_v32 = vmul.f32 3.0517578e-05, %v3825_v48 }
 0x79e   : > { %v3827_v11 = vadd.f32 1e-05, %v3826_v32 }
 0x7a0   : > { %4470 = vrsqrt.f32 %v3827_v11 }
 0x7ad   : > { %v4471_v41 = vpop.eup %4470 }
 0x7ae   : > { %v3830_v38 = vmul.f32 %v6037_v6, %v4471_v41  ;;  %v3829_v24 = vmul.f32 %v6031_v7, %v4471_v41  ;;  %v4477_v7 = vld [vmem:[%s7101_s4] sm:$0xff] }
 0x7b0   : > { %v3834_v49 = vsel %vm1705_vm2, %v3830_v38, 0.0  ;;  %v3831_v12 = vsel %vm1705_vm2, %v3829_v24, 0.0 }
 0x7b1   : > { %3835 = vadd.xlane.f32.xlu0 %v3834_v49  ;;  %3832 = vadd.xlane.f32.xlu1 %v3831_v12 }
 0x83a   : > { %v3836_v16 = vpop.xlane.xlu0 %3835  ;;  %v3833_v21 = vpop.xlane.xlu1 %3832 }
 0x83b   : > { %v3838_v48 = vmul.f32 %v4476_v45, %v3836_v16  ;;  %v3837_v6 = vmul.f32 %v4477_v7, %v3833_v21 }
 0x83d   : > { %3846 = vperm.xlu0 %4449, %v3838_v48   ;;  %3841 = vperm.xlu1 %4448, %v3837_v6  }
 0x841   : > { %4450 = vset.pattern.permute.xlu1 %v4523_v9  ;;  %4451 = vset.pattern.permute.xlu0 %v4523_v9 }
 0x842   : > { %3914 = vperm.xlu1 %4450, %v4477_v7  }
 0x846   : > { %3918 = vperm.xlu1 %4450, %v4476_v45  }
 0x8b8   : > { %v6448_v27 = vpop.permute.xlu0 %3846  ;;  %v3842_v33 = vpop.permute.xlu1 %3841 }
 0x8b9   : > { %v6452_v18 = vmul.f32 %v6448_v27, %v6108_v34  ;;  %v6456_v25 = vmul.f32 %v6448_v27, %v6112_v3  ;;  %v6460_v19 = vmul.f32 %v6448_v27, %v6128_v59  ;;  %v6464_v32 = vmul.f32 %v6448_v27, %v6142_v56 }
 0x8ba   : > { %v6468_v11 = vmul.f32 %v6448_v27, %v6152_v30  ;;  %v6472_v34 = vmul.f32 %v6448_v27, %v6164_v22  ;;  %v6476_v3 = vmul.f32 %v6448_v27, %v6176_v57  ;;  %v6480_v59 = vmul.f32 %v6448_v27, %v6188_v37 }
 0x8bb   : > { %v6484_v56 = vmul.f32 %v6448_v27, %v6200_v0  ;;  %v6488_v30 = vmul.f32 %v6448_v27, %v6212_v46  ;;  %v3849_v41 = vmul.f32 %v3842_v33, %v6050_v28  ;;  %v3850_v22 = vmul.f32 %v3842_v33, %v6054_v40 }
 0x8bc   : > { %7316 = vst [vmem:[#allocation10_spill] sm:$0xff] %v6480_v59  ;;  %v3851_v38 = vmul.f32 %v3842_v33, %v6058_v14  ;;  %v3852_v57 = vmul.f32 %v3842_v33, %v6066_v39  ;;  %v3853_v24 = vmul.f32 %v3842_v33, %v6070_v42  ;;  %v3854_v37 = vmul.f32 %v3842_v33, %v6076_v8 }
 0x8bd   : > { %7317 = vst [vmem:[#allocation28_spill] sm:$0xff] %v6484_v56  ;;  %7318 = vst [vmem:[#allocation27_spill] sm:$0xff] %v6488_v30  ;;  %v3855_v49 = vmul.f32 %v3842_v33, %v6082_v10  ;;  %v3856_v0 = vmul.f32 %v3842_v33, %v6088_v35  ;;  %v3857_v12 = vmul.f32 %v3842_v33, %v6096_v61  ;;  %v3915_v13 = vpop.permute.xlu1 %3914 }
 0x8be   : > { %v3858_v46 = vmul.f32 %v3842_v33, %v6102_v58  ;;  %v3859_v28 = vmul.f32 %v3842_v33, %v6116_v29  ;;  %v3860_v40 = vmul.f32 %v3842_v33, %v6122_v1  ;;  %v3861_v14 = vmul.f32 %v3842_v33, %v6136_v54 }
 0x8bf   : > { %v3862_v39 = vmul.f32 %v3842_v33, %v6146_v17  ;;  %v3863_v42 = vmul.f32 %v3842_v33, %v6158_v4  ;;  %v3864_v8 = vmul.f32 %v3842_v33, %v6170_v23  ;;  %v3865_v10 = vmul.f32 %v3842_v33, %v6182_v43 }
 0x8c0   : > { %v3866_v35 = vmul.f32 %v3842_v33, %v6194_v53  ;;  %v3867_v61 = vmul.f32 %v3842_v33, %v6206_v44  ;;  %v3868_v58 = vmul.f32 %v3842_v33, %v6218_v15  ;;  %v3869_v29 = vmul.f32 %v3842_v33, %v6230_v20 }
 0x8c1   : > { %v3870_v1 = vmul.f32 %v3842_v33, %v6242_v50  ;;  %v3871_v54 = vmul.f32 %v3842_v33, %v6254_v52  ;;  %v3872_v17 = vmul.f32 %v3842_v33, %v6266_v36  ;;  %v3873_v4 = vmul.f32 %v3842_v33, %v6278_v60 }
 0x8c2   : > { %v3874_v23 = vmul.f32 %v3842_v33, %v6290_v47  ;;  %v3875_v43 = vmul.f32 %v3842_v33, %v6302_v51  ;;  %v3876_v53 = vmul.f32 %v3842_v33, %v6314_v5  ;;  %v3877_v44 = vmul.f32 %v3842_v33, %v6326_v26 }
 0x8c3   : > { %v3878_v15 = vmul.f32 %v3842_v33, %v6338_v55  ;;  %v3879_v20 = vmul.f32 %v3842_v33, %v6350_v31  ;;  %v3880_v50 = vmul.f32 %v3842_v33, %v6362_v2  ;;  %v6522_v52 = vadd.f32 %v3915_v13, %v3849_v41 }
 0x8c4   : > { %v6524_v36 = vadd.f32 %v3915_v13, %v3850_v22  ;;  %v6526_v16 = vadd.f32 %v3915_v13, %v3851_v38  ;;  %v6528_v60 = vadd.f32 %v3915_v13, %v3852_v57  ;;  %v6530_v47 = vadd.f32 %v3915_v13, %v3853_v24 }
 0x8c5   : > { %v6532_v51 = vadd.f32 %v3915_v13, %v3854_v37  ;;  %v6534_v5 = vadd.f32 %v3915_v13, %v3855_v49  ;;  %v6536_v26 = vadd.f32 %v3915_v13, %v3856_v0  ;;  %v6538_v55 = vadd.f32 %v3915_v13, %v3857_v12 }
 0x8c6   : > { %v6540_v31 = vadd.f32 %v3915_v13, %v3858_v46  ;;  %v6542_v2 = vadd.f32 %v3915_v13, %v3859_v28  ;;  %v6544_v21 = vadd.f32 %v3915_v13, %v3860_v40  ;;  %v6546_v45 = vadd.f32 %v3915_v13, %v3861_v14 }
 0x8c7   : > { %v6548_v48 = vadd.f32 %v3915_v13, %v3862_v39  ;;  %v6550_v7 = vadd.f32 %v3915_v13, %v3863_v42  ;;  %v6552_v6 = vadd.f32 %v3915_v13, %v3864_v8  ;;  %v6554_v9 = vadd.f32 %v3915_v13, %v3865_v10 }
 0x8c8   : > { %v6556_v33 = vadd.f32 %v3915_v13, %v3866_v35  ;;  %v6558_v41 = vadd.f32 %v3915_v13, %v3867_v61  ;;  %v6560_v22 = vadd.f32 %v3915_v13, %v3868_v58  ;;  %v6562_v38 = vadd.f32 %v3915_v13, %v3869_v29 }
 0x8c9   : > { %v6564_v57 = vadd.f32 %v3915_v13, %v3870_v1  ;;  %v6566_v24 = vadd.f32 %v3915_v13, %v3871_v54  ;;  %v6568_v37 = vadd.f32 %v3915_v13, %v3872_v17  ;;  %v6570_v49 = vadd.f32 %v3915_v13, %v3873_v4 }
 0x8ca   : > { %v6572_v0 = vadd.f32 %v3915_v13, %v3874_v23  ;;  %v6574_v12 = vadd.f32 %v3915_v13, %v3875_v43  ;;  %v6576_v46 = vadd.f32 %v3915_v13, %v3876_v53  ;;  %v6579_v28 = vadd.f32 %v3915_v13, %v3877_v44 }
 0x8cb   : > { %v6581_v40 = vadd.f32 %v3915_v13, %v3878_v15  ;;  %vm3985_vm2 = vcmp.ge.f32.partialorder %v6522_v52, 0.0  ;;  %vm3986_vm3 = vcmp.ge.f32.partialorder %v6524_v36, 0.0  ;;  %vm3987_vm12 = vcmp.ge.f32.partialorder %v6526_v16, 0.0 }
 0x8cc   : > { %vm3988_vm13 = vcmp.ge.f32.partialorder %v6528_v60, 0.0  ;;  %vm3989_vm14 = vcmp.ge.f32.partialorder %v6530_v47, 0.0  ;;  %vm3990_vm15 = vcmp.ge.f32.partialorder %v6532_v51, 0.0  ;;  %vm3991_vm0 = vcmp.ge.f32.partialorder %v6534_v5, 0.0 }
 0x8cd   : > { %vm3992_vm1 = vcmp.ge.f32.partialorder %v6536_v26, 0.0  ;;  %vm3993_vm4 = vcmp.ge.f32.partialorder %v6538_v55, 0.0  ;;  %v6598_v14 = vadd.f32 %v3915_v13, %v3879_v20  ;;  %v4049_v39 = vmul.f32 0.2, %v6522_v52 }
 0x8ce   : > { %v4050_v42 = vmul.f32 0.2, %v6524_v36  ;;  %v4051_v8 = vmul.f32 0.2, %v6526_v16  ;;  %v6607_v10 = vadd.f32 %v3915_v13, %v3880_v50  ;;  %vm4000_vm11 = vcmp.ge.f32.partialorder %v6552_v6, 0.0 }
 0x8cf   : > { %vm4001_vm6 = vcmp.ge.f32.partialorder %v6554_v9, 0.0  ;;  %v4052_v35 = vmul.f32 0.2, %v6528_v60  ;;  %v4053_v61 = vmul.f32 0.2, %v6530_v47  ;;  %vm4006_vm10 = vcmp.ge.f32.partialorder %v6564_v57, 0.0 }
 0x8d0   : > { %v4054_v58 = vmul.f32 0.2, %v6532_v51  ;;  %v4055_v29 = vmul.f32 0.2, %v6534_v5  ;;  %v4056_v1 = vmul.f32 0.2, %v6536_v26  ;;  %v4113_v17 = vsel %vm3985_vm2, %v6522_v52, %v4049_v39 }
 0x8d1   : > { %v4057_v54 = vmul.f32 0.2, %v6538_v55  ;;  %vm4007_vm7 = vcmp.ge.f32.partialorder %v6566_v24, 0.0  ;;  %v4058_v13 = vmul.f32 0.2, %v6540_v31  ;;  %v4114_v43 = vsel %vm3986_vm3, %v6524_v36, %v4050_v42  ;;  %4177 = vst [vmem:[%s6596_s19] sm:$0xff] %v4113_v17 }
 0x8d2   : > { %v4059_v4 = vmul.f32 0.2, %v6542_v2  ;;  %v4060_v23 = vmul.f32 0.2, %v6544_v21  ;;  %vm4011_vm2 = vcmp.ge.f32.partialorder %v6574_v12, 0.0  ;;  %vm4013_vm8 = vcmp.ge.f32.partialorder %v6579_v28, 0.0 }
 0x8d3   : > { %vm4014_vm5 = vcmp.ge.f32.partialorder %v6581_v40, 0.0  ;;  %v4061_v53 = vmul.f32 0.2, %v6546_v45  ;;  %v4062_v44 = vmul.f32 0.2, %v6548_v48  ;;  %v4115_v20 = vsel %vm3987_vm12, %v6526_v16, %v4051_v8  ;;  %4178 = vst [vmem:[%s6596_s19 + $0x8] sm:$0xff] %v4114_v43 }
 0x8d4   : > { %v4063_v15 = vmul.f32 0.2, %v6550_v7  ;;  %vm4015_vm3 = vcmp.ge.f32.partialorder %v6598_v14, 0.0  ;;  %vm4016_vm9 = vcmp.ge.f32.partialorder %v6607_v10, 0.0  ;;  %v4064_v50 = vmul.f32 0.2, %v6552_v6 }
 0x8d5   : > { %v4065_v52 = vmul.f32 0.2, %v6554_v9  ;;  %v4066_v36 = vmul.f32 0.2, %v6556_v33  ;;  %v4116_v39 = vsel %vm3988_vm13, %v6528_v60, %v4052_v35  ;;  %4179 = vst [vmem:[%s6596_s19 + $0x10] sm:$0xff] %v4115_v20  ;;  %v4117_v17 = vsel %vm3989_vm14, %v6530_v47, %v4053_v61 }
 0x8d6   : > { %v4067_v16 = vmul.f32 0.2, %v6558_v41  ;;  %v4068_v42 = vmul.f32 0.2, %v6560_v22  ;;  %v4069_v8 = vmul.f32 0.2, %v6562_v38  ;;  %v4118_v35 = vsel %vm3990_vm15, %v6532_v51, %v4054_v58 }
 0x8d7   : > { %4180 = vst [vmem:[%s6596_s19 + $0x18] sm:$0xff] %v4116_v39  ;;  %v4070_v43 = vmul.f32 0.2, %v6564_v57  ;;  %v4071_v30 = vmul.f32 0.2, %v6566_v24  ;;  %4181 = vst [vmem:[%s6596_s19 + $0x20] sm:$0xff] %v4117_v17  ;;  %v4119_v61 = vsel %vm3991_vm0, %v6534_v5, %v4055_v29  ;;  %v4120_v58 = vsel %vm3992_vm1, %v6536_v26, %v4056_v1 }
 0x8d8   : > { %v4072_v60 = vmul.f32 0.2, %v6568_v37  ;;  %v4073_v20 = vmul.f32 0.2, %v6570_v49  ;;  %v4074_v56 = vmul.f32 0.2, %v6572_v0  ;;  %v4121_v29 = vsel %vm3993_vm4, %v6538_v55, %v4057_v54 }
 0x8d9   : > { %v4075_v47 = vmul.f32 0.2, %v6574_v12  ;;  %4182 = vst [vmem:[%s6596_s19 + $0x28] sm:$0xff] %v4118_v35  ;;  %v4076_v39 = vmul.f32 0.2, %v6576_v46  ;;  %4183 = vst [vmem:[%s6596_s19 + $0x30] sm:$0xff] %v4119_v61 }
 0x8da   : > { %v4077_v59 = vmul.f32 0.2, %v6579_v28  ;;  %v4078_v51 = vmul.f32 0.2, %v6581_v40  ;;  %v4079_v17 = vmul.f32 0.2, %v6598_v14 }
 0x8db   : > { %v4080_v5 = vmul.f32 0.2, %v6607_v10  ;;  %vm7319_vm12 = vcmp.ge.f32.partialorder %v6540_v31, 0.0  ;;  %4184 = vst [vmem:[%s6596_s19 + $0x38] sm:$0xff] %v4120_v58  ;;  %vm7320_vm13 = vcmp.ge.f32.partialorder %v6542_v2, 0.0  ;;  %vm7321_vm14 = vcmp.ge.f32.partialorder %v6544_v21, 0.0 }
 0x8dc   : > { %v4122_v35 = vsel %vm7319_vm12, %v6540_v31, %v4058_v13  ;;  %v4123_v26 = vsel %vm7320_vm13, %v6542_v2, %v4059_v4  ;;  %v4124_v1 = vsel %vm7321_vm14, %v6544_v21, %v4060_v23  ;;  %vm7322_vm15 = vcmp.ge.f32.partialorder %v6546_v45, 0.0  ;;  %4185 = vst [vmem:[%s6596_s19 + $0x40] sm:$0xff] %v4121_v29  ;;  %v7336_v54 = vld [vmem:[#allocation6_spill] sm:$0xff]  ;;  %v7337_v4 = vld [vmem:[#allocation8_spill] sm:$0xff]  ;;  %v7338_v23 = vld [vmem:[#allocation13_spill] sm:$0xff] }
 0x8dd   : > { %v4125_v61 = vsel %vm7322_vm15, %v6546_v45, %v4061_v53  ;;  %vm7323_vm0 = vcmp.ge.f32.partialorder %v6548_v48, 0.0  ;;  %4186 = vst [vmem:[%s6596_s19 + $0x48] sm:$0xff] %v4122_v35  ;;  %vm7324_vm1 = vcmp.ge.f32.partialorder %v6550_v7, 0.0  ;;  %v4128_v2 = vsel %vm4000_vm11, %v6552_v6, %v4064_v50  ;;  %4187 = vst [vmem:[%s6596_s19 + $0x50] sm:$0xff] %v4123_v26  ;;  %v7339_v53 = vld [vmem:[#allocation7_spill] sm:$0xff]  ;;  %v7347_v29 = vld [vmem:[#allocation5_spill] sm:$0xff] }
 0x8de   : > { %v4126_v55 = vsel %vm7323_vm0, %v6548_v48, %v4062_v44  ;;  %v4127_v31 = vsel %vm7324_vm1, %v6550_v7, %v4063_v15  ;;  %v4129_v21 = vsel %vm4001_vm6, %v6554_v9, %v4065_v52  ;;  %vm7325_vm4 = vcmp.ge.f32.partialorder %v6556_v33, 0.0  ;;  %4188 = vst [vmem:[%s6596_s19 + $0x58] sm:$0xff] %v4124_v1  ;;  %4189 = vst [vmem:[%s6596_s19 + $0x60] sm:$0xff] %v4125_v61  ;;  %v7340_v15 = vld [vmem:[#allocation23_spill] sm:$0xff]  ;;  %v7341_v52 = vld [vmem:[#allocation16_spill] sm:$0xff] }
 0x8df   : > { %v4130_v45 = vsel %vm7325_vm4, %v6556_v33, %v4066_v36  ;;  %4190 = vst [vmem:[%s6596_s19 + $0x68] sm:$0xff] %v4126_v55  ;;  %vm7326_vm12 = vcmp.ge.f32.partialorder %v6558_v41, 0.0  ;;  %vm7327_vm11 = vcmp.ge.f32.partialorder %v6560_v22, 0.0  ;;  %vm7328_vm6 = vcmp.ge.f32.partialorder %v6562_v38, 0.0  ;;  %4191 = vst [vmem:[%s6596_s19 + $0x70] sm:$0xff] %v4127_v31  ;;  %v7348_v26 = vld [vmem:[#allocation22_spill] sm:$0xff] }
 0x8e0   : > { %v4131_v48 = vsel %vm7326_vm12, %v6558_v41, %v4067_v16  ;;  %v4132_v7 = vsel %vm7327_vm11, %v6560_v22, %v4068_v42  ;;  %v4133_v6 = vsel %vm7328_vm6, %v6562_v38, %v4069_v8  ;;  %v4134_v9 = vsel %vm4006_vm10, %v6564_v57, %v4070_v43  ;;  %4192 = vst [vmem:[%s6596_s19 + $0x78] sm:$0xff] %v4128_v2  ;;  %v7342_v16 = vld [vmem:[#allocation18_spill] sm:$0xff]  ;;  %v7343_v8 = vld [vmem:[#allocation17_spill] sm:$0xff]  ;;  %v7349_v61 = vld [vmem:[#allocation24_spill] sm:$0xff] }
 0x8e1   : > { %4193 = vst [vmem:[%s6596_s19 + $0x80] sm:$0xff] %v4129_v21  ;;  %4194 = vst [vmem:[%s6596_s19 + $0x88] sm:$0xff] %v4130_v45  ;;  %v4135_v33 = vsel %vm4007_vm7, %v6566_v24, %v4071_v30  ;;  %vm7329_vm13 = vcmp.ge.f32.partialorder %v6568_v37, 0.0  ;;  %vm7330_vm14 = vcmp.ge.f32.partialorder %v6570_v49, 0.0  ;;  %vm7331_vm10 = vcmp.ge.f32.partialorder %v6572_v0, 0.0  ;;  %v7351_v2 = vld [vmem:[#allocation25_spill] sm:$0xff] }
 0x8e2   : > { %v4136_v41 = vsel %vm7329_vm13, %v6568_v37, %v4072_v60  ;;  %v4137_v22 = vsel %vm7330_vm14, %v6570_v49, %v4073_v20  ;;  %v4138_v38 = vsel %vm7331_vm10, %v6572_v0, %v4074_v56  ;;  %4195 = vst [vmem:[%s6596_s19 + $0x90] sm:$0xff] %v4131_v48  ;;  %4196 = vst [vmem:[%s6596_s19 + $0x98] sm:$0xff] %v4132_v7  ;;  %vm7332_vm7 = vcmp.ge.f32.partialorder %v6576_v46, 0.0  ;;  %v7333_v49 = vld [vmem:[#allocation15_spill] sm:$0xff]  ;;  %v7344_v20 = vld [vmem:[#allocation20_spill] sm:$0xff] }
 0x8e3   : > { %4197 = vst [vmem:[%s6596_s19 + $0xa0] sm:$0xff] %v4133_v6  ;;  %4198 = vst [vmem:[%s6596_s19 + $0xa8] sm:$0xff] %v4134_v9  ;;  %v4139_v30 = vsel %vm4011_vm2, %v6574_v12, %v4075_v47  ;;  %v4140_v57 = vsel %vm7332_vm7, %v6576_v46, %v4076_v39  ;;  %v4141_v56 = vsel %vm4013_vm8, %v6579_v28, %v4077_v59  ;;  %v7334_v46 = vld [vmem:[#allocation11_spill] sm:$0xff]  ;;  %v3919_v39 = vpop.permute.xlu1 %3918  ;;  %v7352_v45 = vld [vmem:[#allocation9_spill] sm:$0xff] }
 0x8e4   : > { %v4142_v24 = vsel %vm4014_vm5, %v6581_v40, %v4078_v51  ;;  %4199 = vst [vmem:[%s6596_s19 + $0xb0] sm:$0xff] %v4135_v33  ;;  %4200 = vst [vmem:[%s6596_s19 + $0xb8] sm:$0xff] %v4136_v41  ;;  %v3891_v37 = vmul.f32 %v6448_v27, %v6224_v63  ;;  %v3892_v0 = vmul.f32 %v6448_v27, %v7333_v49  ;;  %v7335_v40 = vld [vmem:[#allocation14_spill] sm:$0xff]  ;;  %v7345_v51 = vld [vmem:[#allocation19_spill] sm:$0xff] }
 0x8e5   : > { %4201 = vst [vmem:[%s6596_s19 + $0xc0] sm:$0xff] %v4137_v22  ;;  %4202 = vst [vmem:[%s6596_s19 + $0xc8] sm:$0xff] %v4138_v38  ;;  %v4143_v59 = vsel %vm4015_vm3, %v6598_v14, %v4079_v17  ;;  %v4144_v12 = vsel %vm4016_vm9, %v6607_v10, %v4080_v5  ;;  %v3893_v28 = vmul.f32 %v6448_v27, %v7334_v46  ;;  %v7346_v17 = vld [vmem:[#allocation21_spill] sm:$0xff] }
 0x8e6   : > { %4203 = vst [vmem:[%s6596_s19 + $0xd0] sm:$0xff] %v4139_v30  ;;  %4204 = vst [vmem:[%s6596_s19 + $0xd8] sm:$0xff] %v4140_v57  ;;  %v3894_v63 = vmul.f32 %v6448_v27, %v7335_v40  ;;  %v3895_v13 = vmul.f32 %v6448_v27, %v7336_v54  ;;  %v3896_v14 = vmul.f32 %v6448_v27, %v7337_v4 }
 0x8e7   : > { %4205 = vst [vmem:[%s6596_s19 + $0xe0] sm:$0xff] %v4141_v56  ;;  %4206 = vst [vmem:[%s6596_s19 + $0xe8] sm:$0xff] %v4142_v24  ;;  %v3897_v10 = vmul.f32 %v6448_v27, %v7338_v23  ;;  %v3898_v44 = vmul.f32 %v6448_v27, %v7339_v53  ;;  %v3899_v50 = vmul.f32 %v6448_v27, %v7340_v15 }
 0x8e8   : > { %4207 = vst [vmem:[%s6596_s19 + $0xf0] sm:$0xff] %v4143_v59  ;;  %4208 = vst [vmem:[%s6596_s19 + $0xf8] sm:$0xff] %v4144_v12  ;;  %v3900_v36 = vmul.f32 %v6448_v27, %v7341_v52  ;;  %v3901_v42 = vmul.f32 %v6448_v27, %v7342_v16  ;;  %v3902_v43 = vmul.f32 %v6448_v27, %v7343_v8 }
 0x8e9   : > { %v3903_v60 = vmul.f32 %v6448_v27, %v6368_v62  ;;  %v3904_v47 = vmul.f32 %v6448_v27, %v7344_v20  ;;  %v3905_v58 = vmul.f32 %v6448_v27, %v7345_v51  ;;  %v3906_v5 = vmul.f32 %v6448_v27, %v7346_v17  ;;  %v7350_v62 = vld [vmem:[#allocation26_spill] sm:$0xff] }
 0x8ea   : > { %v3907_v35 = vmul.f32 %v6448_v27, %v7347_v29  ;;  %v3908_v1 = vmul.f32 %v6448_v27, %v7348_v26  ;;  %v3909_v55 = vmul.f32 %v6448_v27, %v7349_v61  ;;  %v3910_v31 = vmul.f32 %v6448_v27, %v7350_v62 }
 0x8eb   : > { %v3911_v21 = vmul.f32 %v6448_v27, %v7351_v2  ;;  %v3912_v48 = vmul.f32 %v6448_v27, %v7352_v45  ;;  %v6829_v7 = vadd.f32 %v3919_v39, %v6452_v18  ;;  %v6832_v6 = vadd.f32 %v3919_v39, %v6456_v25  ;;  %v7353_v18 = vld [vmem:[#allocation10_spill] sm:$0xff]  ;;  %v7354_v25 = vld [vmem:[#allocation28_spill] sm:$0xff] }
 0x8ec   : > { %v6835_v9 = vadd.f32 %v3919_v39, %v6460_v19  ;;  %v6838_v33 = vadd.f32 %v3919_v39, %v6464_v32  ;;  %v6841_v41 = vadd.f32 %v3919_v39, %v6468_v11  ;;  %v6844_v22 = vadd.f32 %v3919_v39, %v6472_v34  ;;  %v7355_v19 = vld [vmem:[#allocation27_spill] sm:$0xff] }
 0x8ed   : > { %v6847_v27 = vadd.f32 %v3919_v39, %v6476_v3  ;;  %v6850_v38 = vadd.f32 %v3919_v39, %v7353_v18  ;;  %v6853_v30 = vadd.f32 %v3919_v39, %v7354_v25  ;;  %v6856_v57 = vadd.f32 %v3919_v39, %v7355_v19 }
 0x8ee   : > { %v6858_v32 = vadd.f32 %v3919_v39, %v3891_v37  ;;  %v6860_v56 = vadd.f32 %v3919_v39, %v3892_v0  ;;  %v6862_v11 = vadd.f32 %v3919_v39, %v3893_v28  ;;  %v6864_v34 = vadd.f32 %v3919_v39, %v3894_v63 }
 0x8ef   : > { %v6866_v24 = vadd.f32 %v3919_v39, %v3895_v13  ;;  %v6868_v3 = vadd.f32 %v3919_v39, %v3896_v14  ;;  %v6870_v49 = vadd.f32 %v3919_v39, %v3897_v10  ;;  %v6872_v59 = vadd.f32 %v3919_v39, %v3898_v44 }
 0x8f0   : > { %v6874_v12 = vadd.f32 %v3919_v39, %v3899_v50  ;;  %v6876_v46 = vadd.f32 %v3919_v39, %v3900_v36  ;;  %v6878_v37 = vadd.f32 %v3919_v39, %v3901_v42  ;;  %v6880_v0 = vadd.f32 %v3919_v39, %v3902_v43 }
 0x8f1   : > { %v6882_v28 = vadd.f32 %v3919_v39, %v3903_v60  ;;  %v6884_v40 = vadd.f32 %v3919_v39, %v3904_v47  ;;  %v6886_v63 = vadd.f32 %v3919_v39, %v3905_v58  ;;  %v6888_v54 = vadd.f32 %v3919_v39, %v3906_v5 }
 0x8f2   : > { %v6890_v13 = vadd.f32 %v3919_v39, %v3907_v35  ;;  %v6892_v4 = vadd.f32 %v3919_v39, %v3908_v1  ;;  %v6894_v14 = vadd.f32 %v3919_v39, %v3909_v55  ;;  %v6896_v23 = vadd.f32 %v3919_v39, %v3910_v31 }
 0x8f3   : > { %vm4017_vm5 = vcmp.ge.f32.partialorder %v6829_v7, 0.0  ;;  %vm4018_vm8 = vcmp.ge.f32.partialorder %v6832_v6, 0.0  ;;  %vm4019_vm9 = vcmp.ge.f32.partialorder %v6835_v9, 0.0  ;;  %vm4020_vm2 = vcmp.ge.f32.partialorder %v6838_v33, 0.0 }
 0x8f4   : > { %vm4021_vm3 = vcmp.ge.f32.partialorder %v6841_v41, 0.0  ;;  %vm4022_vm15 = vcmp.ge.f32.partialorder %v6844_v22, 0.0  ;;  %vm4023_vm0 = vcmp.ge.f32.partialorder %v6847_v27, 0.0  ;;  %vm4024_vm1 = vcmp.ge.f32.partialorder %v6850_v38, 0.0 }
 0x8f5   : > { %vm4025_vm4 = vcmp.ge.f32.partialorder %v6853_v30, 0.0  ;;  %v6908_v10 = vadd.f32 %v3919_v39, %v3911_v21  ;;  %v4081_v53 = vmul.f32 0.2, %v6829_v7  ;;  %v4082_v44 = vmul.f32 0.2, %v6832_v6 }
 0x8f6   : > { %v4083_v15 = vmul.f32 0.2, %v6835_v9  ;;  %v6917_v50 = vadd.f32 %v3919_v39, %v3912_v48  ;;  %vm4032_vm7 = vcmp.ge.f32.partialorder %v6868_v3, 0.0  ;;  %vm4033_vm11 = vcmp.ge.f32.partialorder %v6870_v49, 0.0 }
 0x8f7   : > { %v4084_v52 = vmul.f32 0.2, %v6838_v33  ;;  %v4085_v36 = vmul.f32 0.2, %v6841_v41  ;;  %v4086_v16 = vmul.f32 0.2, %v6844_v22  ;;  %v4145_v60 = vsel %vm4017_vm5, %v6829_v7, %v4081_v53 }
 0x8f8   : > { %vm4038_vm10 = vcmp.ge.f32.partialorder %v6880_v0, 0.0  ;;  %v4087_v42 = vmul.f32 0.2, %v6847_v27  ;;  %v4088_v8 = vmul.f32 0.2, %v6850_v38  ;;  %vm4039_vm6 = vcmp.ge.f32.partialorder %v6882_v28, 0.0 }
 0x8f9   : > { %v4089_v43 = vmul.f32 0.2, %v6853_v30  ;;  %v4090_v20 = vmul.f32 0.2, %v6856_v57  ;;  %v4091_v47 = vmul.f32 0.2, %v6858_v32  ;;  %v4146_v51 = vsel %vm4018_vm8, %v6832_v6, %v4082_v44 }
 0x8fa   : > { %v4092_v39 = vmul.f32 0.2, %v6860_v56  ;;  %4209 = vst [vmem:[%s6596_s19 + $0x100] sm:$0xff] %v4145_v60  ;;  %vm4043_vm5 = vcmp.ge.f32.partialorder %v6890_v13, 0.0  ;;  %vm4045_vm13 = vcmp.ge.f32.partialorder %v6894_v14, 0.0  ;;  %vm4046_vm12 = vcmp.ge.f32.partialorder %v6896_v23, 0.0 }
 0x8fb   : > { %v4093_v58 = vmul.f32 0.2, %v6862_v11  ;;  %v4094_v17 = vmul.f32 0.2, %v6864_v34  ;;  %v4095_v5 = vmul.f32 0.2, %v6866_v24  ;;  %v4147_v29 = vsel %vm4019_vm9, %v6835_v9, %v4083_v15 }
 0x8fc   : > { %4210 = vst [vmem:[%s6596_s19 + $0x108] sm:$0xff] %v4146_v51  ;;  %vm4047_vm8 = vcmp.ge.f32.partialorder %v6908_v10, 0.0  ;;  %vm4048_vm14 = vcmp.ge.f32.partialorder %v6917_v50, 0.0  ;;  %v4096_v35 = vmul.f32 0.2, %v6868_v3  ;;  %v4148_v61 = vsel %vm4020_vm2, %v6838_v33, %v4084_v52  ;;  %4211 = vst [vmem:[%s6596_s19 + $0x110] sm:$0xff] %v4147_v29 }
 0x8fd   : > { %v4097_v26 = vmul.f32 0.2, %v6870_v49  ;;  %v4098_v1 = vmul.f32 0.2, %v6872_v59  ;;  %v4099_v55 = vmul.f32 0.2, %v6874_v12  ;;  %v4149_v2 = vsel %vm4021_vm3, %v6841_v41, %v4085_v36 }
 0x8fe   : > { %v4100_v62 = vmul.f32 0.2, %v6876_v46  ;;  %v4101_v31 = vmul.f32 0.2, %v6878_v37  ;;  %4212 = vst [vmem:[%s6596_s19 + $0x118] sm:$0xff] %v4148_v61  ;;  %v4150_v7 = vsel %vm4022_vm15, %v6844_v22, %v4086_v16  ;;  %4213 = vst [vmem:[%s6596_s19 + $0x120] sm:$0xff] %v4149_v2  ;;  %v4151_v41 = vsel %vm4023_vm0, %v6847_v27, %v4087_v42 }
 0x8ff   : > { %v4102_v21 = vmul.f32 0.2, %v6880_v0  ;;  %v4103_v45 = vmul.f32 0.2, %v6882_v28  ;;  %v4104_v48 = vmul.f32 0.2, %v6884_v40  ;;  %v4152_v19 = vsel %vm4024_vm1, %v6850_v38, %v4088_v8 }
 0x900   : > { %v4105_v6 = vmul.f32 0.2, %v6886_v63  ;;  %v4106_v9 = vmul.f32 0.2, %v6888_v54  ;;  %v4107_v33 = vmul.f32 0.2, %v6890_v13  ;;  %v4153_v44 = vsel %vm4025_vm4, %v6853_v30, %v4089_v43 }
 0x901   : > { %4214 = vst [vmem:[%s6596_s19 + $0x128] sm:$0xff] %v4150_v7  ;;  %v4108_v18 = vmul.f32 0.2, %v6892_v4  ;;  %v4109_v25 = vmul.f32 0.2, %v6894_v14  ;;  %4215 = vst [vmem:[%s6596_s19 + $0x130] sm:$0xff] %v4151_v41 }
 0x902   : > { %v4110_v22 = vmul.f32 0.2, %v6896_v23  ;;  %v4111_v53 = vmul.f32 0.2, %v6908_v10  ;;  %v4112_v27 = vmul.f32 0.2, %v6917_v50 }
 0x903   : > { %vm7356_vm9 = vcmp.ge.f32.partialorder %v6856_v57, 0.0  ;;  %4216 = vst [vmem:[%s6596_s19 + $0x138] sm:$0xff] %v4152_v19  ;;  %vm7357_vm2 = vcmp.ge.f32.partialorder %v6858_v32, 0.0  ;;  %vm7358_vm3 = vcmp.ge.f32.partialorder %v6860_v56, 0.0  ;;  %vm7359_vm15 = vcmp.ge.f32.partialorder %v6862_v11, 0.0  ;;  %4217 = vst [vmem:[%s6596_s19 + $0x140] sm:$0xff] %v4153_v44 }
 0x904   : > { %v4154_v15 = vsel %vm7356_vm9, %v6856_v57, %v4090_v20  ;;  %v4155_v38 = vsel %vm7357_vm2, %v6858_v32, %v4091_v47  ;;  %v4156_v52 = vsel %vm7358_vm3, %v6860_v56, %v4092_v39  ;;  %v4157_v36 = vsel %vm7359_vm15, %v6862_v11, %v4093_v58 }
 0x905   : > { %vm7360_vm0 = vcmp.ge.f32.partialorder %v6864_v34, 0.0  ;;  %4218 = vst [vmem:[%s6596_s19 + $0x148] sm:$0xff] %v4154_v15  ;;  %vm7361_vm1 = vcmp.ge.f32.partialorder %v6866_v24, 0.0  ;;  %v4160_v32 = vsel %vm4032_vm7, %v6868_v3, %v4096_v35  ;;  %v4161_v56 = vsel %vm4033_vm11, %v6870_v49, %v4097_v26  ;;  %4219 = vst [vmem:[%s6596_s19 + $0x150] sm:$0xff] %v4155_v38 }
 0x906   : > { %v4158_v30 = vsel %vm7360_vm0, %v6864_v34, %v4094_v17  ;;  %v4159_v57 = vsel %vm7361_vm1, %v6866_v24, %v4095_v5  ;;  %vm7362_vm4 = vcmp.ge.f32.partialorder %v6872_v59, 0.0  ;;  %4220 = vst [vmem:[%s6596_s19 + $0x158] sm:$0xff] %v4156_v52  ;;  %4221 = vst [vmem:[%s6596_s19 + $0x160] sm:$0xff] %v4157_v36  ;;  %vm7363_vm9 = vcmp.ge.f32.partialorder %v6874_v12, 0.0 }
 0x907   : > { %v4162_v11 = vsel %vm7362_vm4, %v6872_v59, %v4098_v1  ;;  %4222 = vst [vmem:[%s6596_s19 + $0x168] sm:$0xff] %v4158_v30  ;;  %v4163_v34 = vsel %vm7363_vm9, %v6874_v12, %v4099_v55  ;;  %vm7364_vm7 = vcmp.ge.f32.partialorder %v6876_v46, 0.0  ;;  %vm7365_vm11 = vcmp.ge.f32.partialorder %v6878_v37, 0.0  ;;  %4223 = vst [vmem:[%s6596_s19 + $0x170] sm:$0xff] %v4159_v57 }
 0x908   : > { %v4164_v24 = vsel %vm7364_vm7, %v6876_v46, %v4100_v62  ;;  %v4165_v3 = vsel %vm7365_vm11, %v6878_v37, %v4101_v31  ;;  %v4166_v49 = vsel %vm4038_vm10, %v6880_v0, %v4102_v21  ;;  %4224 = vst [vmem:[%s6596_s19 + $0x178] sm:$0xff] %v4160_v32  ;;  %4225 = vst [vmem:[%s6596_s19 + $0x180] sm:$0xff] %v4161_v56  ;;  %vm7366_vm2 = vcmp.ge.f32.partialorder %v6884_v40, 0.0 }
 0x909   : > { %4226 = vst [vmem:[%s6596_s19 + $0x188] sm:$0xff] %v4162_v11  ;;  %v4167_v59 = vsel %vm4039_vm6, %v6882_v28, %v4103_v45  ;;  %v4168_v12 = vsel %vm7366_vm2, %v6884_v40, %v4104_v48  ;;  %vm7367_vm3 = vcmp.ge.f32.partialorder %v6886_v63, 0.0  ;;  %vm7368_vm10 = vcmp.ge.f32.partialorder %v6888_v54, 0.0  ;;  %4227 = vst [vmem:[%s6596_s19 + $0x190] sm:$0xff] %v4163_v34 }
 0x90a   : > { %v4169_v46 = vsel %vm7367_vm3, %v6886_v63, %v4105_v6  ;;  %v4170_v37 = vsel %vm7368_vm10, %v6888_v54, %v4106_v9  ;;  %4228 = vst [vmem:[%s6596_s19 + $0x198] sm:$0xff] %v4164_v24  ;;  %4229 = vst [vmem:[%s6596_s19 + $0x1a0] sm:$0xff] %v4165_v3  ;;  %v4171_v0 = vsel %vm4043_vm5, %v6890_v13, %v4107_v33  ;;  %vm7369_vm6 = vcmp.ge.f32.partialorder %v6892_v4, 0.0 }
 0x90b   : > { %4230 = vst [vmem:[%s6596_s19 + $0x1a8] sm:$0xff] %v4166_v49  ;;  %v4172_v28 = vsel %vm7369_vm6, %v6892_v4, %v4108_v18  ;;  %v4173_v40 = vsel %vm4045_vm13, %v6894_v14, %v4109_v25  ;;  %v4174_v63 = vsel %vm4046_vm12, %v6896_v23, %v4110_v22  ;;  %4231 = vst [vmem:[%s6596_s19 + $0x1b0] sm:$0xff] %v4167_v59 }
 0x90c   : > { %4232 = vst [vmem:[%s6596_s19 + $0x1b8] sm:$0xff] %v4168_v12  ;;  %4233 = vst [vmem:[%s6596_s19 + $0x1c0] sm:$0xff] %v4169_v46  ;;  %v4175_v54 = vsel %vm4047_vm8, %v6908_v10, %v4111_v53  ;;  %v4176_v13 = vsel %vm4048_vm14, %v6917_v50, %v4112_v27 }
 0x90d   : > { %4234 = vst [vmem:[%s6596_s19 + $0x1c8] sm:$0xff] %v4170_v37  ;;  %4235 = vst [vmem:[%s6596_s19 + $0x1d0] sm:$0xff] %v4171_v0 }
 0x90e   : > { %4236 = vst [vmem:[%s6596_s19 + $0x1d8] sm:$0xff] %v4172_v28  ;;  %4237 = vst [vmem:[%s6596_s19 + $0x1e0] sm:$0xff] %v4173_v40 }
 0x90f   : > { %4238 = vst [vmem:[%s6596_s19 + $0x1e8] sm:$0xff] %v4174_v63  ;;  %4239 = vst [vmem:[%s6596_s19 + $0x1f0] sm:$0xff] %v4175_v54 }
 0x910   : > { %4240 = vst [vmem:[%s6596_s19 + $0x1f8] sm:$0xff] %v4176_v13 }
 0x911 PF: > { %s17_s21 = sadd.s32 1, %s4514_s21  }
 0x912   : > { %p14_p1 = scmp.ge.s32.totalorder %s17_s21, 4  }
 0x914   :  { %16 = sbr.rel (!%p14_p1) target bundleno = 1 (0x1), region = 79 }
 0x919   :  { %4262 = vsyncpa [#allocation3], 1 }
 0x91a   :  { %4264 = vsyncpa [#allocation3 + $0x1], 1 }

</bundles_post_ra>
